<compile_context>
chip_gen: v6e
topology: v6e:2x2x1
jax: 0.10.0
libtpu: 0.0.40
codegen_flags: <defaults>
</compile_context>

<pallas_src>
import jax
import jax.numpy as jnp
from jax.experimental import pallas as pl
from jax.experimental.pallas import tpu as pltpu  # noqa: F401  (TPU backend assumed)

# ---------------- hyperparameters (small, consistent with the module ctor) ----------------
NUM_CAT = 3
VOCAB_SIZES = [11, 7, 5]
NUM_CONT = 2
ENC_HID = 16                    # encoder_hidden_dim (per-categorical embedding width)
HIDDEN = 32                     # hidden_dim (d_model)
DFF = 64                        # dim_feedforward
OUT_DIM = 8                     # output_dim
NUM_LAYERS = 3
NHEAD = 4
HEAD_DIM = HIDDEN // NHEAD
MAX_LEN = 16                    # trainable positional-encoding table length (>= T)
LN_EPS = 1e-5

B = 2
T = 8
D_IN = NUM_CAT * ENC_HID + NUM_CONT


def _layer_norm(v, w, b):
    mu = jnp.mean(v, axis=-1, keepdims=True)
    var = jnp.mean(jnp.square(v - mu), axis=-1, keepdims=True)
    return (v - mu) * jax.lax.rsqrt(var + LN_EPS) * w + b


# -------------------------------- Pallas kernel --------------------------------
# Packed operands (all full-extent VMEM blocks; no grid needed):
#   feat_ref : (B*T, D_IN+1)  event features, last column = 1.0 (fused encoder bias)
#   mask_ref : (B*T, 1)       1.0 = keep, 0.0 = pad
#   pe_ref   : (B*T, HIDDEN)  trainable positional encoding, tiled over batch
#   wenc_ref : (D_IN+1, HIDDEN)  [w_enc ; b_enc]
#   wa_ref   : (L, HIDDEN, 3H+H+DFF)  [wqkv | wo | w1] per layer
#   w2_ref   : (L, DFF, HIDDEN)
#   vec_ref  : (L, 8, 3H)  rows = ln1w, ln1b, ln2w, ln2b, bqkv, bo, b1, b2 (lane-0 aligned)
#   pool_ref : (HIDDEN+1, OUT_DIM+1)  cols 0..OUT_DIM-1 = [wout; bout], col OUT_DIM = [watt; batt]
def bert_kernel(feat_ref, mask_ref, pe_ref, wenc_ref, wa_ref, w2_ref, vec_ref, pool_ref,
                emb_ref, out_ref):
    feat = feat_ref[...]                     # (B*T, D_IN+1)
    mask = mask_ref[...]                     # (B*T, 1)
    pe = pe_ref[...]                         # (B*T, HIDDEN)

    # Event-encoder projection (bias fused via augmented ones column), mask, PE.
    x = jnp.dot(feat, wenc_ref[...], preferred_element_type=jnp.float32)
    x = x * mask + pe                        # (B*T, HIDDEN)

    scale = 1.0 / (HEAD_DIM ** 0.5)
    for l in range(NUM_LAYERS):              # layers are sequential -> static unroll
        wa = wa_ref[l]                       # (HIDDEN, 3H | H | DFF)
        vec = vec_ref[l]                     # (8, 3H) packed per-layer vectors
        ln1w, ln1b = vec[0:1, :HIDDEN], vec[1:2, :HIDDEN]
        ln2w, ln2b = vec[2:3, :HIDDEN], vec[3:4, :HIDDEN]
        bqkv = vec[4:5, :3 * HIDDEN]
        bo = vec[5:6, :HIDDEN]
        b1 = vec[6:7, :DFF]
        b2 = vec[7:8, :HIDDEN]

        # ---- pre-LN multi-head self-attention: all B*NHEAD heads in one batch ----
        h = _layer_norm(x, ln1w, ln1b)
        qkv = jnp.dot(h, wa[:, :3 * HIDDEN],
                      preferred_element_type=jnp.float32) + bqkv          # (B*T, 3H)

        def gather_heads(base):
            # -> (NHEAD*B, T, HEAD_DIM); batch index g = head * B + b (static slices)
            return jnp.stack(
                [qkv[b * T:(b + 1) * T, base + n * HEAD_DIM: base + (n + 1) * HEAD_DIM]
                 for n in range(NHEAD) for b in range(B)], axis=0)

        q = gather_heads(0)
        k = gather_heads(HIDDEN)
        v = gather_heads(2 * HIDDEN)

        s = jnp.einsum('gqd,gkd->gqk', q, k,
                       preferred_element_type=jnp.float32) * scale        # (G, T, T)
        s = s - jnp.max(s, axis=-1, keepdims=True)
        p = jnp.exp(s)
        p = p * pl.reciprocal(jnp.sum(p, axis=-1, keepdims=True), approx=True)
        ctx = jnp.einsum('gqk,gkd->gqd', p, v,
                         preferred_element_type=jnp.float32)               # (G, T, HD)
        # back to (B*T, HIDDEN): heads concat along lanes, batches along sublanes
        ctx = jnp.concatenate(
            [jnp.concatenate([ctx[n * B + b] for n in range(NHEAD)], axis=-1)
             for b in range(B)], axis=0)                                   # (B*T, HIDDEN)

        x = x + jnp.dot(ctx, wa[:, 3 * HIDDEN:4 * HIDDEN],
                        preferred_element_type=jnp.float32) + bo

        # ---- pre-LN feed-forward ----
        h2 = _layer_norm(x, ln2w, ln2b)
        ff = jnp.maximum(
            jnp.dot(h2, wa[:, 4 * HIDDEN:4 * HIDDEN + DFF],
                    preferred_element_type=jnp.float32) + b1, 0.0)
        x = x + jnp.dot(ff, w2_ref[l], preferred_element_type=jnp.float32) + b2

    # ---- attention pooling (masked softmax over T) + output head ----
    pool = pool_ref[...]                                   # (HIDDEN+1, OUT_DIM+1)
    wout = pool[:HIDDEN, :OUT_DIM]                         # (HIDDEN, OUT_DIM)
    bout = pool[HIDDEN:HIDDEN + 1, :OUT_DIM]               # (1, OUT_DIM)
    watt = pool[:HIDDEN, OUT_DIM:OUT_DIM + 1]              # (HIDDEN, 1)
    batt = pool[HIDDEN:HIDDEN + 1, OUT_DIM:OUT_DIM + 1]    # (1, 1)

    # pooling score on the (idle) MXU instead of an XLU lane reduction
    scores = jnp.dot(x, watt, preferred_element_type=jnp.float32) + batt   # (B*T, 1)
    scores = jnp.where(mask > 0.5, scores, -1e9)

    embs = []
    for b in range(B):
        sb = scores[b * T:(b + 1) * T, :]                  # (T, 1)
        xb = x[b * T:(b + 1) * T, :]                       # (T, HIDDEN)
        sb = sb - jnp.max(sb, axis=0, keepdims=True)
        wb = jnp.exp(sb)
        wb = wb * pl.reciprocal(jnp.sum(wb, axis=0, keepdims=True), approx=True)
        embs.append(jnp.sum(wb * xb, axis=0, keepdims=True))   # (1, HIDDEN)
    emb = jnp.concatenate(embs, axis=0)                    # (B, HIDDEN)

    # dense, batch-stacked outputs written exactly once
    emb_ref[...] = emb
    out_ref[...] = jnp.dot(emb, wout, preferred_element_type=jnp.float32) + bout


# -------------------------------- wrapper --------------------------------
def _pack_params(params):
    """Pack the module weights into a small number of kernel operands."""
    wenc_aug = jnp.concatenate([params['w_enc'], params['b_enc']], axis=0)       # (D_IN+1, H)
    wa = jnp.concatenate([params['wqkv'], params['wo'], params['w1']], axis=-1)  # (L, H, 4H+DFF)

    def row(p):  # (L, 1, n) -> (L, 1, 3H), zero-padded along lanes
        return jnp.pad(p, ((0, 0), (0, 0), (0, 3 * HIDDEN - p.shape[-1])))

    vec = jnp.concatenate([row(params['ln1w']), row(params['ln1b']),
                           row(params['ln2w']), row(params['ln2b']),
                           row(params['bqkv']), row(params['bo']),
                           row(params['b1']), row(params['b2'])], axis=1)        # (L, 8, 3H)
    pool = jnp.concatenate(
        [jnp.concatenate([params['wout'], params['bout']], axis=0),              # (H+1, OUT)
         jnp.concatenate([params['watt'].reshape(HIDDEN, 1),
                          params['batt'].reshape(1, 1)], axis=0)], axis=1)       # (H+1, OUT+1)
    return wenc_aug, wa, params['w2'], vec, pool


def attention_pooling_bert(params, cat_features, cont_features, attention_mask):
    # Embedding gathers (EventEncoder categorical lookups) stay in plain JAX glue.
    embs = [params['cat_emb'][i][cat_features[:, :, i]] for i in range(NUM_CAT)]
    feat = jnp.concatenate(embs + [cont_features.astype(jnp.float32)], axis=-1)  # (B,T,D_IN)
    ones = jnp.ones((B, T, 1), jnp.float32)
    feat_aug = jnp.concatenate([feat, ones], axis=-1).reshape(B * T, D_IN + 1)   # (B*T,D_IN+1)
    mask = attention_mask.astype(jnp.float32).reshape(B * T, 1)                  # (B*T,1)
    pe = jnp.tile(params['pe'][:T], (B, 1))                                      # (B*T,H)

    wenc_aug, wa, w2, vec, pool = _pack_params(params)

    # Single invocation, no grid: everything fits comfortably in VMEM, so default
    # full-extent BlockSpecs (whole array = one VMEM block) are the correct tiling.
    # A batch grid for B=2 would only add per-step launch overhead (~0.35 us/step).
    emb, out = pl.pallas_call(
        bert_kernel,
        out_shape=(jax.ShapeDtypeStruct((B, HIDDEN), jnp.float32),
                   jax.ShapeDtypeStruct((B, OUT_DIM), jnp.float32)),
    )(feat_aug, mask, pe, wenc_aug, wa, w2, vec, pool)
    return emb, out


# -------------------------------- params & reference --------------------------------
def make_params(key):
    keys = jax.random.split(key, 20)

    def w(k, shape, scale=0.02):
        return jax.random.normal(k, shape, jnp.float32) * scale

    L = NUM_LAYERS
    p = {
        'cat_emb': [w(keys[i], (VOCAB_SIZES[i], ENC_HID)) for i in range(NUM_CAT)],
        'pe': w(keys[3], (MAX_LEN, HIDDEN)),
        'w_enc': w(keys[4], (D_IN, HIDDEN)),
        'b_enc': jnp.zeros((1, HIDDEN), jnp.float32),
        'ln1w': jnp.ones((L, 1, HIDDEN), jnp.float32),
        'ln1b': jnp.zeros((L, 1, HIDDEN), jnp.float32),
        'ln2w': jnp.ones((L, 1, HIDDEN), jnp.float32),
        'ln2b': jnp.zeros((L, 1, HIDDEN), jnp.float32),
        'wqkv': w(keys[5], (L, HIDDEN, 3 * HIDDEN)),
        'bqkv': w(keys[6], (L, 1, 3 * HIDDEN), 0.01),
        'wo': w(keys[7], (L, HIDDEN, HIDDEN)),
        'bo': w(keys[8], (L, 1, HIDDEN), 0.01),
        'w1': w(keys[9], (L, HIDDEN, DFF)),
        'b1': w(keys[10], (L, 1, DFF), 0.01),
        'w2': w(keys[11], (L, DFF, HIDDEN)),
        'b2': w(keys[12], (L, 1, HIDDEN), 0.01),
        'watt': w(keys[13], (1, HIDDEN)),
        'batt': jnp.zeros((1, 1), jnp.float32),
        'wout': w(keys[14], (HIDDEN, OUT_DIM)),
        'bout': w(keys[15], (1, OUT_DIM), 0.01),
    }
    return p


def ref_forward(params, cat_features, cont_features, attention_mask):
    embs = [params['cat_emb'][i][cat_features[:, :, i]] for i in range(NUM_CAT)]
    feat = jnp.concatenate(embs + [cont_features.astype(jnp.float32)], axis=-1)
    mask = attention_mask.astype(jnp.float32)[:, :, None]
    pe = params['pe'][:T]

    x = jnp.einsum('btd,dh->bth', feat, params['w_enc']) + params['b_enc']
    x = x * mask
    x = x + pe[None]
    for l in range(NUM_LAYERS):
        h = _layer_norm(x, params['ln1w'][l, 0], params['ln1b'][l, 0])
        qkv = jnp.einsum('bth,hk->btk', h, params['wqkv'][l]) + params['bqkv'][l]
        q, k, v = jnp.split(qkv, 3, axis=-1)
        q = q.reshape(B, T, NHEAD, HEAD_DIM)
        k = k.reshape(B, T, NHEAD, HEAD_DIM)
        v = v.reshape(B, T, NHEAD, HEAD_DIM)
        s = jnp.einsum('bqnd,bknd->bnqk', q, k) / (HEAD_DIM ** 0.5)
        a = jax.nn.softmax(s, axis=-1)
        ctx = jnp.einsum('bnqk,bknd->bqnd', a, v).reshape(B, T, HIDDEN)
        x = x + jnp.einsum('bth,hk->btk', ctx, params['wo'][l]) + params['bo'][l]
        h2 = _layer_norm(x, params['ln2w'][l, 0], params['ln2b'][l, 0])
        ff = jax.nn.relu(jnp.einsum('bth,hf->btf', h2, params['w1'][l]) + params['b1'][l])
        x = x + jnp.einsum('btf,fh->bth', ff, params['w2'][l]) + params['b2'][l]
    scores = jnp.sum(x * params['watt'], axis=-1, keepdims=True) + params['batt']
    scores = jnp.where(mask > 0.5, scores, -1e9)
    wgt = jax.nn.softmax(scores, axis=1)
    emb = jnp.sum(wgt * x, axis=1)
    out = emb @ params['wout'] + params['bout']
    return emb, out


if __name__ == "__main__":
    key = jax.random.PRNGKey(0)
    pkey, k1, k2 = jax.random.split(key, 3)
    params = make_params(pkey)

    cat_features = jnp.stack(
        [jax.random.randint(jax.random.fold_in(k1, i), (B, T), 0, VOCAB_SIZES[i])
         for i in range(NUM_CAT)], axis=-1).astype(jnp.int32)             # (B, T, NUM_CAT)
    cont_features = jax.random.normal(k2, (B, T, NUM_CONT), jnp.float32)  # (B, T, NUM_CONT)
    attention_mask = jnp.array([[1] * T, [1] * (T - 3) + [0] * 3], dtype=jnp.int32)  # (B, T)

    emb, out = attention_pooling_bert(params, cat_features, cont_features, attention_mask)
    jax.block_until_ready((emb, out))

    ref_emb, ref_out = ref_forward(params, cat_features, cont_features, attention_mask)
    assert emb.shape == (B, HIDDEN) and out.shape == (B, OUT_DIM)
    assert jnp.allclose(emb, ref_emb, atol=1e-3, rtol=1e-3)
    assert jnp.allclose(out, ref_out, atol=1e-3, rtol=1e-3)
    print("KERNEL_OK")
</pallas_src>

<mosaic_0001>
module attributes {stable_mosaic.version = 11 : i64} {
  func.func @bert_kernel(%arg0: memref<16x51xf32, #tpu.memory_space<vmem>>, %arg1: memref<16x1xf32, #tpu.memory_space<vmem>>, %arg2: memref<16x32xf32, #tpu.memory_space<vmem>>, %arg3: memref<51x32xf32, #tpu.memory_space<vmem>>, %arg4: memref<3x32x192xf32, #tpu.memory_space<vmem>>, %arg5: memref<3x64x32xf32, #tpu.memory_space<vmem>>, %arg6: memref<3x8x96xf32, #tpu.memory_space<vmem>>, %arg7: memref<33x9xf32, #tpu.memory_space<vmem>>, %arg8: memref<2x32xf32, #tpu.memory_space<vmem>>, %arg9: memref<2x8xf32, #tpu.memory_space<vmem>>) attributes {dimension_semantics = [], scalar_prefetch = 0 : i64, scratch_operands = 0 : i64, tpu.core_type = #tpu.core_type<tc>} {
    %c0 = arith.constant 0 : index
    %c0_0 = arith.constant 0 : index
    %0 = vector.load %arg0[%c0, %c0_0] : memref<16x51xf32, #tpu.memory_space<vmem>>, vector<16x51xf32>
    %c0_1 = arith.constant 0 : index
    %c0_2 = arith.constant 0 : index
    %1 = vector.load %arg1[%c0_1, %c0_2] : memref<16x1xf32, #tpu.memory_space<vmem>>, vector<16x1xf32>
    %c0_3 = arith.constant 0 : index
    %c0_4 = arith.constant 0 : index
    %2 = vector.load %arg2[%c0_3, %c0_4] : memref<16x32xf32, #tpu.memory_space<vmem>>, vector<16x32xf32>
    %c0_5 = arith.constant 0 : index
    %c0_6 = arith.constant 0 : index
    %3 = vector.load %arg3[%c0_5, %c0_6] : memref<51x32xf32, #tpu.memory_space<vmem>>, vector<51x32xf32>
    %cst = arith.constant dense<0.000000e+00> : vector<16x32xf32>
    %4 = tpu.matmul %0, %3, %cst {dimension_numbers = #tpu.dot_dimension_numbers<[1], [0], [0], [1], [0, 0, 1, 1], [], []>} : vector<16x51xf32>, vector<51x32xf32>, vector<16x32xf32> -> vector<16x32xf32>
    %5 = vector.broadcast %1 : vector<16x1xf32> to vector<16x32xf32>
    %6 = arith.mulf %4, %5 : vector<16x32xf32>
    %7 = arith.addf %6, %2 : vector<16x32xf32>
    %c0_7 = arith.constant 0 : index
    %c0_8 = arith.constant 0 : index
    %c0_9 = arith.constant 0 : index
    %8 = vector.load %arg4[%c0_7, %c0_8, %c0_9] : memref<3x32x192xf32, #tpu.memory_space<vmem>>, vector<1x32x192xf32>
    %9 = vector.shape_cast %8 : vector<1x32x192xf32> to vector<32x192xf32>
    %c0_10 = arith.constant 0 : index
    %c0_11 = arith.constant 0 : index
    %c0_12 = arith.constant 0 : index
    %10 = vector.load %arg6[%c0_10, %c0_11, %c0_12] : memref<3x8x96xf32, #tpu.memory_space<vmem>>, vector<1x8x96xf32>
    %11 = vector.shape_cast %10 : vector<1x8x96xf32> to vector<8x96xf32>
    %12 = vector.extract_strided_slice %11 {offsets = [0, 0], sizes = [1, 32], strides = [1, 1]} : vector<8x96xf32> to vector<1x32xf32>
    %13 = vector.extract_strided_slice %11 {offsets = [1, 0], sizes = [1, 32], strides = [1, 1]} : vector<8x96xf32> to vector<1x32xf32>
    %14 = vector.extract_strided_slice %11 {offsets = [2, 0], sizes = [1, 32], strides = [1, 1]} : vector<8x96xf32> to vector<1x32xf32>
    %15 = vector.extract_strided_slice %11 {offsets = [3, 0], sizes = [1, 32], strides = [1, 1]} : vector<8x96xf32> to vector<1x32xf32>
    %16 = vector.extract_strided_slice %11 {offsets = [4, 0], sizes = [1, 96], strides = [1, 1]} : vector<8x96xf32> to vector<1x96xf32>
    %17 = vector.extract_strided_slice %11 {offsets = [5, 0], sizes = [1, 32], strides = [1, 1]} : vector<8x96xf32> to vector<1x32xf32>
    %18 = vector.extract_strided_slice %11 {offsets = [6, 0], sizes = [1, 64], strides = [1, 1]} : vector<8x96xf32> to vector<1x64xf32>
    %19 = vector.extract_strided_slice %11 {offsets = [7, 0], sizes = [1, 32], strides = [1, 1]} : vector<8x96xf32> to vector<1x32xf32>
    %cst_13 = arith.constant dense<0.000000e+00> : vector<16xf32>
    %20 = vector.multi_reduction <add>, %7, %cst_13 [1] : vector<16x32xf32> to vector<16xf32>
    %21 = vector.shape_cast %20 : vector<16xf32> to vector<16x1xf32>
    %cst_14 = arith.constant 3.200000e+01 : f32
    %22 = vector.broadcast %cst_14 : f32 to vector<16x1xf32>
    %23 = arith.divf %21, %22 : vector<16x1xf32>
    %24 = vector.broadcast %23 : vector<16x1xf32> to vector<16x32xf32>
    %25 = arith.subf %7, %24 : vector<16x32xf32>
    %26 = arith.mulf %25, %25 : vector<16x32xf32>
    %cst_15 = arith.constant dense<0.000000e+00> : vector<16xf32>
    %27 = vector.multi_reduction <add>, %26, %cst_15 [1] : vector<16x32xf32> to vector<16xf32>
    %28 = vector.shape_cast %27 : vector<16xf32> to vector<16x1xf32>
    %cst_16 = arith.constant 3.200000e+01 : f32
    %29 = vector.broadcast %cst_16 : f32 to vector<16x1xf32>
    %30 = arith.divf %28, %29 : vector<16x1xf32>
    %31 = vector.broadcast %23 : vector<16x1xf32> to vector<16x32xf32>
    %32 = arith.subf %7, %31 : vector<16x32xf32>
    %cst_17 = arith.constant 9.99999974E-6 : f32
    %33 = vector.broadcast %cst_17 : f32 to vector<16x1xf32>
    %34 = arith.addf %30, %33 : vector<16x1xf32>
    %35 = math.rsqrt %34 : vector<16x1xf32>
    %36 = vector.broadcast %35 : vector<16x1xf32> to vector<16x32xf32>
    %37 = arith.mulf %32, %36 : vector<16x32xf32>
    %38 = vector.broadcast %12 : vector<1x32xf32> to vector<16x32xf32>
    %39 = arith.mulf %37, %38 : vector<16x32xf32>
    %40 = vector.broadcast %13 : vector<1x32xf32> to vector<16x32xf32>
    %41 = arith.addf %39, %40 : vector<16x32xf32>
    %42 = vector.extract_strided_slice %9 {offsets = [0, 0], sizes = [32, 96], strides = [1, 1]} : vector<32x192xf32> to vector<32x96xf32>
    %cst_18 = arith.constant dense<0.000000e+00> : vector<16x96xf32>
    %43 = tpu.matmul %41, %42, %cst_18 {dimension_numbers = #tpu.dot_dimension_numbers<[1], [0], [0], [1], [0, 0, 1, 1], [], []>} : vector<16x32xf32>, vector<32x96xf32>, vector<16x96xf32> -> vector<16x96xf32>
    %44 = vector.broadcast %16 : vector<1x96xf32> to vector<16x96xf32>
    %45 = arith.addf %43, %44 : vector<16x96xf32>
    %46 = vector.extract_strided_slice %45 {offsets = [0, 0], sizes = [8, 8], strides = [1, 1]} : vector<16x96xf32> to vector<8x8xf32>
    %47 = vector.extract_strided_slice %45 {offsets = [8, 0], sizes = [8, 8], strides = [1, 1]} : vector<16x96xf32> to vector<8x8xf32>
    %48 = vector.extract_strided_slice %45 {offsets = [0, 8], sizes = [8, 8], strides = [1, 1]} : vector<16x96xf32> to vector<8x8xf32>
    %49 = vector.extract_strided_slice %45 {offsets = [8, 8], sizes = [8, 8], strides = [1, 1]} : vector<16x96xf32> to vector<8x8xf32>
    %50 = vector.extract_strided_slice %45 {offsets = [0, 16], sizes = [8, 8], strides = [1, 1]} : vector<16x96xf32> to vector<8x8xf32>
    %51 = vector.extract_strided_slice %45 {offsets = [8, 16], sizes = [8, 8], strides = [1, 1]} : vector<16x96xf32> to vector<8x8xf32>
    %52 = vector.extract_strided_slice %45 {offsets = [0, 24], sizes = [8, 8], strides = [1, 1]} : vector<16x96xf32> to vector<8x8xf32>
    %53 = vector.extract_strided_slice %45 {offsets = [8, 24], sizes = [8, 8], strides = [1, 1]} : vector<16x96xf32> to vector<8x8xf32>
    %54 = vector.shape_cast %46 : vector<8x8xf32> to vector<1x8x8xf32>
    %55 = vector.shape_cast %47 : vector<8x8xf32> to vector<1x8x8xf32>
    %56 = vector.shape_cast %48 : vector<8x8xf32> to vector<1x8x8xf32>
    %57 = vector.shape_cast %49 : vector<8x8xf32> to vector<1x8x8xf32>
    %58 = vector.shape_cast %50 : vector<8x8xf32> to vector<1x8x8xf32>
    %59 = vector.shape_cast %51 : vector<8x8xf32> to vector<1x8x8xf32>
    %60 = vector.shape_cast %52 : vector<8x8xf32> to vector<1x8x8xf32>
    %61 = vector.shape_cast %53 : vector<8x8xf32> to vector<1x8x8xf32>
    %62 = tpu.concatenate %54, %55, %56, %57, %58, %59, %60, %61 in 0 : vector<1x8x8xf32>, vector<1x8x8xf32>, vector<1x8x8xf32>, vector<1x8x8xf32>, vector<1x8x8xf32>, vector<1x8x8xf32>, vector<1x8x8xf32>, vector<1x8x8xf32> -> vector<8x8x8xf32>
    %63 = vector.extract_strided_slice %45 {offsets = [0, 32], sizes = [8, 8], strides = [1, 1]} : vector<16x96xf32> to vector<8x8xf32>
    %64 = vector.extract_strided_slice %45 {offsets = [8, 32], sizes = [8, 8], strides = [1, 1]} : vector<16x96xf32> to vector<8x8xf32>
    %65 = vector.extract_strided_slice %45 {offsets = [0, 40], sizes = [8, 8], strides = [1, 1]} : vector<16x96xf32> to vector<8x8xf32>
    %66 = vector.extract_strided_slice %45 {offsets = [8, 40], sizes = [8, 8], strides = [1, 1]} : vector<16x96xf32> to vector<8x8xf32>
    %67 = vector.extract_strided_slice %45 {offsets = [0, 48], sizes = [8, 8], strides = [1, 1]} : vector<16x96xf32> to vector<8x8xf32>
    %68 = vector.extract_strided_slice %45 {offsets = [8, 48], sizes = [8, 8], strides = [1, 1]} : vector<16x96xf32> to vector<8x8xf32>
    %69 = vector.extract_strided_slice %45 {offsets = [0, 56], sizes = [8, 8], strides = [1, 1]} : vector<16x96xf32> to vector<8x8xf32>
    %70 = vector.extract_strided_slice %45 {offsets = [8, 56], sizes = [8, 8], strides = [1, 1]} : vector<16x96xf32> to vector<8x8xf32>
    %71 = vector.shape_cast %63 : vector<8x8xf32> to vector<1x8x8xf32>
    %72 = vector.shape_cast %64 : vector<8x8xf32> to vector<1x8x8xf32>
    %73 = vector.shape_cast %65 : vector<8x8xf32> to vector<1x8x8xf32>
    %74 = vector.shape_cast %66 : vector<8x8xf32> to vector<1x8x8xf32>
    %75 = vector.shape_cast %67 : vector<8x8xf32> to vector<1x8x8xf32>
    %76 = vector.shape_cast %68 : vector<8x8xf32> to vector<1x8x8xf32>
    %77 = vector.shape_cast %69 : vector<8x8xf32> to vector<1x8x8xf32>
    %78 = vector.shape_cast %70 : vector<8x8xf32> to vector<1x8x8xf32>
    %79 = tpu.concatenate %71, %72, %73, %74, %75, %76, %77, %78 in 0 : vector<1x8x8xf32>, vector<1x8x8xf32>, vector<1x8x8xf32>, vector<1x8x8xf32>, vector<1x8x8xf32>, vector<1x8x8xf32>, vector<1x8x8xf32>, vector<1x8x8xf32> -> vector<8x8x8xf32>
    %80 = vector.extract_strided_slice %45 {offsets = [0, 64], sizes = [8, 8], strides = [1, 1]} : vector<16x96xf32> to vector<8x8xf32>
    %81 = vector.extract_strided_slice %45 {offsets = [8, 64], sizes = [8, 8], strides = [1, 1]} : vector<16x96xf32> to vector<8x8xf32>
    %82 = vector.extract_strided_slice %45 {offsets = [0, 72], sizes = [8, 8], strides = [1, 1]} : vector<16x96xf32> to vector<8x8xf32>
    %83 = vector.extract_strided_slice %45 {offsets = [8, 72], sizes = [8, 8], strides = [1, 1]} : vector<16x96xf32> to vector<8x8xf32>
    %84 = vector.extract_strided_slice %45 {offsets = [0, 80], sizes = [8, 8], strides = [1, 1]} : vector<16x96xf32> to vector<8x8xf32>
    %85 = vector.extract_strided_slice %45 {offsets = [8, 80], sizes = [8, 8], strides = [1, 1]} : vector<16x96xf32> to vector<8x8xf32>
    %86 = vector.extract_strided_slice %45 {offsets = [0, 88], sizes = [8, 8], strides = [1, 1]} : vector<16x96xf32> to vector<8x8xf32>
    %87 = vector.extract_strided_slice %45 {offsets = [8, 88], sizes = [8, 8], strides = [1, 1]} : vector<16x96xf32> to vector<8x8xf32>
    %88 = vector.shape_cast %80 : vector<8x8xf32> to vector<1x8x8xf32>
    %89 = vector.shape_cast %81 : vector<8x8xf32> to vector<1x8x8xf32>
    %90 = vector.shape_cast %82 : vector<8x8xf32> to vector<1x8x8xf32>
    %91 = vector.shape_cast %83 : vector<8x8xf32> to vector<1x8x8xf32>
    %92 = vector.shape_cast %84 : vector<8x8xf32> to vector<1x8x8xf32>
    %93 = vector.shape_cast %85 : vector<8x8xf32> to vector<1x8x8xf32>
    %94 = vector.shape_cast %86 : vector<8x8xf32> to vector<1x8x8xf32>
    %95 = vector.shape_cast %87 : vector<8x8xf32> to vector<1x8x8xf32>
    %96 = tpu.concatenate %88, %89, %90, %91, %92, %93, %94, %95 in 0 : vector<1x8x8xf32>, vector<1x8x8xf32>, vector<1x8x8xf32>, vector<1x8x8xf32>, vector<1x8x8xf32>, vector<1x8x8xf32>, vector<1x8x8xf32>, vector<1x8x8xf32> -> vector<8x8x8xf32>
    "tpu.trace_start"() <{level = 10 : i32, message = "gqd,gkd->gqk"}> : () -> ()
    %cst_19 = arith.constant dense<0.000000e+00> : vector<8x8x8xf32>
    %97 = tpu.matmul %62, %79, %cst_19 {dimension_numbers = #tpu.dot_dimension_numbers<[2], [2], [1], [1], [0, 0, 0, 1, 1, 1], [0], [0]>} : vector<8x8x8xf32>, vector<8x8x8xf32>, vector<8x8x8xf32> -> vector<8x8x8xf32>
    "tpu.trace_stop"() : () -> ()
    %cst_20 = arith.constant 0.353553385 : f32
    %98 = vector.broadcast %cst_20 : f32 to vector<8x8x8xf32>
    %99 = arith.mulf %97, %98 : vector<8x8x8xf32>
    %cst_21 = arith.constant dense<0xFF800000> : vector<8x8xf32>
    %100 = vector.multi_reduction <maximumf>, %99, %cst_21 [2] : vector<8x8x8xf32> to vector<8x8xf32>
    %101 = vector.shape_cast %100 : vector<8x8xf32> to vector<8x8x1xf32>
    %102 = vector.broadcast %101 : vector<8x8x1xf32> to vector<8x8x8xf32>
    %103 = arith.subf %99, %102 : vector<8x8x8xf32>
    %104 = math.exp %103 : vector<8x8x8xf32>
    %cst_22 = arith.constant dense<0.000000e+00> : vector<8x8xf32>
    %105 = vector.multi_reduction <add>, %104, %cst_22 [2] : vector<8x8x8xf32> to vector<8x8xf32>
    %106 = vector.shape_cast %105 : vector<8x8xf32> to vector<8x8x1xf32>
    %107 = tpu.reciprocal %106 {approx = true} : vector<8x8x1xf32> -> vector<8x8x1xf32>
    %108 = vector.broadcast %107 : vector<8x8x1xf32> to vector<8x8x8xf32>
    %109 = arith.mulf %104, %108 : vector<8x8x8xf32>
    "tpu.trace_start"() <{level = 10 : i32, message = "gqk,gkd->gqd"}> : () -> ()
    %cst_23 = arith.constant dense<0.000000e+00> : vector<8x8x8xf32>
    %110 = tpu.matmul %109, %96, %cst_23 {dimension_numbers = #tpu.dot_dimension_numbers<[2], [1], [1], [2], [0, 0, 0, 1, 1, 2], [0], [0]>} : vector<8x8x8xf32>, vector<8x8x8xf32>, vector<8x8x8xf32> -> vector<8x8x8xf32>
    "tpu.trace_stop"() : () -> ()
    %111 = vector.extract_strided_slice %110 {offsets = [0, 0, 0], sizes = [1, 8, 8], strides = [1, 1, 1]} : vector<8x8x8xf32> to vector<1x8x8xf32>
    %112 = vector.shape_cast %111 : vector<1x8x8xf32> to vector<8x8xf32>
    %113 = vector.extract_strided_slice %110 {offsets = [2, 0, 0], sizes = [1, 8, 8], strides = [1, 1, 1]} : vector<8x8x8xf32> to vector<1x8x8xf32>
    %114 = vector.shape_cast %113 : vector<1x8x8xf32> to vector<8x8xf32>
    %115 = vector.extract_strided_slice %110 {offsets = [4, 0, 0], sizes = [1, 8, 8], strides = [1, 1, 1]} : vector<8x8x8xf32> to vector<1x8x8xf32>
    %116 = vector.shape_cast %115 : vector<1x8x8xf32> to vector<8x8xf32>
    %117 = vector.extract_strided_slice %110 {offsets = [6, 0, 0], sizes = [1, 8, 8], strides = [1, 1, 1]} : vector<8x8x8xf32> to vector<1x8x8xf32>
    %118 = vector.shape_cast %117 : vector<1x8x8xf32> to vector<8x8xf32>
    %119 = tpu.concatenate %112, %114, %116, %118 in 1 : vector<8x8xf32>, vector<8x8xf32>, vector<8x8xf32>, vector<8x8xf32> -> vector<8x32xf32>
    %120 = vector.extract_strided_slice %110 {offsets = [1, 0, 0], sizes = [1, 8, 8], strides = [1, 1, 1]} : vector<8x8x8xf32> to vector<1x8x8xf32>
    %121 = vector.shape_cast %120 : vector<1x8x8xf32> to vector<8x8xf32>
    %122 = vector.extract_strided_slice %110 {offsets = [3, 0, 0], sizes = [1, 8, 8], strides = [1, 1, 1]} : vector<8x8x8xf32> to vector<1x8x8xf32>
    %123 = vector.shape_cast %122 : vector<1x8x8xf32> to vector<8x8xf32>
    %124 = vector.extract_strided_slice %110 {offsets = [5, 0, 0], sizes = [1, 8, 8], strides = [1, 1, 1]} : vector<8x8x8xf32> to vector<1x8x8xf32>
    %125 = vector.shape_cast %124 : vector<1x8x8xf32> to vector<8x8xf32>
    %126 = vector.extract_strided_slice %110 {offsets = [7, 0, 0], sizes = [1, 8, 8], strides = [1, 1, 1]} : vector<8x8x8xf32> to vector<1x8x8xf32>
    %127 = vector.shape_cast %126 : vector<1x8x8xf32> to vector<8x8xf32>
    %128 = tpu.concatenate %121, %123, %125, %127 in 1 : vector<8x8xf32>, vector<8x8xf32>, vector<8x8xf32>, vector<8x8xf32> -> vector<8x32xf32>
    %129 = tpu.concatenate %119, %128 in 0 : vector<8x32xf32>, vector<8x32xf32> -> vector<16x32xf32>
    %130 = vector.extract_strided_slice %9 {offsets = [0, 96], sizes = [32, 32], strides = [1, 1]} : vector<32x192xf32> to vector<32x32xf32>
    %cst_24 = arith.constant dense<0.000000e+00> : vector<16x32xf32>
    %131 = tpu.matmul %129, %130, %cst_24 {dimension_numbers = #tpu.dot_dimension_numbers<[1], [0], [0], [1], [0, 0, 1, 1], [], []>} : vector<16x32xf32>, vector<32x32xf32>, vector<16x32xf32> -> vector<16x32xf32>
    %132 = arith.addf %7, %131 : vector<16x32xf32>
    %133 = vector.broadcast %17 : vector<1x32xf32> to vector<16x32xf32>
    %134 = arith.addf %132, %133 : vector<16x32xf32>
    %cst_25 = arith.constant dense<0.000000e+00> : vector<16xf32>
    %135 = vector.multi_reduction <add>, %134, %cst_25 [1] : vector<16x32xf32> to vector<16xf32>
    %136 = vector.shape_cast %135 : vector<16xf32> to vector<16x1xf32>
    %cst_26 = arith.constant 3.200000e+01 : f32
    %137 = vector.broadcast %cst_26 : f32 to vector<16x1xf32>
    %138 = arith.divf %136, %137 : vector<16x1xf32>
    %139 = vector.broadcast %138 : vector<16x1xf32> to vector<16x32xf32>
    %140 = arith.subf %134, %139 : vector<16x32xf32>
    %141 = arith.mulf %140, %140 : vector<16x32xf32>
    %cst_27 = arith.constant dense<0.000000e+00> : vector<16xf32>
    %142 = vector.multi_reduction <add>, %141, %cst_27 [1] : vector<16x32xf32> to vector<16xf32>
    %143 = vector.shape_cast %142 : vector<16xf32> to vector<16x1xf32>
    %cst_28 = arith.constant 3.200000e+01 : f32
    %144 = vector.broadcast %cst_28 : f32 to vector<16x1xf32>
    %145 = arith.divf %143, %144 : vector<16x1xf32>
    %146 = vector.broadcast %138 : vector<16x1xf32> to vector<16x32xf32>
    %147 = arith.subf %134, %146 : vector<16x32xf32>
    %cst_29 = arith.constant 9.99999974E-6 : f32
    %148 = vector.broadcast %cst_29 : f32 to vector<16x1xf32>
    %149 = arith.addf %145, %148 : vector<16x1xf32>
    %150 = math.rsqrt %149 : vector<16x1xf32>
    %151 = vector.broadcast %150 : vector<16x1xf32> to vector<16x32xf32>
    %152 = arith.mulf %147, %151 : vector<16x32xf32>
    %153 = vector.broadcast %14 : vector<1x32xf32> to vector<16x32xf32>
    %154 = arith.mulf %152, %153 : vector<16x32xf32>
    %155 = vector.broadcast %15 : vector<1x32xf32> to vector<16x32xf32>
    %156 = arith.addf %154, %155 : vector<16x32xf32>
    %157 = vector.extract_strided_slice %9 {offsets = [0, 128], sizes = [32, 64], strides = [1, 1]} : vector<32x192xf32> to vector<32x64xf32>
    %cst_30 = arith.constant dense<0.000000e+00> : vector<16x64xf32>
    %158 = tpu.matmul %156, %157, %cst_30 {dimension_numbers = #tpu.dot_dimension_numbers<[1], [0], [0], [1], [0, 0, 1, 1], [], []>} : vector<16x32xf32>, vector<32x64xf32>, vector<16x64xf32> -> vector<16x64xf32>
    %159 = vector.broadcast %18 : vector<1x64xf32> to vector<16x64xf32>
    %160 = arith.addf %158, %159 : vector<16x64xf32>
    %cst_31 = arith.constant 0.000000e+00 : f32
    %161 = vector.broadcast %cst_31 : f32 to vector<16x64xf32>
    %162 = arith.maximumf %160, %161 : vector<16x64xf32>
    %c0_32 = arith.constant 0 : index
    %c0_33 = arith.constant 0 : index
    %c0_34 = arith.constant 0 : index
    %163 = vector.load %arg5[%c0_32, %c0_33, %c0_34] : memref<3x64x32xf32, #tpu.memory_space<vmem>>, vector<1x64x32xf32>
    %164 = vector.shape_cast %163 : vector<1x64x32xf32> to vector<64x32xf32>
    %cst_35 = arith.constant dense<0.000000e+00> : vector<16x32xf32>
    %165 = tpu.matmul %162, %164, %cst_35 {dimension_numbers = #tpu.dot_dimension_numbers<[1], [0], [0], [1], [0, 0, 1, 1], [], []>} : vector<16x64xf32>, vector<64x32xf32>, vector<16x32xf32> -> vector<16x32xf32>
    %166 = arith.addf %134, %165 : vector<16x32xf32>
    %167 = vector.broadcast %19 : vector<1x32xf32> to vector<16x32xf32>
    %168 = arith.addf %166, %167 : vector<16x32xf32>
    %c1 = arith.constant 1 : index
    %c0_36 = arith.constant 0 : index
    %c0_37 = arith.constant 0 : index
    %169 = vector.load %arg4[%c1, %c0_36, %c0_37] : memref<3x32x192xf32, #tpu.memory_space<vmem>>, vector<1x32x192xf32>
    %170 = vector.shape_cast %169 : vector<1x32x192xf32> to vector<32x192xf32>
    %c1_38 = arith.constant 1 : index
    %c0_39 = arith.constant 0 : index
    %c0_40 = arith.constant 0 : index
    %171 = vector.load %arg6[%c1_38, %c0_39, %c0_40] : memref<3x8x96xf32, #tpu.memory_space<vmem>>, vector<1x8x96xf32>
    %172 = vector.shape_cast %171 : vector<1x8x96xf32> to vector<8x96xf32>
    %173 = vector.extract_strided_slice %172 {offsets = [0, 0], sizes = [1, 32], strides = [1, 1]} : vector<8x96xf32> to vector<1x32xf32>
    %174 = vector.extract_strided_slice %172 {offsets = [1, 0], sizes = [1, 32], strides = [1, 1]} : vector<8x96xf32> to vector<1x32xf32>
    %175 = vector.extract_strided_slice %172 {offsets = [2, 0], sizes = [1, 32], strides = [1, 1]} : vector<8x96xf32> to vector<1x32xf32>
    %176 = vector.extract_strided_slice %172 {offsets = [3, 0], sizes = [1, 32], strides = [1, 1]} : vector<8x96xf32> to vector<1x32xf32>
    %177 = vector.extract_strided_slice %172 {offsets = [4, 0], sizes = [1, 96], strides = [1, 1]} : vector<8x96xf32> to vector<1x96xf32>
    %178 = vector.extract_strided_slice %172 {offsets = [5, 0], sizes = [1, 32], strides = [1, 1]} : vector<8x96xf32> to vector<1x32xf32>
    %179 = vector.extract_strided_slice %172 {offsets = [6, 0], sizes = [1, 64], strides = [1, 1]} : vector<8x96xf32> to vector<1x64xf32>
    %180 = vector.extract_strided_slice %172 {offsets = [7, 0], sizes = [1, 32], strides = [1, 1]} : vector<8x96xf32> to vector<1x32xf32>
    %cst_41 = arith.constant dense<0.000000e+00> : vector<16xf32>
    %181 = vector.multi_reduction <add>, %168, %cst_41 [1] : vector<16x32xf32> to vector<16xf32>
    %182 = vector.shape_cast %181 : vector<16xf32> to vector<16x1xf32>
    %cst_42 = arith.constant 3.200000e+01 : f32
    %183 = vector.broadcast %cst_42 : f32 to vector<16x1xf32>
    %184 = arith.divf %182, %183 : vector<16x1xf32>
    %185 = vector.broadcast %184 : vector<16x1xf32> to vector<16x32xf32>
    %186 = arith.subf %168, %185 : vector<16x32xf32>
    %187 = arith.mulf %186, %186 : vector<16x32xf32>
    %cst_43 = arith.constant dense<0.000000e+00> : vector<16xf32>
    %188 = vector.multi_reduction <add>, %187, %cst_43 [1] : vector<16x32xf32> to vector<16xf32>
    %189 = vector.shape_cast %188 : vector<16xf32> to vector<16x1xf32>
    %cst_44 = arith.constant 3.200000e+01 : f32
    %190 = vector.broadcast %cst_44 : f32 to vector<16x1xf32>
    %191 = arith.divf %189, %190 : vector<16x1xf32>
    %192 = vector.broadcast %184 : vector<16x1xf32> to vector<16x32xf32>
    %193 = arith.subf %168, %192 : vector<16x32xf32>
    %cst_45 = arith.constant 9.99999974E-6 : f32
    %194 = vector.broadcast %cst_45 : f32 to vector<16x1xf32>
    %195 = arith.addf %191, %194 : vector<16x1xf32>
    %196 = math.rsqrt %195 : vector<16x1xf32>
    %197 = vector.broadcast %196 : vector<16x1xf32> to vector<16x32xf32>
    %198 = arith.mulf %193, %197 : vector<16x32xf32>
    %199 = vector.broadcast %173 : vector<1x32xf32> to vector<16x32xf32>
    %200 = arith.mulf %198, %199 : vector<16x32xf32>
    %201 = vector.broadcast %174 : vector<1x32xf32> to vector<16x32xf32>
    %202 = arith.addf %200, %201 : vector<16x32xf32>
    %203 = vector.extract_strided_slice %170 {offsets = [0, 0], sizes = [32, 96], strides = [1, 1]} : vector<32x192xf32> to vector<32x96xf32>
    %cst_46 = arith.constant dense<0.000000e+00> : vector<16x96xf32>
    %204 = tpu.matmul %202, %203, %cst_46 {dimension_numbers = #tpu.dot_dimension_numbers<[1], [0], [0], [1], [0, 0, 1, 1], [], []>} : vector<16x32xf32>, vector<32x96xf32>, vector<16x96xf32> -> vector<16x96xf32>
    %205 = vector.broadcast %177 : vector<1x96xf32> to vector<16x96xf32>
    %206 = arith.addf %204, %205 : vector<16x96xf32>
    %207 = vector.extract_strided_slice %206 {offsets = [0, 0], sizes = [8, 8], strides = [1, 1]} : vector<16x96xf32> to vector<8x8xf32>
    %208 = vector.extract_strided_slice %206 {offsets = [8, 0], sizes = [8, 8], strides = [1, 1]} : vector<16x96xf32> to vector<8x8xf32>
    %209 = vector.extract_strided_slice %206 {offsets = [0, 8], sizes = [8, 8], strides = [1, 1]} : vector<16x96xf32> to vector<8x8xf32>
    %210 = vector.extract_strided_slice %206 {offsets = [8, 8], sizes = [8, 8], strides = [1, 1]} : vector<16x96xf32> to vector<8x8xf32>
    %211 = vector.extract_strided_slice %206 {offsets = [0, 16], sizes = [8, 8], strides = [1, 1]} : vector<16x96xf32> to vector<8x8xf32>
    %212 = vector.extract_strided_slice %206 {offsets = [8, 16], sizes = [8, 8], strides = [1, 1]} : vector<16x96xf32> to vector<8x8xf32>
    %213 = vector.extract_strided_slice %206 {offsets = [0, 24], sizes = [8, 8], strides = [1, 1]} : vector<16x96xf32> to vector<8x8xf32>
    %214 = vector.extract_strided_slice %206 {offsets = [8, 24], sizes = [8, 8], strides = [1, 1]} : vector<16x96xf32> to vector<8x8xf32>
    %215 = vector.shape_cast %207 : vector<8x8xf32> to vector<1x8x8xf32>
    %216 = vector.shape_cast %208 : vector<8x8xf32> to vector<1x8x8xf32>
    %217 = vector.shape_cast %209 : vector<8x8xf32> to vector<1x8x8xf32>
    %218 = vector.shape_cast %210 : vector<8x8xf32> to vector<1x8x8xf32>
    %219 = vector.shape_cast %211 : vector<8x8xf32> to vector<1x8x8xf32>
    %220 = vector.shape_cast %212 : vector<8x8xf32> to vector<1x8x8xf32>
    %221 = vector.shape_cast %213 : vector<8x8xf32> to vector<1x8x8xf32>
    %222 = vector.shape_cast %214 : vector<8x8xf32> to vector<1x8x8xf32>
    %223 = tpu.concatenate %215, %216, %217, %218, %219, %220, %221, %222 in 0 : vector<1x8x8xf32>, vector<1x8x8xf32>, vector<1x8x8xf32>, vector<1x8x8xf32>, vector<1x8x8xf32>, vector<1x8x8xf32>, vector<1x8x8xf32>, vector<1x8x8xf32> -> vector<8x8x8xf32>
    %224 = vector.extract_strided_slice %206 {offsets = [0, 32], sizes = [8, 8], strides = [1, 1]} : vector<16x96xf32> to vector<8x8xf32>
    %225 = vector.extract_strided_slice %206 {offsets = [8, 32], sizes = [8, 8], strides = [1, 1]} : vector<16x96xf32> to vector<8x8xf32>
    %226 = vector.extract_strided_slice %206 {offsets = [0, 40], sizes = [8, 8], strides = [1, 1]} : vector<16x96xf32> to vector<8x8xf32>
    %227 = vector.extract_strided_slice %206 {offsets = [8, 40], sizes = [8, 8], strides = [1, 1]} : vector<16x96xf32> to vector<8x8xf32>
    %228 = vector.extract_strided_slice %206 {offsets = [0, 48], sizes = [8, 8], strides = [1, 1]} : vector<16x96xf32> to vector<8x8xf32>
    %229 = vector.extract_strided_slice %206 {offsets = [8, 48], sizes = [8, 8], strides = [1, 1]} : vector<16x96xf32> to vector<8x8xf32>
    %230 = vector.extract_strided_slice %206 {offsets = [0, 56], sizes = [8, 8], strides = [1, 1]} : vector<16x96xf32> to vector<8x8xf32>
    %231 = vector.extract_strided_slice %206 {offsets = [8, 56], sizes = [8, 8], strides = [1, 1]} : vector<16x96xf32> to vector<8x8xf32>
    %232 = vector.shape_cast %224 : vector<8x8xf32> to vector<1x8x8xf32>
    %233 = vector.shape_cast %225 : vector<8x8xf32> to vector<1x8x8xf32>
    %234 = vector.shape_cast %226 : vector<8x8xf32> to vector<1x8x8xf32>
    %235 = vector.shape_cast %227 : vector<8x8xf32> to vector<1x8x8xf32>
    %236 = vector.shape_cast %228 : vector<8x8xf32> to vector<1x8x8xf32>
    %237 = vector.shape_cast %229 : vector<8x8xf32> to vector<1x8x8xf32>
    %238 = vector.shape_cast %230 : vector<8x8xf32> to vector<1x8x8xf32>
    %239 = vector.shape_cast %231 : vector<8x8xf32> to vector<1x8x8xf32>
    %240 = tpu.concatenate %232, %233, %234, %235, %236, %237, %238, %239 in 0 : vector<1x8x8xf32>, vector<1x8x8xf32>, vector<1x8x8xf32>, vector<1x8x8xf32>, vector<1x8x8xf32>, vector<1x8x8xf32>, vector<1x8x8xf32>, vector<1x8x8xf32> -> vector<8x8x8xf32>
    %241 = vector.extract_strided_slice %206 {offsets = [0, 64], sizes = [8, 8], strides = [1, 1]} : vector<16x96xf32> to vector<8x8xf32>
    %242 = vector.extract_strided_slice %206 {offsets = [8, 64], sizes = [8, 8], strides = [1, 1]} : vector<16x96xf32> to vector<8x8xf32>
    %243 = vector.extract_strided_slice %206 {offsets = [0, 72], sizes = [8, 8], strides = [1, 1]} : vector<16x96xf32> to vector<8x8xf32>
    %244 = vector.extract_strided_slice %206 {offsets = [8, 72], sizes = [8, 8], strides = [1, 1]} : vector<16x96xf32> to vector<8x8xf32>
    %245 = vector.extract_strided_slice %206 {offsets = [0, 80], sizes = [8, 8], strides = [1, 1]} : vector<16x96xf32> to vector<8x8xf32>
    %246 = vector.extract_strided_slice %206 {offsets = [8, 80], sizes = [8, 8], strides = [1, 1]} : vector<16x96xf32> to vector<8x8xf32>
    %247 = vector.extract_strided_slice %206 {offsets = [0, 88], sizes = [8, 8], strides = [1, 1]} : vector<16x96xf32> to vector<8x8xf32>
    %248 = vector.extract_strided_slice %206 {offsets = [8, 88], sizes = [8, 8], strides = [1, 1]} : vector<16x96xf32> to vector<8x8xf32>
    %249 = vector.shape_cast %241 : vector<8x8xf32> to vector<1x8x8xf32>
    %250 = vector.shape_cast %242 : vector<8x8xf32> to vector<1x8x8xf32>
    %251 = vector.shape_cast %243 : vector<8x8xf32> to vector<1x8x8xf32>
    %252 = vector.shape_cast %244 : vector<8x8xf32> to vector<1x8x8xf32>
    %253 = vector.shape_cast %245 : vector<8x8xf32> to vector<1x8x8xf32>
    %254 = vector.shape_cast %246 : vector<8x8xf32> to vector<1x8x8xf32>
    %255 = vector.shape_cast %247 : vector<8x8xf32> to vector<1x8x8xf32>
    %256 = vector.shape_cast %248 : vector<8x8xf32> to vector<1x8x8xf32>
    %257 = tpu.concatenate %249, %250, %251, %252, %253, %254, %255, %256 in 0 : vector<1x8x8xf32>, vector<1x8x8xf32>, vector<1x8x8xf32>, vector<1x8x8xf32>, vector<1x8x8xf32>, vector<1x8x8xf32>, vector<1x8x8xf32>, vector<1x8x8xf32> -> vector<8x8x8xf32>
    "tpu.trace_start"() <{level = 10 : i32, message = "gqd,gkd->gqk"}> : () -> ()
    %cst_47 = arith.constant dense<0.000000e+00> : vector<8x8x8xf32>
    %258 = tpu.matmul %223, %240, %cst_47 {dimension_numbers = #tpu.dot_dimension_numbers<[2], [2], [1], [1], [0, 0, 0, 1, 1, 1], [0], [0]>} : vector<8x8x8xf32>, vector<8x8x8xf32>, vector<8x8x8xf32> -> vector<8x8x8xf32>
    "tpu.trace_stop"() : () -> ()
    %cst_48 = arith.constant 0.353553385 : f32
    %259 = vector.broadcast %cst_48 : f32 to vector<8x8x8xf32>
    %260 = arith.mulf %258, %259 : vector<8x8x8xf32>
    %cst_49 = arith.constant dense<0xFF800000> : vector<8x8xf32>
    %261 = vector.multi_reduction <maximumf>, %260, %cst_49 [2] : vector<8x8x8xf32> to vector<8x8xf32>
    %262 = vector.shape_cast %261 : vector<8x8xf32> to vector<8x8x1xf32>
    %263 = vector.broadcast %262 : vector<8x8x1xf32> to vector<8x8x8xf32>
    %264 = arith.subf %260, %263 : vector<8x8x8xf32>
    %265 = math.exp %264 : vector<8x8x8xf32>
    %cst_50 = arith.constant dense<0.000000e+00> : vector<8x8xf32>
    %266 = vector.multi_reduction <add>, %265, %cst_50 [2] : vector<8x8x8xf32> to vector<8x8xf32>
    %267 = vector.shape_cast %266 : vector<8x8xf32> to vector<8x8x1xf32>
    %268 = tpu.reciprocal %267 {approx = true} : vector<8x8x1xf32> -> vector<8x8x1xf32>
    %269 = vector.broadcast %268 : vector<8x8x1xf32> to vector<8x8x8xf32>
    %270 = arith.mulf %265, %269 : vector<8x8x8xf32>
    "tpu.trace_start"() <{level = 10 : i32, message = "gqk,gkd->gqd"}> : () -> ()
    %cst_51 = arith.constant dense<0.000000e+00> : vector<8x8x8xf32>
    %271 = tpu.matmul %270, %257, %cst_51 {dimension_numbers = #tpu.dot_dimension_numbers<[2], [1], [1], [2], [0, 0, 0, 1, 1, 2], [0], [0]>} : vector<8x8x8xf32>, vector<8x8x8xf32>, vector<8x8x8xf32> -> vector<8x8x8xf32>
    "tpu.trace_stop"() : () -> ()
    %272 = vector.extract_strided_slice %271 {offsets = [0, 0, 0], sizes = [1, 8, 8], strides = [1, 1, 1]} : vector<8x8x8xf32> to vector<1x8x8xf32>
    %273 = vector.shape_cast %272 : vector<1x8x8xf32> to vector<8x8xf32>
    %274 = vector.extract_strided_slice %271 {offsets = [2, 0, 0], sizes = [1, 8, 8], strides = [1, 1, 1]} : vector<8x8x8xf32> to vector<1x8x8xf32>
    %275 = vector.shape_cast %274 : vector<1x8x8xf32> to vector<8x8xf32>
    %276 = vector.extract_strided_slice %271 {offsets = [4, 0, 0], sizes = [1, 8, 8], strides = [1, 1, 1]} : vector<8x8x8xf32> to vector<1x8x8xf32>
    %277 = vector.shape_cast %276 : vector<1x8x8xf32> to vector<8x8xf32>
    %278 = vector.extract_strided_slice %271 {offsets = [6, 0, 0], sizes = [1, 8, 8], strides = [1, 1, 1]} : vector<8x8x8xf32> to vector<1x8x8xf32>
    %279 = vector.shape_cast %278 : vector<1x8x8xf32> to vector<8x8xf32>
    %280 = tpu.concatenate %273, %275, %277, %279 in 1 : vector<8x8xf32>, vector<8x8xf32>, vector<8x8xf32>, vector<8x8xf32> -> vector<8x32xf32>
    %281 = vector.extract_strided_slice %271 {offsets = [1, 0, 0], sizes = [1, 8, 8], strides = [1, 1, 1]} : vector<8x8x8xf32> to vector<1x8x8xf32>
    %282 = vector.shape_cast %281 : vector<1x8x8xf32> to vector<8x8xf32>
    %283 = vector.extract_strided_slice %271 {offsets = [3, 0, 0], sizes = [1, 8, 8], strides = [1, 1, 1]} : vector<8x8x8xf32> to vector<1x8x8xf32>
    %284 = vector.shape_cast %283 : vector<1x8x8xf32> to vector<8x8xf32>
    %285 = vector.extract_strided_slice %271 {offsets = [5, 0, 0], sizes = [1, 8, 8], strides = [1, 1, 1]} : vector<8x8x8xf32> to vector<1x8x8xf32>
    %286 = vector.shape_cast %285 : vector<1x8x8xf32> to vector<8x8xf32>
    %287 = vector.extract_strided_slice %271 {offsets = [7, 0, 0], sizes = [1, 8, 8], strides = [1, 1, 1]} : vector<8x8x8xf32> to vector<1x8x8xf32>
    %288 = vector.shape_cast %287 : vector<1x8x8xf32> to vector<8x8xf32>
    %289 = tpu.concatenate %282, %284, %286, %288 in 1 : vector<8x8xf32>, vector<8x8xf32>, vector<8x8xf32>, vector<8x8xf32> -> vector<8x32xf32>
    %290 = tpu.concatenate %280, %289 in 0 : vector<8x32xf32>, vector<8x32xf32> -> vector<16x32xf32>
    %291 = vector.extract_strided_slice %170 {offsets = [0, 96], sizes = [32, 32], strides = [1, 1]} : vector<32x192xf32> to vector<32x32xf32>
    %cst_52 = arith.constant dense<0.000000e+00> : vector<16x32xf32>
    %292 = tpu.matmul %290, %291, %cst_52 {dimension_numbers = #tpu.dot_dimension_numbers<[1], [0], [0], [1], [0, 0, 1, 1], [], []>} : vector<16x32xf32>, vector<32x32xf32>, vector<16x32xf32> -> vector<16x32xf32>
    %293 = arith.addf %168, %292 : vector<16x32xf32>
    %294 = vector.broadcast %178 : vector<1x32xf32> to vector<16x32xf32>
    %295 = arith.addf %293, %294 : vector<16x32xf32>
    %cst_53 = arith.constant dense<0.000000e+00> : vector<16xf32>
    %296 = vector.multi_reduction <add>, %295, %cst_53 [1] : vector<16x32xf32> to vector<16xf32>
    %297 = vector.shape_cast %296 : vector<16xf32> to vector<16x1xf32>
    %cst_54 = arith.constant 3.200000e+01 : f32
    %298 = vector.broadcast %cst_54 : f32 to vector<16x1xf32>
    %299 = arith.divf %297, %298 : vector<16x1xf32>
    %300 = vector.broadcast %299 : vector<16x1xf32> to vector<16x32xf32>
    %301 = arith.subf %295, %300 : vector<16x32xf32>
    %302 = arith.mulf %301, %301 : vector<16x32xf32>
    %cst_55 = arith.constant dense<0.000000e+00> : vector<16xf32>
    %303 = vector.multi_reduction <add>, %302, %cst_55 [1] : vector<16x32xf32> to vector<16xf32>
    %304 = vector.shape_cast %303 : vector<16xf32> to vector<16x1xf32>
    %cst_56 = arith.constant 3.200000e+01 : f32
    %305 = vector.broadcast %cst_56 : f32 to vector<16x1xf32>
    %306 = arith.divf %304, %305 : vector<16x1xf32>
    %307 = vector.broadcast %299 : vector<16x1xf32> to vector<16x32xf32>
    %308 = arith.subf %295, %307 : vector<16x32xf32>
    %cst_57 = arith.constant 9.99999974E-6 : f32
    %309 = vector.broadcast %cst_57 : f32 to vector<16x1xf32>
    %310 = arith.addf %306, %309 : vector<16x1xf32>
    %311 = math.rsqrt %310 : vector<16x1xf32>
    %312 = vector.broadcast %311 : vector<16x1xf32> to vector<16x32xf32>
    %313 = arith.mulf %308, %312 : vector<16x32xf32>
    %314 = vector.broadcast %175 : vector<1x32xf32> to vector<16x32xf32>
    %315 = arith.mulf %313, %314 : vector<16x32xf32>
    %316 = vector.broadcast %176 : vector<1x32xf32> to vector<16x32xf32>
    %317 = arith.addf %315, %316 : vector<16x32xf32>
    %318 = vector.extract_strided_slice %170 {offsets = [0, 128], sizes = [32, 64], strides = [1, 1]} : vector<32x192xf32> to vector<32x64xf32>
    %cst_58 = arith.constant dense<0.000000e+00> : vector<16x64xf32>
    %319 = tpu.matmul %317, %318, %cst_58 {dimension_numbers = #tpu.dot_dimension_numbers<[1], [0], [0], [1], [0, 0, 1, 1], [], []>} : vector<16x32xf32>, vector<32x64xf32>, vector<16x64xf32> -> vector<16x64xf32>
    %320 = vector.broadcast %179 : vector<1x64xf32> to vector<16x64xf32>
    %321 = arith.addf %319, %320 : vector<16x64xf32>
    %cst_59 = arith.constant 0.000000e+00 : f32
    %322 = vector.broadcast %cst_59 : f32 to vector<16x64xf32>
    %323 = arith.maximumf %321, %322 : vector<16x64xf32>
    %c1_60 = arith.constant 1 : index
    %c0_61 = arith.constant 0 : index
    %c0_62 = arith.constant 0 : index
    %324 = vector.load %arg5[%c1_60, %c0_61, %c0_62] : memref<3x64x32xf32, #tpu.memory_space<vmem>>, vector<1x64x32xf32>
    %325 = vector.shape_cast %324 : vector<1x64x32xf32> to vector<64x32xf32>
    %cst_63 = arith.constant dense<0.000000e+00> : vector<16x32xf32>
    %326 = tpu.matmul %323, %325, %cst_63 {dimension_numbers = #tpu.dot_dimension_numbers<[1], [0], [0], [1], [0, 0, 1, 1], [], []>} : vector<16x64xf32>, vector<64x32xf32>, vector<16x32xf32> -> vector<16x32xf32>
    %327 = arith.addf %295, %326 : vector<16x32xf32>
    %328 = vector.broadcast %180 : vector<1x32xf32> to vector<16x32xf32>
    %329 = arith.addf %327, %328 : vector<16x32xf32>
    %c2 = arith.constant 2 : index
    %c0_64 = arith.constant 0 : index
    %c0_65 = arith.constant 0 : index
    %330 = vector.load %arg4[%c2, %c0_64, %c0_65] : memref<3x32x192xf32, #tpu.memory_space<vmem>>, vector<1x32x192xf32>
    %331 = vector.shape_cast %330 : vector<1x32x192xf32> to vector<32x192xf32>
    %c2_66 = arith.constant 2 : index
    %c0_67 = arith.constant 0 : index
    %c0_68 = arith.constant 0 : index
    %332 = vector.load %arg6[%c2_66, %c0_67, %c0_68] : memref<3x8x96xf32, #tpu.memory_space<vmem>>, vector<1x8x96xf32>
    %333 = vector.shape_cast %332 : vector<1x8x96xf32> to vector<8x96xf32>
    %334 = vector.extract_strided_slice %333 {offsets = [0, 0], sizes = [1, 32], strides = [1, 1]} : vector<8x96xf32> to vector<1x32xf32>
    %335 = vector.extract_strided_slice %333 {offsets = [1, 0], sizes = [1, 32], strides = [1, 1]} : vector<8x96xf32> to vector<1x32xf32>
    %336 = vector.extract_strided_slice %333 {offsets = [2, 0], sizes = [1, 32], strides = [1, 1]} : vector<8x96xf32> to vector<1x32xf32>
    %337 = vector.extract_strided_slice %333 {offsets = [3, 0], sizes = [1, 32], strides = [1, 1]} : vector<8x96xf32> to vector<1x32xf32>
    %338 = vector.extract_strided_slice %333 {offsets = [4, 0], sizes = [1, 96], strides = [1, 1]} : vector<8x96xf32> to vector<1x96xf32>
    %339 = vector.extract_strided_slice %333 {offsets = [5, 0], sizes = [1, 32], strides = [1, 1]} : vector<8x96xf32> to vector<1x32xf32>
    %340 = vector.extract_strided_slice %333 {offsets = [6, 0], sizes = [1, 64], strides = [1, 1]} : vector<8x96xf32> to vector<1x64xf32>
    %341 = vector.extract_strided_slice %333 {offsets = [7, 0], sizes = [1, 32], strides = [1, 1]} : vector<8x96xf32> to vector<1x32xf32>
    %cst_69 = arith.constant dense<0.000000e+00> : vector<16xf32>
    %342 = vector.multi_reduction <add>, %329, %cst_69 [1] : vector<16x32xf32> to vector<16xf32>
    %343 = vector.shape_cast %342 : vector<16xf32> to vector<16x1xf32>
    %cst_70 = arith.constant 3.200000e+01 : f32
    %344 = vector.broadcast %cst_70 : f32 to vector<16x1xf32>
    %345 = arith.divf %343, %344 : vector<16x1xf32>
    %346 = vector.broadcast %345 : vector<16x1xf32> to vector<16x32xf32>
    %347 = arith.subf %329, %346 : vector<16x32xf32>
    %348 = arith.mulf %347, %347 : vector<16x32xf32>
    %cst_71 = arith.constant dense<0.000000e+00> : vector<16xf32>
    %349 = vector.multi_reduction <add>, %348, %cst_71 [1] : vector<16x32xf32> to vector<16xf32>
    %350 = vector.shape_cast %349 : vector<16xf32> to vector<16x1xf32>
    %cst_72 = arith.constant 3.200000e+01 : f32
    %351 = vector.broadcast %cst_72 : f32 to vector<16x1xf32>
    %352 = arith.divf %350, %351 : vector<16x1xf32>
    %353 = vector.broadcast %345 : vector<16x1xf32> to vector<16x32xf32>
    %354 = arith.subf %329, %353 : vector<16x32xf32>
    %cst_73 = arith.constant 9.99999974E-6 : f32
    %355 = vector.broadcast %cst_73 : f32 to vector<16x1xf32>
    %356 = arith.addf %352, %355 : vector<16x1xf32>
    %357 = math.rsqrt %356 : vector<16x1xf32>
    %358 = vector.broadcast %357 : vector<16x1xf32> to vector<16x32xf32>
    %359 = arith.mulf %354, %358 : vector<16x32xf32>
    %360 = vector.broadcast %334 : vector<1x32xf32> to vector<16x32xf32>
    %361 = arith.mulf %359, %360 : vector<16x32xf32>
    %362 = vector.broadcast %335 : vector<1x32xf32> to vector<16x32xf32>
    %363 = arith.addf %361, %362 : vector<16x32xf32>
    %364 = vector.extract_strided_slice %331 {offsets = [0, 0], sizes = [32, 96], strides = [1, 1]} : vector<32x192xf32> to vector<32x96xf32>
    %cst_74 = arith.constant dense<0.000000e+00> : vector<16x96xf32>
    %365 = tpu.matmul %363, %364, %cst_74 {dimension_numbers = #tpu.dot_dimension_numbers<[1], [0], [0], [1], [0, 0, 1, 1], [], []>} : vector<16x32xf32>, vector<32x96xf32>, vector<16x96xf32> -> vector<16x96xf32>
    %366 = vector.broadcast %338 : vector<1x96xf32> to vector<16x96xf32>
    %367 = arith.addf %365, %366 : vector<16x96xf32>
    %368 = vector.extract_strided_slice %367 {offsets = [0, 0], sizes = [8, 8], strides = [1, 1]} : vector<16x96xf32> to vector<8x8xf32>
    %369 = vector.extract_strided_slice %367 {offsets = [8, 0], sizes = [8, 8], strides = [1, 1]} : vector<16x96xf32> to vector<8x8xf32>
    %370 = vector.extract_strided_slice %367 {offsets = [0, 8], sizes = [8, 8], strides = [1, 1]} : vector<16x96xf32> to vector<8x8xf32>
    %371 = vector.extract_strided_slice %367 {offsets = [8, 8], sizes = [8, 8], strides = [1, 1]} : vector<16x96xf32> to vector<8x8xf32>
    %372 = vector.extract_strided_slice %367 {offsets = [0, 16], sizes = [8, 8], strides = [1, 1]} : vector<16x96xf32> to vector<8x8xf32>
    %373 = vector.extract_strided_slice %367 {offsets = [8, 16], sizes = [8, 8], strides = [1, 1]} : vector<16x96xf32> to vector<8x8xf32>
    %374 = vector.extract_strided_slice %367 {offsets = [0, 24], sizes = [8, 8], strides = [1, 1]} : vector<16x96xf32> to vector<8x8xf32>
    %375 = vector.extract_strided_slice %367 {offsets = [8, 24], sizes = [8, 8], strides = [1, 1]} : vector<16x96xf32> to vector<8x8xf32>
    %376 = vector.shape_cast %368 : vector<8x8xf32> to vector<1x8x8xf32>
    %377 = vector.shape_cast %369 : vector<8x8xf32> to vector<1x8x8xf32>
    %378 = vector.shape_cast %370 : vector<8x8xf32> to vector<1x8x8xf32>
    %379 = vector.shape_cast %371 : vector<8x8xf32> to vector<1x8x8xf32>
    %380 = vector.shape_cast %372 : vector<8x8xf32> to vector<1x8x8xf32>
    %381 = vector.shape_cast %373 : vector<8x8xf32> to vector<1x8x8xf32>
    %382 = vector.shape_cast %374 : vector<8x8xf32> to vector<1x8x8xf32>
    %383 = vector.shape_cast %375 : vector<8x8xf32> to vector<1x8x8xf32>
    %384 = tpu.concatenate %376, %377, %378, %379, %380, %381, %382, %383 in 0 : vector<1x8x8xf32>, vector<1x8x8xf32>, vector<1x8x8xf32>, vector<1x8x8xf32>, vector<1x8x8xf32>, vector<1x8x8xf32>, vector<1x8x8xf32>, vector<1x8x8xf32> -> vector<8x8x8xf32>
    %385 = vector.extract_strided_slice %367 {offsets = [0, 32], sizes = [8, 8], strides = [1, 1]} : vector<16x96xf32> to vector<8x8xf32>
    %386 = vector.extract_strided_slice %367 {offsets = [8, 32], sizes = [8, 8], strides = [1, 1]} : vector<16x96xf32> to vector<8x8xf32>
    %387 = vector.extract_strided_slice %367 {offsets = [0, 40], sizes = [8, 8], strides = [1, 1]} : vector<16x96xf32> to vector<8x8xf32>
    %388 = vector.extract_strided_slice %367 {offsets = [8, 40], sizes = [8, 8], strides = [1, 1]} : vector<16x96xf32> to vector<8x8xf32>
    %389 = vector.extract_strided_slice %367 {offsets = [0, 48], sizes = [8, 8], strides = [1, 1]} : vector<16x96xf32> to vector<8x8xf32>
    %390 = vector.extract_strided_slice %367 {offsets = [8, 48], sizes = [8, 8], strides = [1, 1]} : vector<16x96xf32> to vector<8x8xf32>
    %391 = vector.extract_strided_slice %367 {offsets = [0, 56], sizes = [8, 8], strides = [1, 1]} : vector<16x96xf32> to vector<8x8xf32>
    %392 = vector.extract_strided_slice %367 {offsets = [8, 56], sizes = [8, 8], strides = [1, 1]} : vector<16x96xf32> to vector<8x8xf32>
    %393 = vector.shape_cast %385 : vector<8x8xf32> to vector<1x8x8xf32>
    %394 = vector.shape_cast %386 : vector<8x8xf32> to vector<1x8x8xf32>
    %395 = vector.shape_cast %387 : vector<8x8xf32> to vector<1x8x8xf32>
    %396 = vector.shape_cast %388 : vector<8x8xf32> to vector<1x8x8xf32>
    %397 = vector.shape_cast %389 : vector<8x8xf32> to vector<1x8x8xf32>
    %398 = vector.shape_cast %390 : vector<8x8xf32> to vector<1x8x8xf32>
    %399 = vector.shape_cast %391 : vector<8x8xf32> to vector<1x8x8xf32>
    %400 = vector.shape_cast %392 : vector<8x8xf32> to vector<1x8x8xf32>
    %401 = tpu.concatenate %393, %394, %395, %396, %397, %398, %399, %400 in 0 : vector<1x8x8xf32>, vector<1x8x8xf32>, vector<1x8x8xf32>, vector<1x8x8xf32>, vector<1x8x8xf32>, vector<1x8x8xf32>, vector<1x8x8xf32>, vector<1x8x8xf32> -> vector<8x8x8xf32>
    %402 = vector.extract_strided_slice %367 {offsets = [0, 64], sizes = [8, 8], strides = [1, 1]} : vector<16x96xf32> to vector<8x8xf32>
    %403 = vector.extract_strided_slice %367 {offsets = [8, 64], sizes = [8, 8], strides = [1, 1]} : vector<16x96xf32> to vector<8x8xf32>
    %404 = vector.extract_strided_slice %367 {offsets = [0, 72], sizes = [8, 8], strides = [1, 1]} : vector<16x96xf32> to vector<8x8xf32>
    %405 = vector.extract_strided_slice %367 {offsets = [8, 72], sizes = [8, 8], strides = [1, 1]} : vector<16x96xf32> to vector<8x8xf32>
    %406 = vector.extract_strided_slice %367 {offsets = [0, 80], sizes = [8, 8], strides = [1, 1]} : vector<16x96xf32> to vector<8x8xf32>
    %407 = vector.extract_strided_slice %367 {offsets = [8, 80], sizes = [8, 8], strides = [1, 1]} : vector<16x96xf32> to vector<8x8xf32>
    %408 = vector.extract_strided_slice %367 {offsets = [0, 88], sizes = [8, 8], strides = [1, 1]} : vector<16x96xf32> to vector<8x8xf32>
    %409 = vector.extract_strided_slice %367 {offsets = [8, 88], sizes = [8, 8], strides = [1, 1]} : vector<16x96xf32> to vector<8x8xf32>
    %410 = vector.shape_cast %402 : vector<8x8xf32> to vector<1x8x8xf32>
    %411 = vector.shape_cast %403 : vector<8x8xf32> to vector<1x8x8xf32>
    %412 = vector.shape_cast %404 : vector<8x8xf32> to vector<1x8x8xf32>
    %413 = vector.shape_cast %405 : vector<8x8xf32> to vector<1x8x8xf32>
    %414 = vector.shape_cast %406 : vector<8x8xf32> to vector<1x8x8xf32>
    %415 = vector.shape_cast %407 : vector<8x8xf32> to vector<1x8x8xf32>
    %416 = vector.shape_cast %408 : vector<8x8xf32> to vector<1x8x8xf32>
    %417 = vector.shape_cast %409 : vector<8x8xf32> to vector<1x8x8xf32>
    %418 = tpu.concatenate %410, %411, %412, %413, %414, %415, %416, %417 in 0 : vector<1x8x8xf32>, vector<1x8x8xf32>, vector<1x8x8xf32>, vector<1x8x8xf32>, vector<1x8x8xf32>, vector<1x8x8xf32>, vector<1x8x8xf32>, vector<1x8x8xf32> -> vector<8x8x8xf32>
    "tpu.trace_start"() <{level = 10 : i32, message = "gqd,gkd->gqk"}> : () -> ()
    %cst_75 = arith.constant dense<0.000000e+00> : vector<8x8x8xf32>
    %419 = tpu.matmul %384, %401, %cst_75 {dimension_numbers = #tpu.dot_dimension_numbers<[2], [2], [1], [1], [0, 0, 0, 1, 1, 1], [0], [0]>} : vector<8x8x8xf32>, vector<8x8x8xf32>, vector<8x8x8xf32> -> vector<8x8x8xf32>
    "tpu.trace_stop"() : () -> ()
    %cst_76 = arith.constant 0.353553385 : f32
    %420 = vector.broadcast %cst_76 : f32 to vector<8x8x8xf32>
    %421 = arith.mulf %419, %420 : vector<8x8x8xf32>
    %cst_77 = arith.constant dense<0xFF800000> : vector<8x8xf32>
    %422 = vector.multi_reduction <maximumf>, %421, %cst_77 [2] : vector<8x8x8xf32> to vector<8x8xf32>
    %423 = vector.shape_cast %422 : vector<8x8xf32> to vector<8x8x1xf32>
    %424 = vector.broadcast %423 : vector<8x8x1xf32> to vector<8x8x8xf32>
    %425 = arith.subf %421, %424 : vector<8x8x8xf32>
    %426 = math.exp %425 : vector<8x8x8xf32>
    %cst_78 = arith.constant dense<0.000000e+00> : vector<8x8xf32>
    %427 = vector.multi_reduction <add>, %426, %cst_78 [2] : vector<8x8x8xf32> to vector<8x8xf32>
    %428 = vector.shape_cast %427 : vector<8x8xf32> to vector<8x8x1xf32>
    %429 = tpu.reciprocal %428 {approx = true} : vector<8x8x1xf32> -> vector<8x8x1xf32>
    %430 = vector.broadcast %429 : vector<8x8x1xf32> to vector<8x8x8xf32>
    %431 = arith.mulf %426, %430 : vector<8x8x8xf32>
    "tpu.trace_start"() <{level = 10 : i32, message = "gqk,gkd->gqd"}> : () -> ()
    %cst_79 = arith.constant dense<0.000000e+00> : vector<8x8x8xf32>
    %432 = tpu.matmul %431, %418, %cst_79 {dimension_numbers = #tpu.dot_dimension_numbers<[2], [1], [1], [2], [0, 0, 0, 1, 1, 2], [0], [0]>} : vector<8x8x8xf32>, vector<8x8x8xf32>, vector<8x8x8xf32> -> vector<8x8x8xf32>
    "tpu.trace_stop"() : () -> ()
    %433 = vector.extract_strided_slice %432 {offsets = [0, 0, 0], sizes = [1, 8, 8], strides = [1, 1, 1]} : vector<8x8x8xf32> to vector<1x8x8xf32>
    %434 = vector.shape_cast %433 : vector<1x8x8xf32> to vector<8x8xf32>
    %435 = vector.extract_strided_slice %432 {offsets = [2, 0, 0], sizes = [1, 8, 8], strides = [1, 1, 1]} : vector<8x8x8xf32> to vector<1x8x8xf32>
    %436 = vector.shape_cast %435 : vector<1x8x8xf32> to vector<8x8xf32>
    %437 = vector.extract_strided_slice %432 {offsets = [4, 0, 0], sizes = [1, 8, 8], strides = [1, 1, 1]} : vector<8x8x8xf32> to vector<1x8x8xf32>
    %438 = vector.shape_cast %437 : vector<1x8x8xf32> to vector<8x8xf32>
    %439 = vector.extract_strided_slice %432 {offsets = [6, 0, 0], sizes = [1, 8, 8], strides = [1, 1, 1]} : vector<8x8x8xf32> to vector<1x8x8xf32>
    %440 = vector.shape_cast %439 : vector<1x8x8xf32> to vector<8x8xf32>
    %441 = tpu.concatenate %434, %436, %438, %440 in 1 : vector<8x8xf32>, vector<8x8xf32>, vector<8x8xf32>, vector<8x8xf32> -> vector<8x32xf32>
    %442 = vector.extract_strided_slice %432 {offsets = [1, 0, 0], sizes = [1, 8, 8], strides = [1, 1, 1]} : vector<8x8x8xf32> to vector<1x8x8xf32>
    %443 = vector.shape_cast %442 : vector<1x8x8xf32> to vector<8x8xf32>
    %444 = vector.extract_strided_slice %432 {offsets = [3, 0, 0], sizes = [1, 8, 8], strides = [1, 1, 1]} : vector<8x8x8xf32> to vector<1x8x8xf32>
    %445 = vector.shape_cast %444 : vector<1x8x8xf32> to vector<8x8xf32>
    %446 = vector.extract_strided_slice %432 {offsets = [5, 0, 0], sizes = [1, 8, 8], strides = [1, 1, 1]} : vector<8x8x8xf32> to vector<1x8x8xf32>
    %447 = vector.shape_cast %446 : vector<1x8x8xf32> to vector<8x8xf32>
    %448 = vector.extract_strided_slice %432 {offsets = [7, 0, 0], sizes = [1, 8, 8], strides = [1, 1, 1]} : vector<8x8x8xf32> to vector<1x8x8xf32>
    %449 = vector.shape_cast %448 : vector<1x8x8xf32> to vector<8x8xf32>
    %450 = tpu.concatenate %443, %445, %447, %449 in 1 : vector<8x8xf32>, vector<8x8xf32>, vector<8x8xf32>, vector<8x8xf32> -> vector<8x32xf32>
    %451 = tpu.concatenate %441, %450 in 0 : vector<8x32xf32>, vector<8x32xf32> -> vector<16x32xf32>
    %452 = vector.extract_strided_slice %331 {offsets = [0, 96], sizes = [32, 32], strides = [1, 1]} : vector<32x192xf32> to vector<32x32xf32>
    %cst_80 = arith.constant dense<0.000000e+00> : vector<16x32xf32>
    %453 = tpu.matmul %451, %452, %cst_80 {dimension_numbers = #tpu.dot_dimension_numbers<[1], [0], [0], [1], [0, 0, 1, 1], [], []>} : vector<16x32xf32>, vector<32x32xf32>, vector<16x32xf32> -> vector<16x32xf32>
    %454 = arith.addf %329, %453 : vector<16x32xf32>
    %455 = vector.broadcast %339 : vector<1x32xf32> to vector<16x32xf32>
    %456 = arith.addf %454, %455 : vector<16x32xf32>
    %cst_81 = arith.constant dense<0.000000e+00> : vector<16xf32>
    %457 = vector.multi_reduction <add>, %456, %cst_81 [1] : vector<16x32xf32> to vector<16xf32>
    %458 = vector.shape_cast %457 : vector<16xf32> to vector<16x1xf32>
    %cst_82 = arith.constant 3.200000e+01 : f32
    %459 = vector.broadcast %cst_82 : f32 to vector<16x1xf32>
    %460 = arith.divf %458, %459 : vector<16x1xf32>
    %461 = vector.broadcast %460 : vector<16x1xf32> to vector<16x32xf32>
    %462 = arith.subf %456, %461 : vector<16x32xf32>
    %463 = arith.mulf %462, %462 : vector<16x32xf32>
    %cst_83 = arith.constant dense<0.000000e+00> : vector<16xf32>
    %464 = vector.multi_reduction <add>, %463, %cst_83 [1] : vector<16x32xf32> to vector<16xf32>
    %465 = vector.shape_cast %464 : vector<16xf32> to vector<16x1xf32>
    %cst_84 = arith.constant 3.200000e+01 : f32
    %466 = vector.broadcast %cst_84 : f32 to vector<16x1xf32>
    %467 = arith.divf %465, %466 : vector<16x1xf32>
    %468 = vector.broadcast %460 : vector<16x1xf32> to vector<16x32xf32>
    %469 = arith.subf %456, %468 : vector<16x32xf32>
    %cst_85 = arith.constant 9.99999974E-6 : f32
    %470 = vector.broadcast %cst_85 : f32 to vector<16x1xf32>
    %471 = arith.addf %467, %470 : vector<16x1xf32>
    %472 = math.rsqrt %471 : vector<16x1xf32>
    %473 = vector.broadcast %472 : vector<16x1xf32> to vector<16x32xf32>
    %474 = arith.mulf %469, %473 : vector<16x32xf32>
    %475 = vector.broadcast %336 : vector<1x32xf32> to vector<16x32xf32>
    %476 = arith.mulf %474, %475 : vector<16x32xf32>
    %477 = vector.broadcast %337 : vector<1x32xf32> to vector<16x32xf32>
    %478 = arith.addf %476, %477 : vector<16x32xf32>
    %479 = vector.extract_strided_slice %331 {offsets = [0, 128], sizes = [32, 64], strides = [1, 1]} : vector<32x192xf32> to vector<32x64xf32>
    %cst_86 = arith.constant dense<0.000000e+00> : vector<16x64xf32>
    %480 = tpu.matmul %478, %479, %cst_86 {dimension_numbers = #tpu.dot_dimension_numbers<[1], [0], [0], [1], [0, 0, 1, 1], [], []>} : vector<16x32xf32>, vector<32x64xf32>, vector<16x64xf32> -> vector<16x64xf32>
    %481 = vector.broadcast %340 : vector<1x64xf32> to vector<16x64xf32>
    %482 = arith.addf %480, %481 : vector<16x64xf32>
    %cst_87 = arith.constant 0.000000e+00 : f32
    %483 = vector.broadcast %cst_87 : f32 to vector<16x64xf32>
    %484 = arith.maximumf %482, %483 : vector<16x64xf32>
    %c2_88 = arith.constant 2 : index
    %c0_89 = arith.constant 0 : index
    %c0_90 = arith.constant 0 : index
    %485 = vector.load %arg5[%c2_88, %c0_89, %c0_90] : memref<3x64x32xf32, #tpu.memory_space<vmem>>, vector<1x64x32xf32>
    %486 = vector.shape_cast %485 : vector<1x64x32xf32> to vector<64x32xf32>
    %cst_91 = arith.constant dense<0.000000e+00> : vector<16x32xf32>
    %487 = tpu.matmul %484, %486, %cst_91 {dimension_numbers = #tpu.dot_dimension_numbers<[1], [0], [0], [1], [0, 0, 1, 1], [], []>} : vector<16x64xf32>, vector<64x32xf32>, vector<16x32xf32> -> vector<16x32xf32>
    %488 = arith.addf %456, %487 : vector<16x32xf32>
    %489 = vector.broadcast %341 : vector<1x32xf32> to vector<16x32xf32>
    %490 = arith.addf %488, %489 : vector<16x32xf32>
    %c0_92 = arith.constant 0 : index
    %c0_93 = arith.constant 0 : index
    %491 = vector.load %arg7[%c0_92, %c0_93] : memref<33x9xf32, #tpu.memory_space<vmem>>, vector<33x9xf32>
    %492 = vector.extract_strided_slice %491 {offsets = [0, 0], sizes = [32, 8], strides = [1, 1]} : vector<33x9xf32> to vector<32x8xf32>
    %493 = vector.extract_strided_slice %491 {offsets = [32, 0], sizes = [1, 8], strides = [1, 1]} : vector<33x9xf32> to vector<1x8xf32>
    %494 = vector.extract_strided_slice %491 {offsets = [0, 8], sizes = [32, 1], strides = [1, 1]} : vector<33x9xf32> to vector<32x1xf32>
    %495 = vector.extract_strided_slice %491 {offsets = [32, 8], sizes = [1, 1], strides = [1, 1]} : vector<33x9xf32> to vector<1x1xf32>
    %cst_94 = arith.constant dense<0.000000e+00> : vector<16x1xf32>
    %496 = tpu.matmul %490, %494, %cst_94 {dimension_numbers = #tpu.dot_dimension_numbers<[1], [0], [0], [1], [0, 0, 1, 1], [], []>} : vector<16x32xf32>, vector<32x1xf32>, vector<16x1xf32> -> vector<16x1xf32>
    %497 = vector.broadcast %495 : vector<1x1xf32> to vector<16x1xf32>
    %498 = arith.addf %496, %497 : vector<16x1xf32>
    %cst_95 = arith.constant 5.000000e-01 : f32
    %499 = vector.broadcast %cst_95 : f32 to vector<16x1xf32>
    %500 = arith.cmpf ogt, %1, %499 : vector<16x1xf32>
    %cst_96 = arith.constant -1.000000e+09 : f32
    %501 = vector.broadcast %cst_96 : f32 to vector<16x1xf32>
    %502 = arith.select %500, %498, %501 : vector<16x1xi1>, vector<16x1xf32>
    %503 = vector.extract_strided_slice %502 {offsets = [0, 0], sizes = [8, 1], strides = [1, 1]} : vector<16x1xf32> to vector<8x1xf32>
    %504 = vector.extract_strided_slice %490 {offsets = [0, 0], sizes = [8, 32], strides = [1, 1]} : vector<16x32xf32> to vector<8x32xf32>
    %cst_97 = arith.constant dense<0xFF800000> : vector<1xf32>
    %505 = vector.multi_reduction <maximumf>, %503, %cst_97 [0] : vector<8x1xf32> to vector<1xf32>
    %506 = vector.shape_cast %505 : vector<1xf32> to vector<1x1xf32>
    %507 = vector.broadcast %506 : vector<1x1xf32> to vector<8x1xf32>
    %508 = arith.subf %503, %507 : vector<8x1xf32>
    %509 = math.exp %508 : vector<8x1xf32>
    %cst_98 = arith.constant dense<0.000000e+00> : vector<1xf32>
    %510 = vector.multi_reduction <add>, %509, %cst_98 [0] : vector<8x1xf32> to vector<1xf32>
    %511 = vector.shape_cast %510 : vector<1xf32> to vector<1x1xf32>
    %512 = tpu.reciprocal %511 {approx = true} : vector<1x1xf32> -> vector<1x1xf32>
    %513 = vector.broadcast %512 : vector<1x1xf32> to vector<8x1xf32>
    %514 = arith.mulf %509, %513 : vector<8x1xf32>
    %515 = vector.broadcast %514 : vector<8x1xf32> to vector<8x32xf32>
    %516 = arith.mulf %515, %504 : vector<8x32xf32>
    %cst_99 = arith.constant dense<0.000000e+00> : vector<32xf32>
    %517 = vector.multi_reduction <add>, %516, %cst_99 [0] : vector<8x32xf32> to vector<32xf32>
    %518 = vector.shape_cast %517 : vector<32xf32> to vector<1x32xf32>
    %519 = vector.extract_strided_slice %502 {offsets = [8, 0], sizes = [8, 1], strides = [1, 1]} : vector<16x1xf32> to vector<8x1xf32>
    %520 = vector.extract_strided_slice %490 {offsets = [8, 0], sizes = [8, 32], strides = [1, 1]} : vector<16x32xf32> to vector<8x32xf32>
    %cst_100 = arith.constant dense<0xFF800000> : vector<1xf32>
    %521 = vector.multi_reduction <maximumf>, %519, %cst_100 [0] : vector<8x1xf32> to vector<1xf32>
    %522 = vector.shape_cast %521 : vector<1xf32> to vector<1x1xf32>
    %523 = vector.broadcast %522 : vector<1x1xf32> to vector<8x1xf32>
    %524 = arith.subf %519, %523 : vector<8x1xf32>
    %525 = math.exp %524 : vector<8x1xf32>
    %cst_101 = arith.constant dense<0.000000e+00> : vector<1xf32>
    %526 = vector.multi_reduction <add>, %525, %cst_101 [0] : vector<8x1xf32> to vector<1xf32>
    %527 = vector.shape_cast %526 : vector<1xf32> to vector<1x1xf32>
    %528 = tpu.reciprocal %527 {approx = true} : vector<1x1xf32> -> vector<1x1xf32>
    %529 = vector.broadcast %528 : vector<1x1xf32> to vector<8x1xf32>
    %530 = arith.mulf %525, %529 : vector<8x1xf32>
    %531 = vector.broadcast %530 : vector<8x1xf32> to vector<8x32xf32>
    %532 = arith.mulf %531, %520 : vector<8x32xf32>
    %cst_102 = arith.constant dense<0.000000e+00> : vector<32xf32>
    %533 = vector.multi_reduction <add>, %532, %cst_102 [0] : vector<8x32xf32> to vector<32xf32>
    %534 = vector.shape_cast %533 : vector<32xf32> to vector<1x32xf32>
    %535 = tpu.concatenate %518, %534 in 0 : vector<1x32xf32>, vector<1x32xf32> -> vector<2x32xf32>
    %c0_103 = arith.constant 0 : index
    %c0_104 = arith.constant 0 : index
    %536 = vector.load %arg8[%c0_103, %c0_104] : memref<2x32xf32, #tpu.memory_space<vmem>>, vector<2x32xf32>
    tpu.vector_store %arg8[%c0_103, %c0_104], %535 {strides = array<i32>} : memref<2x32xf32, #tpu.memory_space<vmem>>, vector<2x32xf32>,
    %cst_105 = arith.constant dense<0.000000e+00> : vector<2x8xf32>
    %537 = tpu.matmul %535, %492, %cst_105 {dimension_numbers = #tpu.dot_dimension_numbers<[1], [0], [0], [1], [0, 0, 1, 1], [], []>} : vector<2x32xf32>, vector<32x8xf32>, vector<2x8xf32> -> vector<2x8xf32>
    %538 = vector.broadcast %493 : vector<1x8xf32> to vector<2x8xf32>
    %539 = arith.addf %537, %538 : vector<2x8xf32>
    %c0_106 = arith.constant 0 : index
    %c0_107 = arith.constant 0 : index
    %540 = vector.load %arg9[%c0_106, %c0_107] : memref<2x8xf32, #tpu.memory_space<vmem>>, vector<2x8xf32>
    tpu.vector_store %arg9[%c0_106, %c0_107], %539 {strides = array<i32>} : memref<2x8xf32, #tpu.memory_space<vmem>>, vector<2x8xf32>,
    return
  }
}

</mosaic_0001>

<bundles_post_ra>
// kernel: tpu_custom_call.1
= control target key start
LH: loop header
LB: loop body
LE: loop exit
PB: predicated region body
PF: predicated region fallthrough
CT: control target
= control target key end

     0   :  { %15 = vsyncpa [#allocation3], 0  ;;  %vm53_vm0 = vcmask 1042432   ;;  %vm46_vm1 = vcmask 416768   ;;  %v6851_v4 = vmov 0   ;;  %s7992_s0 = inlined_call_operand.vmem [shape: f32[16,51], index: 0, kind: input, shape index: {}]   ;;  %s7993_s1 = inlined_call_operand.vmem [shape: f32[16,1], index: 1, kind: input, shape index: {}]   ;;  %s7994_s2 = inlined_call_operand.vmem [shape: f32[16,32], index: 2, kind: input, shape index: {}]   ;;  %s7995_s3 = inlined_call_operand.vmem [shape: f32[51,32], index: 3, kind: input, shape index: {}]   ;;  %s7996_s4 = inlined_call_operand.vmem [shape: f32[3,32,192], index: 4, kind: input, shape index: {}]   ;;  %s7997_s5 = inlined_call_operand.vmem [shape: f32[3,64,32], index: 5, kind: input, shape index: {}]   ;;  %s7998_s6 = inlined_call_operand.vmem [shape: f32[3,8,96], index: 6, kind: input, shape index: {}]   ;;  %s7999_s7 = inlined_call_operand.vmem [shape: f32[33,9], index: 7, kind: input, shape index: {}]   ;;  %s8000_s8 = inlined_call_operand.hbm [shape: f32[2,32], index: 8, kind: output, shape index: {0}]   ;;  %s8001_s9 = inlined_call_operand.hbm [shape: f32[2,8], index: 9, kind: output, shape index: {1}]  }
   0x1   :  { %v45_v0 = vld [vmem:[%s7995_s3 + $0x30] sm:$0x7]  ;;  %v44_v1 = vld [vmem:[%s7995_s3 + $0x28] sm:$0xff]  ;;  %v43_v2 = vld [vmem:[%s7995_s3 + $0x20] sm:$0xff]  ;;  %6675 = vset.pattern.permute.xlu0 %v6851_v4 }
   0x2   :  { %6226 = vmatprep.subr.msk.mxu0 %vm53_vm0, %v45_v0  ;;  %v33_v3 = vld [vmem:[%s7992_s0] sm:$0xff]  ;;  %v42_v6 = vld [vmem:[%s7995_s3 + $0x18] sm:$0xff] }
   0x3   :  { %6227 = vmatpush3.msk.msra.mxu0 %vm53_vm0, %v45_v0  ;;  %6240 = vmatprep.mubr.msk.f32.mxu0 %vm46_vm1, %v33_v3  ;;  %v35_v5 = vld [vmem:[%s7993_s1] sm:$0xff] }
   0x4   :  { %6228 = vmatprep.subr.mxu0 %v44_v1  ;;  %134 = vperm.xlu0 %6675, %v35_v5  }
   0x5   :  { %6229 = vmatpush3.msra.mxu0 %v44_v1 }
   0x6   :  { %16 = vsyncpa [#allocation5], 0  ;;  %6230 = vmatprep.subr.mxu0 %v43_v2  ;;  %v36_v7 = vld [vmem:[%s7993_s1 + $0x8] sm:$0xff]  ;;  %6676 = vset.pattern.permute.xlu1 %v6851_v4  ;;  %v41_v8 = vld [vmem:[%s7995_s3 + $0x10] sm:$0xff]  ;;  %vm155_vm2 = vcmask 261120   ;;  %v183_v43 = vlaneseq  ;;  %s6852_s21 = smov 120  }
   0x7   :  { %6231 = vmatpush3.msra.mxu0 %v43_v2  ;;  %v40_v9 = vld [vmem:[%s7995_s3 + $0x8] sm:$0xff]  ;;  %v39_v10 = vld [vmem:[%s7995_s3] sm:$0xff]  ;;  %v6971_v34 = vld [vmem:[%s7996_s4 + $0x30] sm:$0xff]  ;;  %s6853_s22 = smov 104   ;;  %v6854_v1 = vmov 0.0   ;;  %s6855_s23 = smov 112  }
   0x8   :  { %6232 = vmatprep.subr.mxu0 %v42_v6  ;;  %139 = vperm.xlu0 %6675, %v36_v7   ;;  %v34_v11 = vld [vmem:[%s7992_s0 + $0x8] sm:$0xff]  ;;  %v37_v15 = vld [vmem:[%s7994_s2] sm:$0xff]  ;;  %v6983_v36 = vld [vmem:[%s7996_s4 + $0x10] sm:$0xff]  ;;  %v6996_v45 = vshrl.u32 %v183_v43, 7  ;;  %vm6856_vm3 = vmmov 0   ;;  %s6857_s24 = smov 96  }
   0x9   :  { %6233 = vmatpush3.msra.mxu0 %v42_v6  ;;  %v38_v19 = vld [vmem:[%s7994_s2 + $0x8] sm:$0xff]  ;;  %v6976_v35 = vld [vmem:[%s7996_s4 + $0x20] sm:$0xff]  ;;  %6243 = vmatprep.subr.mxu1 %v6971_v34  ;;  %vm296_vm4 = vcmask 64512   ;;  %s6858_s25 = smov 64   ;;  %s6859_s26 = smov 32   ;;  %vm1620_vm5 = vcmask 130048  }
   0xa   :  { %6234 = vmatprep.subr.mxu0 %v41_v8  ;;  %6244 = vmatpush3.msra.mxu1 %v6971_v34  ;;  %v6992_v37 = vld [vmem:[%s7996_s4] sm:$0xff]  ;;  %v6999_v46 = vsub.s32 0, %v6996_v45  ;;  %v7007_v48 = vsub.s32 1, %v6996_v45  ;;  %v7016_v59 = vsub.s32 4, %v6996_v45  ;;  %s6860_s27 = smov 8   ;;  %s6861_s28 = smov 16  }
   0xb   :  { %6235 = vmatpush3.msra.mxu0 %v41_v8  ;;  %6245 = vmatprep.subr.mxu1 %v6976_v35  ;;  %v7004_v47 = vld [vmem:[%s7998_s6] sm:$0xff]  ;;  %s6862_s29 = smov 24   ;;  %vm1622_vm6 = vcmask 195584   ;;  %vm1877_vm7 = vcmask 523264   ;;  %vm5717_vm9 = vcmask 7168   ;;  %vm5782_vm11 = vcmask 1040384  }
   0xc   :  { %6236 = vmatprep.subr.mxu0 %v40_v9  ;;  %6246 = vmatpush3.msra.mxu1 %v6976_v35  ;;  %v186_v49 = vrot.slane %v7004_v47, %v6999_v46  ;;  %v192_v52 = vrot.slane %v7004_v47, %v7007_v48  ;;  %v198_v60 = vrot.slane %v7004_v47, %v7016_v59  ;;  %vm5784_vm12 = vcmask 254976  }
   0xd   :  { %6237 = vmatpush3.msra.mxu0 %v40_v9  ;;  %6247 = vmatprep.subr.mxu1 %v6983_v36 }
   0xe   :  { %6238 = vmatprep.subr.mxu0 %v39_v10  ;;  %6248 = vmatpush3.msra.mxu1 %v6983_v36 }
   0xf   :  { %6239 = vmatpush3.msra.mxu0 %v39_v10  ;;  %6249 = vmatprep.subr.mxu1 %v6992_v37 }
  0x10   :  { %6241 = vmatmul.mubr.msk.f32.vlgmr.msra.gmra.mxu0 %vm46_vm1, %v34_v11  ;;  %6250 = vmatpush3.msra.mxu1 %v6992_v37 }
  0x11   :  { %6254 = vmatprep.subr.mxu1 %v6854_v1  ;;  %6264 = vmatprep.subr.mxu0 %v6854_v1 }
  0x12   :  { %6266 = vmatprep.mubr.msk.f32.mxu0 %vm6856_vm3, %v6854_v1 }
  0x7f   :  { %v135_v12 = vpop.permute.xlu0 %134 }
  0x83   :  { %v140_v13 = vpop.permute.xlu0 %139 }
  0xd0   :  { %v6242_v14 = vpop.f32.mrf.mxu0 }
  0xd1   :  { %v143_v17 = vmul.f32 %v6242_v14, %v140_v13 }
  0xd2   :  { %v123_v16 = vpop.f32.mrf.mxu0 }
  0xd3   :  { %v142_v18 = vmul.f32 %v135_v12, %v123_v16  ;;  %v6958_v21 = vadd.f32 %v143_v17, %v38_v19 }
  0xd5   :  { %v6956_v20 = vadd.f32 %v142_v18, %v37_v15  ;;  %v159_v23 = vsel %vm155_vm2, %v6958_v21, 0.0 }
  0xd7   :  { %v156_v22 = vsel %vm155_vm2, %v6956_v20, 0.0 }
  0xd8   :  { %157 = vadd.xlane.f32.xlu1 %v156_v22 }
  0xdc   :  { %160 = vadd.xlane.f32.xlu1 %v159_v23 }
 0x161   :  { %v158_v24 = vpop.xlane.xlu1 %157 }
 0x162   :  { %v163_v25 = vmul.f32 0.03125, %v158_v24 }
 0x164   :  { %v165_v26 = vsub.f32 %v6956_v20, %v163_v25 }
 0x165   :  { %v161_v27 = vpop.xlane.xlu1 %160 }
 0x166   :  { %v164_v28 = vmul.f32 0.03125, %v161_v27  ;;  %v167_v29 = vmul.f32 %v165_v26, %v165_v26 }
 0x168   :  { %v166_v30 = vsub.f32 %v6958_v21, %v164_v28  ;;  %v169_v31 = vsel %vm155_vm2, %v167_v29, 0.0 }
 0x169   :  { %170 = vadd.xlane.f32.xlu0 %v169_v31 }
 0x16a   :  { %v168_v32 = vmul.f32 %v166_v30, %v166_v30 }
 0x16c   :  { %v172_v33 = vsel %vm155_vm2, %v168_v32, 0.0 }
 0x16d   :  { %173 = vadd.xlane.f32.xlu1 %v172_v33 }
 0x1f2   :  { %v171_v38 = vpop.xlane.xlu0 %170 }
 0x1f3   :  { %v175_v39 = vmul.f32 0.03125, %v171_v38 }
 0x1f5   :  { %v177_v40 = vadd.f32 1e-05, %v175_v39 }
 0x1f6   :  { %v174_v41 = vpop.xlane.xlu1 %173 }
 0x1f7   :  { %6677 = vrsqrt.f32 %v177_v40  ;;  %v176_v42 = vmul.f32 0.03125, %v174_v41 }
 0x1f9   :  { %v178_v44 = vadd.f32 1e-05, %v176_v42 }
 0x1fb   :  { %6679 = vrsqrt.f32 %v178_v44 }
 0x204   :  { %v6678_v50 = vpop.eup %6677 }
 0x205   :  { %v181_v51 = vmul.f32 %v6678_v50, %v165_v26 }
 0x207   :  { %v187_v53 = vmul.f32 %v186_v49, %v181_v51 }
 0x208   :  { %v6680_v54 = vpop.eup %6679 }
 0x209   :  { %v182_v55 = vmul.f32 %v6680_v54, %v166_v30  ;;  %v193_v56 = vadd.f32 %v192_v52, %v187_v53 }
 0x20b   :  { %v188_v57 = vmul.f32 %v186_v49, %v182_v55  ;;  %6251 = vmatprep.mubr.msk.f32.mxu1 %vm155_vm2, %v193_v56 }
 0x20d   :  { %v194_v58 = vadd.f32 %v192_v52, %v188_v57 }
 0x20f   :  { %6252 = vmatmul.mubr.msk.f32.vlgmr.msra.gmra.mxu1 %vm155_vm2, %v194_v58 }
 0x210   :  { %6256 = vmatprep.mubr.msk.f32.mxu1 %vm6856_vm3, %v6854_v1 }
 0x2cf   :  { %v6253_v61 = vpop.f32.mrf.mxu1 }
 0x2d0   :  { %v7020_v62 = vadd.f32 %v6253_v61, %v198_v60 }
 0x2d1   :  { %v271_v63 = vpop.f32.mrf.mxu1 }
 0x2d2   :  { %v7022_v0 = vadd.f32 %v271_v63, %v198_v60  ;;  %284 = vrot.lane.b32.xlu1 %v7020_v62, %s6852_s21 }
 0x2d4   :  { %290 = vrot.lane.b32.xlu0 %v7022_v0, %s6853_s22 }
 0x2d6   :  { %281 = vrot.lane.b32.xlu1 %v7022_v0, %s6852_s21 }
 0x2da   :  { %286 = vrot.lane.b32.xlu1 %v7022_v0, %s6855_s23 }
 0x2de   :  { %288 = vrot.lane.b32.xlu1 %v7020_v62, %s6855_s23 }
 0x2e2   :  { %292 = vrot.lane.b32.xlu1 %v7020_v62, %s6853_s22 }
 0x2e6   :  { %371 = vrot.lane.b32.xlu1 %v7020_v62, %s6857_s24 }
 0x2ea   :  { %294 = vrot.lane.b32.xlu1 %v7022_v0, %s6857_s24 }
 0x344   :  { %v7046_v2 = vpop.permute.xlu1 %284 }
 0x346   :  { %v7058_v5 = vpop.permute.xlu0 %290 }
 0x348   :  { %v7048_v3 = vpop.permute.xlu1 %281 }
 0x349   :  { %447 = vrot.lane.b32.xlu1 %v7048_v3, %s6857_s24 }
 0x34c   :  { %v7052_v4 = vpop.permute.xlu1 %286 }
 0x34d   :  { %523 = vrot.lane.b32.xlu1 %v7046_v2, %s6857_s24  ;;  %599 = vrot.lane.b32.xlu0 %v7052_v4, %s6857_s24 }
 0x350   :  { %v7060_v6 = vpop.permute.xlu1 %288 }
 0x351   :  { %751 = vrot.lane.b32.xlu0 %v7058_v5, %s6857_s24  ;;  %675 = vrot.lane.b32.xlu1 %v7060_v6, %s6857_s24 }
 0x354   :  { %v7066_v7 = vpop.permute.xlu1 %292 }
 0x355   :  { %827 = vrot.lane.b32.xlu1 %v7066_v7, %s6857_s24 }
 0x358   :  { %v372_v8 = vpop.permute.xlu1 %371 }
 0x35c   :  { %v295_v9 = vpop.permute.xlu1 %294 }
 0x35d   :  { %6255 = vmatpush3.xpose.msk.msra.mxu1 %vm296_vm4, %v295_v9 }
 0x35e   :  { %6259 = vmatprep.subr.mxu1 %v6854_v1 }
 0x360   :  { %6257 = vmatmul.mubr.msk.f32.vlgmr.msra.gmra.mxu1 %vm296_vm4, %v7022_v0 }
 0x361   :  { %6260 = vmatpush3.xpose.msk.msra.mxu1 %vm296_vm4, %v372_v8  ;;  %6261 = vmatprep.mubr.msk.f32.mxu1 %vm6856_vm3, %v6854_v1 }
 0x362   :  { %6269 = vmatprep.subr.mxu1 %v6854_v1 }
 0x364   :  { %6262 = vmatmul.mubr.msk.f32.vlgmr.msra.gmra.mxu1 %vm296_vm4, %v7020_v62 }
 0x365   :  { %6271 = vmatprep.mubr.msk.f32.mxu1 %vm6856_vm3, %v6854_v1 }
 0x3bb   :  { %v448_v10 = vpop.permute.xlu1 %447 }
 0x3bc   :  { %6265 = vmatpush3.xpose.msk.msra.mxu0 %vm296_vm4, %v448_v10 }
 0x3bd   :  { %6274 = vmatprep.subr.mxu0 %v6854_v1 }
 0x3bf   :  { %v600_v11 = vpop.permute.xlu0 %599  ;;  %6267 = vmatmul.mubr.msk.f32.vlgmr.msra.gmra.mxu0 %vm296_vm4, %v7048_v3  ;;  %v524_v12 = vpop.permute.xlu1 %523 }
 0x3c0   :  { %6270 = vmatpush3.xpose.msk.msra.mxu1 %vm296_vm4, %v524_v12  ;;  %6275 = vmatpush3.xpose.msk.msra.mxu0 %vm296_vm4, %v600_v11 }
 0x3c1   :  { %6276 = vmatprep.mubr.msk.f32.mxu0 %vm6856_vm3, %v6854_v1  ;;  %6279 = vmatprep.subr.mxu1 %v6854_v1 }
 0x3c2   :  { %6284 = vmatprep.subr.mxu0 %v6854_v1 }
 0x3c3   :  { %v752_v13 = vpop.permute.xlu0 %751  ;;  %6272 = vmatmul.mubr.msk.f32.vlgmr.msra.gmra.mxu1 %vm296_vm4, %v7046_v2  ;;  %6277 = vmatmul.mubr.msk.f32.vlgmr.msra.gmra.mxu0 %vm296_vm4, %v7052_v4  ;;  %v676_v14 = vpop.permute.xlu1 %675 }
 0x3c4   :  { %6280 = vmatpush3.xpose.msk.msra.mxu1 %vm296_vm4, %v676_v14  ;;  %6285 = vmatpush3.xpose.msk.msra.mxu0 %vm296_vm4, %v752_v13 }
 0x3c5   :  { %6281 = vmatprep.mubr.msk.f32.mxu1 %vm6856_vm3, %v6854_v1  ;;  %6286 = vmatprep.mubr.msk.f32.mxu0 %vm6856_vm3, %v6854_v1 }
 0x3c6   :  { %6289 = vmatprep.subr.mxu1 %v6854_v1  ;;  %6294 = vmatprep.subr.mxu0 %v6854_v1 }
 0x3c7   :  { %6282 = vmatmul.mubr.msk.f32.vlgmr.msra.gmra.mxu1 %vm296_vm4, %v7060_v6  ;;  %6287 = vmatmul.mubr.msk.f32.vlgmr.msra.gmra.mxu0 %vm296_vm4, %v7058_v5  ;;  %v828_v15 = vpop.permute.xlu1 %827 }
 0x3c8   :  { %6290 = vmatpush3.xpose.msk.msra.mxu1 %vm296_vm4, %v828_v15  ;;  %6291 = vmatprep.mubr.msk.f32.mxu1 %vm6856_vm3, %v6854_v1 }
 0x3c9   :  { %6299 = vmatprep.subr.mxu1 %v6854_v1  ;;  %6296 = vmatprep.mubr.msk.f32.mxu0 %vm6856_vm3, %v6854_v1 }
 0x3cb   :  { %6292 = vmatmul.mubr.msk.f32.vlgmr.msra.gmra.mxu1 %vm296_vm4, %v7066_v7 }
 0x3cc   :  { %6301 = vmatprep.mubr.msk.f32.mxu1 %vm6856_vm3, %v6854_v1 }
 0x420   :  { %v367_v16 = vpop.f32.mrf.mxu1 }
 0x421   :  { %v903_v17 = vmul.f32 0.35355338, %v367_v16 }
 0x422   :  { %v6258_v18 = vpop.f32.mrf.mxu1 }
 0x423   :  { %v911_v19 = vsel %vm296_vm4, %v903_v17, -inf }
 0x424   :  { %912 = vmax.xlane.f32.xlu0 %v911_v19  ;;  %v443_v22 = vpop.f32.mrf.mxu1 }
 0x425   :  { %v904_v23 = vmul.f32 0.35355338, %v443_v22 }
 0x426   :  { %v6263_v24 = vpop.f32.mrf.mxu1 }
 0x427   :  { %v914_v25 = vsel %vm296_vm4, %v904_v23, -inf }
 0x428   :  { %915 = vmax.xlane.f32.xlu1 %v914_v25 }
 0x47f   :  { %v519_v26 = vpop.f32.mrf.mxu0 }
 0x480   :  { %v905_v27 = vmul.f32 0.35355338, %v519_v26 }
 0x481   :  { %v6268_v28 = vpop.f32.mrf.mxu0 }
 0x482   :  { %v917_v29 = vsel %vm296_vm4, %v905_v27, -inf }
 0x483   :  { %918 = vmax.xlane.f32.xlu0 %v917_v29  ;;  %v595_v30 = vpop.f32.mrf.mxu1  ;;  %v671_v31 = vpop.f32.mrf.mxu0 }
 0x484   :  { %v906_v32 = vmul.f32 0.35355338, %v595_v30  ;;  %v907_v33 = vmul.f32 0.35355338, %v671_v31 }
 0x485   :  { %v6273_v38 = vpop.f32.mrf.mxu1  ;;  %v6278_v39 = vpop.f32.mrf.mxu0 }
 0x486   :  { %v923_v40 = vsel %vm296_vm4, %v907_v33, -inf  ;;  %v920_v41 = vsel %vm296_vm4, %v906_v32, -inf }
 0x487   :  { %924 = vmax.xlane.f32.xlu1 %v923_v40  ;;  %v823_v42 = vpop.f32.mrf.mxu0  ;;  %921 = vmax.xlane.f32.xlu0 %v920_v41  ;;  %v747_v43 = vpop.f32.mrf.mxu1 }
 0x488   :  { %v909_v44 = vmul.f32 0.35355338, %v823_v42  ;;  %v908_v49 = vmul.f32 0.35355338, %v747_v43 }
 0x489   :  { %v6283_v50 = vpop.f32.mrf.mxu1  ;;  %v6288_v51 = vpop.f32.mrf.mxu0 }
 0x48a   :  { %v929_v52 = vsel %vm296_vm4, %v909_v44, -inf  ;;  %v926_v53 = vsel %vm296_vm4, %v908_v49, -inf }
 0x48b   :  { %930 = vmax.xlane.f32.xlu1 %v929_v52  ;;  %927 = vmax.xlane.f32.xlu0 %v926_v53  ;;  %v899_v54 = vpop.f32.mrf.mxu1 }
 0x48c   :  { %v910_v55 = vmul.f32 0.35355338, %v899_v54 }
 0x48d   :  { %v6293_v56 = vpop.f32.mrf.mxu1 }
 0x48e   :  { %v932_v57 = vsel %vm296_vm4, %v910_v55, -inf }
 0x48f   :  { %933 = vmax.xlane.f32.xlu0 %v932_v57 }
 0x49c   :  { %999 = vrot.lane.b32.xlu1 %v7022_v0, %s6858_s25 }
 0x4a0   :  { %1151 = vrot.lane.b32.xlu1 %v7048_v3, %s6858_s25 }
 0x4a4   :  { %1227 = vrot.lane.b32.xlu1 %v7046_v2, %s6858_s25 }
 0x4a5   :  { %1075 = vrot.lane.b32.xlu0 %v7020_v62, %s6858_s25 }
 0x4a8   :  { %1379 = vrot.lane.b32.xlu1 %v7060_v6, %s6858_s25 }
 0x4a9   :  { %1303 = vrot.lane.b32.xlu0 %v7052_v4, %s6858_s25 }
 0x4ad   :  { %v913_v58 = vpop.xlane.xlu0 %912 }
 0x4ae   :  { %v935_v63 = vsub.f32 %v903_v17, %v913_v58 }
 0x4b0   :  { %v943_v8 = vmul.f32 1.442695, %v935_v63 }
 0x4b1   :  { %v916_v60 = vpop.xlane.xlu1 %915 }
 0x4b2   :  { %v936_v61 = vsub.f32 %v904_v23, %v916_v60 }
 0x4b4   :  { %v945_v0 = vmul.f32 1.442695, %v936_v61 }
 0x4b6   :  { %6681 = vpow2.f32 %v945_v0 }
 0x4b7   :  { %6683 = vpow2.f32 %v943_v8 }
 0x4c3   :  { %v7138_v3 = vpop.eup %6681 }
 0x4c4   :  { %v962_v2 = vsel %vm296_vm4, %v7138_v3, 0.0  ;;  %v7142_v62 = vpop.eup %6683 }
 0x4c5   :  { %v959_v6 = vsel %vm296_vm4, %v7142_v62, 0.0 }
 0x4c8   :  { %963 = vadd.xlane.f32.xlu0 %v962_v2 }
 0x4cc   :  { %960 = vadd.xlane.f32.xlu1 %v959_v6 }
 0x50c   :  { %v919_v4 = vpop.xlane.xlu0 %918 }
 0x50d   :  { %v937_v9 = vsub.f32 %v905_v27, %v919_v4 }
 0x50f   :  { %v947_v10 = vmul.f32 1.442695, %v937_v9 }
 0x510   :  { %v922_v11 = vpop.xlane.xlu0 %921  ;;  %v925_v12 = vpop.xlane.xlu1 %924 }
 0x511   :  { %6685 = vpow2.f32 %v947_v10  ;;  %v938_v13 = vsub.f32 %v906_v32, %v922_v11  ;;  %v939_v14 = vsub.f32 %v907_v33, %v925_v12 }
 0x513   :  { %v949_v15 = vmul.f32 1.442695, %v938_v13  ;;  %v951_v16 = vmul.f32 1.442695, %v939_v14 }
 0x514   :  { %v928_v17 = vpop.xlane.xlu0 %927  ;;  %v931_v18 = vpop.xlane.xlu1 %930 }
 0x515   :  { %6687 = vpow2.f32 %v949_v15  ;;  %v940_v19 = vsub.f32 %v908_v49, %v928_v17  ;;  %v941_v22 = vsub.f32 %v909_v44, %v931_v18 }
 0x516   :  { %6689 = vpow2.f32 %v951_v16 }
 0x517   :  { %v953_v23 = vmul.f32 1.442695, %v940_v19  ;;  %v955_v24 = vmul.f32 1.442695, %v941_v22 }
 0x518   :  { %v934_v25 = vpop.xlane.xlu0 %933  ;;  %v1000_v26 = vpop.permute.xlu1 %999 }
 0x519   :  { %6691 = vpow2.f32 %v953_v23  ;;  %v942_v27 = vsub.f32 %v910_v55, %v934_v25  ;;  %6295 = vmatpush3.msra.mxu0 %v1000_v26 }
 0x51a   :  { %6693 = vpow2.f32 %v955_v24  ;;  %6304 = vmatprep.subr.mxu0 %v6854_v1 }
 0x51b   :  { %v957_v28 = vmul.f32 1.442695, %v942_v27 }
 0x51c   :  { %v1076_v29 = vpop.permute.xlu0 %1075  ;;  %v1152_v50 = vpop.permute.xlu1 %1151 }
 0x51d   :  { %6695 = vpow2.f32 %v957_v28  ;;  %6300 = vmatpush3.msra.mxu1 %v1076_v29 }
 0x51e   :  { %v6686_v30 = vpop.eup %6685  ;;  %6309 = vmatprep.subr.mxu1 %v6854_v1 }
 0x51f   :  { %v965_v31 = vsel %vm296_vm4, %v6686_v30, 0.0 }
 0x520   :  { %966 = vadd.xlane.f32.xlu1 %v965_v31  ;;  %v1228_v51 = vpop.permute.xlu1 %1227  ;;  %v1304_v52 = vpop.permute.xlu0 %1303 }
 0x522   :  { %v6688_v32 = vpop.eup %6687 }
 0x523   :  { %v6690_v33 = vpop.eup %6689  ;;  %v968_v38 = vsel %vm296_vm4, %v6688_v32, 0.0 }
 0x524   :  { %969 = vadd.xlane.f32.xlu0 %v968_v38  ;;  %v971_v39 = vsel %vm296_vm4, %v6690_v33, 0.0  ;;  %v1380_v53 = vpop.permute.xlu1 %1379 }
 0x525   :  { %972 = vadd.xlane.f32.xlu1 %v971_v39 }
 0x526   :  { %v7151_v40 = vpop.eup %6691 }
 0x527   :  { %v7153_v41 = vpop.eup %6693  ;;  %v974_v42 = vsel %vm296_vm4, %v7151_v40, 0.0 }
 0x528   :  { %975 = vadd.xlane.f32.xlu0 %v974_v42  ;;  %v977_v43 = vsel %vm296_vm4, %v7153_v41, 0.0 }
 0x529   :  { %978 = vadd.xlane.f32.xlu1 %v977_v43 }
 0x52a   :  { %v7159_v44 = vpop.eup %6695 }
 0x52b   :  { %v980_v49 = vsel %vm296_vm4, %v7159_v44, 0.0 }
 0x52c   :  { %981 = vadd.xlane.f32.xlu0 %v980_v49 }
 0x53a   :  { %1531 = vrot.lane.b32.xlu1 %v7066_v7, %s6858_s25 }
 0x53e   :  { %1647 = vrot.lane.b32.xlu1 %v6976_v35, %s6859_s26 }
 0x542   :  { %1455 = vrot.lane.b32.xlu0 %v7058_v5, %s6858_s25  ;;  %1645 = vrot.lane.b32.xlu1 %v6983_v36, %s6859_s26 }
 0x546   :  { %1649 = vrot.lane.b32.xlu0 %v6971_v34, %s6859_s26 }
 0x551   :  { %v964_v54 = vpop.xlane.xlu0 %963 }
 0x552   :  { %6697 = vrcp.f32 %v964_v54 }
 0x555   :  { %v961_v55 = vpop.xlane.xlu1 %960 }
 0x556   :  { %6699 = vrcp.f32 %v961_v55 }
 0x55f   :  { %v6698_v56 = vpop.eup %6697 }
 0x560   :  { %v992_v57 = vmul.f32 %v6698_v56, %v7138_v3  ;;  %v7219_v56 = vsub.s32 5, %v6996_v45 }
 0x562   :  { %6302 = vmatmul.mubr.msk.f32.vlgmr.msra.gmra.mxu1 %vm296_vm4, %v992_v57  ;;  %v1741_v57 = vrot.slane %v7004_v47, %v7219_v56 }
 0x563   :  { %v6700_v58 = vpop.eup %6699  ;;  %6310 = vmatpush3.msra.mxu1 %v1228_v51  ;;  %6311 = vmatprep.mubr.msk.f32.mxu1 %vm6856_vm3, %v6854_v1 }
 0x564   :  { %v991_v5 = vmul.f32 %v6700_v58, %v7142_v62  ;;  %6319 = vmatprep.subr.mxu1 %v6854_v1 }
 0x566   :  { %6297 = vmatmul.mubr.msk.f32.vlgmr.msra.gmra.mxu0 %vm296_vm4, %v991_v5 }
 0x567   :  { %6305 = vmatpush3.msra.mxu0 %v1152_v50  ;;  %6306 = vmatprep.mubr.msk.f32.mxu0 %vm6856_vm3, %v6854_v1 }
 0x568   :  { %6314 = vmatprep.subr.mxu0 %v6854_v1 }
 0x5a9   :  { %v967_v7 = vpop.xlane.xlu1 %966 }
 0x5aa   :  { %6701 = vrcp.f32 %v967_v7 }
 0x5ad   :  { %v970_v60 = vpop.xlane.xlu0 %969 }
 0x5ae   :  { %6703 = vrcp.f32 %v970_v60  ;;  %v973_v61 = vpop.xlane.xlu1 %972 }
 0x5af   :  { %6705 = vrcp.f32 %v973_v61 }
 0x5b1   :  { %v976_v63 = vpop.xlane.xlu0 %975 }
 0x5b2   :  { %6707 = vrcp.f32 %v976_v63  ;;  %v979_v0 = vpop.xlane.xlu1 %978 }
 0x5b3   :  { %6709 = vrcp.f32 %v979_v0 }
 0x5b5   :  { %v982_v8 = vpop.xlane.xlu0 %981 }
 0x5b6   :  { %6711 = vrcp.f32 %v982_v8  ;;  %v1532_v12 = vpop.permute.xlu1 %1531 }
 0x5b7   :  { %v6702_v3 = vpop.eup %6701 }
 0x5b8   :  { %v993_v2 = vmul.f32 %v6702_v3, %v6686_v30 }
 0x5b9   :  { %v1456_v4 = vpop.permute.xlu0 %1455 }
 0x5ba   :  { %6307 = vmatmul.mubr.msk.f32.vlgmr.msra.gmra.mxu0 %vm296_vm4, %v993_v2  ;;  %v1648_v16 = vpop.permute.xlu1 %1647 }
 0x5bb   :  { %v6704_v34 = vpop.eup %6703  ;;  %6315 = vmatpush3.msra.mxu0 %v1304_v52  ;;  %6316 = vmatprep.mubr.msk.f32.mxu0 %vm6856_vm3, %v6854_v1 }
 0x5bc   :  { %v6706_v35 = vpop.eup %6705  ;;  %6324 = vmatprep.subr.mxu0 %v6854_v1  ;;  %v994_v36 = vmul.f32 %v6704_v34, %v6688_v32 }
 0x5bd   :  { %v995_v62 = vmul.f32 %v6706_v35, %v6690_v33  ;;  %v1650_v15 = vpop.permute.xlu0 %1649 }
 0x5be   :  { %6312 = vmatmul.mubr.msk.f32.vlgmr.msra.gmra.mxu1 %vm296_vm4, %v994_v36  ;;  %v1646_v23 = vpop.permute.xlu1 %1645 }
 0x5bf   :  { %v6708_v6 = vpop.eup %6707  ;;  %6317 = vmatmul.mubr.msk.f32.vlgmr.msra.gmra.mxu0 %vm296_vm4, %v995_v62  ;;  %6320 = vmatpush3.msra.mxu1 %v1380_v53 }
 0x5c0   :  { %v6710_v9 = vpop.eup %6709  ;;  %6325 = vmatpush3.msra.mxu0 %v1456_v4  ;;  %6321 = vmatprep.mubr.msk.f32.mxu1 %vm6856_vm3, %v6854_v1  ;;  %v996_v10 = vmul.f32 %v6708_v6, %v7151_v40 }
 0x5c1   :  { %6326 = vmatprep.mubr.msk.f32.mxu0 %vm6856_vm3, %v6854_v1  ;;  %6329 = vmatprep.subr.mxu1 %v6854_v1  ;;  %v997_v11 = vmul.f32 %v6710_v9, %v7153_v41  ;;  %v153_v9 = vld [vmem:[%s7996_s4 + $0x38] sm:$0xff] }
 0x5c2   :  { %6322 = vmatmul.mubr.msk.f32.vlgmr.msra.gmra.mxu1 %vm296_vm4, %v996_v10  ;;  %6334 = vmatprep.subr.mxu0 %v1650_v15  ;;  %v151_v10 = vld [vmem:[%s7996_s4 + $0x28] sm:$0xff] }
 0x5c3   :  { %v6712_v13 = vpop.eup %6711  ;;  %6327 = vmatmul.mubr.msk.f32.vlgmr.msra.gmra.mxu0 %vm296_vm4, %v997_v11  ;;  %6330 = vmatpush3.msra.mxu1 %v1532_v12  ;;  %v149_v11 = vld [vmem:[%s7996_s4 + $0x18] sm:$0xff]  ;;  %v147_v12 = vld [vmem:[%s7996_s4 + $0x8] sm:$0xff] }
 0x5c4   :  { %6331 = vmatprep.mubr.msk.f32.mxu1 %vm6856_vm3, %v6854_v1  ;;  %v998_v14 = vmul.f32 %v6712_v13, %v7159_v44  ;;  %6335 = vmatpush3.msra.mxu0 %v1650_v15  ;;  %v1876_v13 = vld [vmem:[%s7997_s5 + $0x38] sm:$0xff]  ;;  %v1874_v15 = vld [vmem:[%s7997_s5 + $0x28] sm:$0xff] }
 0x5c5   :  { %6336 = vmatprep.subr.mxu0 %v1648_v16  ;;  %6345 = vmatprep.subr.mxu1 %v153_v9 }
 0x5c6   :  { %6332 = vmatmul.mubr.msk.f32.vlgmr.msra.gmra.mxu1 %vm296_vm4, %v998_v14  ;;  %6337 = vmatpush3.msra.mxu0 %v1648_v16  ;;  %v1875_v14 = vld [vmem:[%s7997_s5 + $0x30] sm:$0xff]  ;;  %v1873_v16 = vld [vmem:[%s7997_s5 + $0x20] sm:$0xff] }
 0x5c7   :  { %6338 = vmatprep.subr.mxu0 %v1646_v23  ;;  %6346 = vmatpush3.msra.mxu1 %v153_v9  ;;  %v7322_v9 = vld [vmem:[%s7996_s4 + $0x60] sm:$0xff] }
 0x5c8   :  { %6339 = vmatpush3.msra.mxu0 %v1646_v23  ;;  %6347 = vmatprep.subr.mxu1 %v151_v10 }
 0x5c9   :  { %6348 = vmatpush3.msra.mxu1 %v151_v10  ;;  %v7329_v10 = vld [vmem:[%s7996_s4 + $0x50] sm:$0xff] }
 0x5ca   :  { %6349 = vmatprep.subr.mxu1 %v149_v11 }
 0x5cb   :  { %6350 = vmatpush3.msra.mxu1 %v149_v11  ;;  %v7336_v11 = vld [vmem:[%s7996_s4 + $0x40] sm:$0xff] }
 0x5cc   :  { %6351 = vmatprep.subr.mxu1 %v147_v12 }
 0x5cd   :  { %6352 = vmatpush3.msra.mxu1 %v147_v12 }
 0x622   :  { %v1147_v17 = vpop.f32.mrf.mxu1 }
 0x624   :  { %v6303_v18 = vpop.f32.mrf.mxu1 }
 0x626   :  { %v1071_v19 = vpop.f32.mrf.mxu0 }
 0x628   :  { %v6298_v22 = vpop.f32.mrf.mxu0 }
 0x67a   :  { %v1223_v24 = vpop.f32.mrf.mxu0 }
 0x67b   :  { %1608 = vrot.lane.b32.xlu0 %v1223_v24, %s6860_s27 }
 0x67c   :  { %v6308_v25 = vpop.f32.mrf.mxu0 }
 0x67d   :  { %v7262_v25 = vsub.s32 2, %v6996_v45 }
 0x67e   :  { %v1299_v26 = vpop.f32.mrf.mxu1 }
 0x67f   :  { %v1375_v27 = vpop.f32.mrf.mxu0  ;;  %1625 = vrot.lane.b32.xlu1 %v1299_v26, %s6860_s27  ;;  %v7265_v26 = vsub.s32 3, %v6996_v45 }
 0x680   :  { %1612 = vrot.lane.b32.xlu0 %v1375_v27, %s6861_s28  ;;  %v6313_v28 = vpop.f32.mrf.mxu1  ;;  %v1773_v27 = vrot.slane %v7004_v47, %v7262_v25 }
 0x681   :  { %v6318_v29 = vpop.f32.mrf.mxu0 }
 0x682   :  { %v1451_v30 = vpop.f32.mrf.mxu1 }
 0x683   :  { %v1527_v31 = vpop.f32.mrf.mxu0  ;;  %1629 = vrot.lane.b32.xlu1 %v1451_v30, %s6861_s28  ;;  %v1779_v30 = vrot.slane %v7004_v47, %v7265_v26 }
 0x684   :  { %1616 = vrot.lane.b32.xlu0 %v1527_v31, %s6862_s29  ;;  %v6323_v32 = vpop.f32.mrf.mxu1 }
 0x685   :  { %v6328_v33 = vpop.f32.mrf.mxu0 }
 0x686   :  { %v1603_v38 = vpop.f32.mrf.mxu1 }
 0x687   :  { %1633 = vrot.lane.b32.xlu1 %v1603_v38, %s6862_s29 }
 0x688   :  { %1643 = vrot.lane.b32.xlu0 %v6992_v37, %s6859_s26  ;;  %v6333_v39 = vpop.f32.mrf.mxu1 }
 0x6ed   :  { %v1609_v40 = vpop.permute.xlu0 %1608 }
 0x6ee   :  { %v1619_v43 = vsel %vm296_vm4, %v1071_v19, %v1609_v40 }
 0x6f1   :  { %v1626_v41 = vpop.permute.xlu1 %1625 }
 0x6f2   :  { %v1613_v42 = vpop.permute.xlu0 %1612  ;;  %v1636_v52 = vsel %vm296_vm4, %v1147_v17, %v1626_v41  ;;  %v1872_v41 = vld [vmem:[%s7997_s5 + $0x18] sm:$0xff] }
 0x6f3   :  { %v1621_v49 = vsel %vm1620_vm5, %v1619_v43, %v1613_v42  ;;  %v1871_v42 = vld [vmem:[%s7997_s5 + $0x10] sm:$0xff]  ;;  %v1870_v43 = vld [vmem:[%s7997_s5 + $0x8] sm:$0xff] }
 0x6f5   :  { %v1630_v44 = vpop.permute.xlu1 %1629 }
 0x6f6   :  { %v1617_v50 = vpop.permute.xlu0 %1616  ;;  %v1637_v37 = vsel %vm1620_vm5, %v1636_v52, %v1630_v44  ;;  %v1869_v44 = vld [vmem:[%s7997_s5] sm:$0xff] }
 0x6f7   :  { %v1623_v51 = vsel %vm1622_vm6, %v1621_v49, %v1617_v50  ;;  %v7287_v49 = vsub.s32 6, %v6996_v45 }
 0x6f8   :  { %6342 = vmatprep.mubr.msk.f32.mxu0 %vm155_vm2, %v1623_v51 }
 0x6f9   :  { %v1634_v53 = vpop.permute.xlu1 %1633  ;;  %v1785_v50 = vrot.slane %v7004_v47, %v7287_v49 }
 0x6fa   :  { %v1644_v54 = vpop.permute.xlu0 %1643  ;;  %v1638_v55 = vsel %vm1622_vm6, %v1637_v37, %v1634_v53 }
 0x6fb   :  { %6340 = vmatprep.subr.mxu0 %v1644_v54 }
 0x6fc   :  { %6341 = vmatpush3.msra.mxu0 %v1644_v54 }
 0x6fd   :  { %6343 = vmatmul.mubr.msk.f32.vlgmr.msra.gmra.mxu0 %vm155_vm2, %v1638_v55  ;;  %6356 = vmatprep.subr.mxu0 %v1876_v13 }
 0x6fe   :  { %6357 = vmatpush3.msra.mxu0 %v1876_v13 }
 0x6ff   :  { %6358 = vmatprep.subr.mxu0 %v1875_v14 }
 0x700   :  { %6359 = vmatpush3.msra.mxu0 %v1875_v14 }
 0x701   :  { %6360 = vmatprep.subr.mxu0 %v1874_v15 }
 0x702   :  { %6361 = vmatpush3.msra.mxu0 %v1874_v15 }
 0x703   :  { %6362 = vmatprep.subr.mxu0 %v1873_v16 }
 0x704   :  { %6363 = vmatpush3.msra.mxu0 %v1873_v16 }
 0x705   :  { %6364 = vmatprep.subr.mxu0 %v1872_v41 }
 0x706   :  { %6365 = vmatpush3.msra.mxu0 %v1872_v41 }
 0x707   :  { %6366 = vmatprep.subr.mxu0 %v1871_v42 }
 0x708   :  { %6367 = vmatpush3.msra.mxu0 %v1871_v42 }
 0x709   :  { %6368 = vmatprep.subr.mxu0 %v1870_v43 }
 0x70a   :  { %6369 = vmatpush3.msra.mxu0 %v1870_v43 }
 0x70b   :  { %6370 = vmatprep.subr.mxu0 %v1869_v44 }
 0x70c   :  { %6371 = vmatpush3.msra.mxu0 %v1869_v44 }
 0x70d   :  { %6396 = vmatprep.subr.mxu0 %v6854_v1 }
 0x7bd   :  { %v6344_v58 = vpop.f32.mrf.mxu0 }
 0x7be   :  { %v1737_v5 = vadd.f32 %v6344_v58, %v6958_v21 }
 0x7bf   :  { %v1727_v7 = vpop.f32.mrf.mxu0 }
 0x7c0   :  { %v7224_v60 = vadd.f32 %v1741_v57, %v1737_v5  ;;  %v1736_v61 = vadd.f32 %v1727_v7, %v6956_v20 }
 0x7c2   :  { %v7227_v63 = vadd.f32 %v1741_v57, %v1736_v61  ;;  %v1747_v0 = vsel %vm155_vm2, %v7224_v60, 0.0  ;;  %v7296_v57 = vsub.s32 7, %v6996_v45 }
 0x7c3   :  { %1748 = vadd.xlane.f32.xlu1 %v1747_v0 }
 0x7c4   :  { %v1744_v8 = vsel %vm155_vm2, %v7227_v63, 0.0  ;;  %v1964_v58 = vrot.slane %v7004_v47, %v7296_v57 }
 0x7c5   :  { %1745 = vadd.xlane.f32.xlu0 %v1744_v8 }
 0x84c   :  { %v1749_v3 = vpop.xlane.xlu1 %1748 }
 0x84d   :  { %v1751_v2 = vmul.f32 0.03125, %v1749_v3 }
 0x84e   :  { %v1746_v34 = vpop.xlane.xlu0 %1745 }
 0x84f   :  { %v1750_v35 = vmul.f32 0.03125, %v1746_v34  ;;  %v1753_v21 = vsub.f32 %v7224_v60, %v1751_v2 }
 0x851   :  { %v1752_v36 = vsub.f32 %v7227_v63, %v1750_v35  ;;  %v1755_v6 = vmul.f32 %v1753_v21, %v1753_v21 }
 0x853   :  { %v1754_v62 = vmul.f32 %v1752_v36, %v1752_v36  ;;  %v1759_v4 = vsel %vm155_vm2, %v1755_v6, 0.0 }
 0x855   :  { %v1756_v20 = vsel %vm155_vm2, %v1754_v62, 0.0 }
 0x856   :  { %1757 = vadd.xlane.f32.xlu0 %v1756_v20 }
 0x85a   :  { %1760 = vadd.xlane.f32.xlu0 %v1759_v4  ;;  %v7317_v4 = vld [vmem:[%s7996_s4 + $0x70] sm:$0xff] }
 0x85b   :  { %6375 = vmatprep.subr.mxu1 %v7317_v4 }
 0x8df   :  { %v1758_v17 = vpop.xlane.xlu0 %1757 }
 0x8e0   :  { %v1762_v18 = vmul.f32 0.03125, %v1758_v17 }
 0x8e2   :  { %v1764_v19 = vadd.f32 1e-05, %v1762_v18  ;;  %v7346_v18 = vld [vmem:[%s7998_s6 + $0x8] sm:$0xff] }
 0x8e3   :  { %v1761_v22 = vpop.xlane.xlu0 %1760 }
 0x8e4   :  { %6713 = vrsqrt.f32 %v1764_v19  ;;  %v1763_v23 = vmul.f32 0.03125, %v1761_v22  ;;  %v2007_v22 = vrot.slane %v7346_v18, %v6999_v46 }
 0x8e6   :  { %v1765_v24 = vadd.f32 1e-05, %v1763_v23 }
 0x8e8   :  { %6715 = vrsqrt.f32 %v1765_v24 }
 0x8f1   :  { %v6714_v28 = vpop.eup %6713 }
 0x8f2   :  { %v1768_v29 = vmul.f32 %v6714_v28, %v1752_v36 }
 0x8f4   :  { %v1774_v31 = vmul.f32 %v1773_v27, %v1768_v29  ;;  %v2013_v29 = vrot.slane %v7346_v18, %v7007_v48 }
 0x8f5   :  { %v6716_v32 = vpop.eup %6715 }
 0x8f6   :  { %v1769_v33 = vmul.f32 %v6716_v32, %v1753_v21  ;;  %v1780_v38 = vadd.f32 %v1779_v30, %v1774_v31 }
 0x8f8   :  { %v1775_v39 = vmul.f32 %v1773_v27, %v1769_v33  ;;  %6353 = vmatprep.mubr.msk.f32.mxu1 %vm155_vm2, %v1780_v38  ;;  %v2019_v33 = vrot.slane %v7346_v18, %v7016_v59 }
 0x8fa   :  { %v1781_v40 = vadd.f32 %v1779_v30, %v1775_v39 }
 0x8fc   :  { %6354 = vmatmul.mubr.msk.f32.vlgmr.msra.gmra.mxu1 %vm155_vm2, %v1781_v40 }
 0x8fd   :  { %6376 = vmatpush3.msra.mxu1 %v7317_v4 }
 0x8fe   :  { %6377 = vmatprep.subr.mxu1 %v7322_v9 }
 0x8ff   :  { %6378 = vmatpush3.msra.mxu1 %v7322_v9 }
 0x900   :  { %6379 = vmatprep.subr.mxu1 %v7329_v10 }
 0x901   :  { %6380 = vmatpush3.msra.mxu1 %v7329_v10 }
 0x902   :  { %6381 = vmatprep.subr.mxu1 %v7336_v11 }
 0x903   :  { %6382 = vmatpush3.msra.mxu1 %v7336_v11 }
 0x904   :  { %6386 = vmatprep.subr.mxu1 %v6854_v1 }
 0x9bc   :  { %v6355_v51 = vpop.f32.mrf.mxu1 }
 0x9bd   :  { %v1864_v52 = vadd.f32 %v6355_v51, %v1785_v50 }
 0x9be   :  { %v1858_v37 = vpop.f32.mrf.mxu1 }
 0x9bf   :  { %v1859_v53 = vadd.f32 %v1858_v37, %v1785_v50  ;;  %v1868_v55 = vmax.f32 %v1864_v52, 0.0 }
 0x9c1   :  { %v1867_v54 = vmax.f32 %v1859_v53, 0.0 }
 0x9c3   :  { %6372 = vmatprep.mubr.msk.f32.mxu0 %vm1877_vm7, %v1867_v54 }
 0x9c4   :  { %6373 = vmatmul.mubr.msk.f32.vlgmr.msra.gmra.mxu0 %vm1877_vm7, %v1868_v55 }
 0x9c5   :  { %6398 = vmatprep.mubr.msk.f32.mxu0 %vm6856_vm3, %v6854_v1 }
 0xa84   :  { %v6374_v5 = vpop.f32.mrf.mxu0 }
 0xa85   :  { %v1960_v7 = vadd.f32 %v6374_v5, %v7224_v60 }
 0xa86   :  { %v1950_v61 = vpop.f32.mrf.mxu0 }
 0xa87   :  { %v7301_v0 = vadd.f32 %v1964_v58, %v1960_v7  ;;  %v1959_v8 = vadd.f32 %v1950_v61, %v7227_v63 }
 0xa89   :  { %v7304_v3 = vadd.f32 %v1964_v58, %v1959_v8  ;;  %v1981_v2 = vsel %vm155_vm2, %v7301_v0, 0.0 }
 0xa8a   :  { %1982 = vadd.xlane.f32.xlu0 %v1981_v2 }
 0xa8b   :  { %v1978_v45 = vsel %vm155_vm2, %v7304_v3, 0.0 }
 0xa8c   :  { %1979 = vadd.xlane.f32.xlu1 %v1978_v45 }
 0xb13   :  { %v1983_v34 = vpop.xlane.xlu0 %1982 }
 0xb14   :  { %v1985_v47 = vmul.f32 0.03125, %v1983_v34 }
 0xb15   :  { %v1980_v35 = vpop.xlane.xlu1 %1979 }
 0xb16   :  { %v1987_v60 = vsub.f32 %v7301_v0, %v1985_v47  ;;  %v1984_v21 = vmul.f32 0.03125, %v1980_v35 }
 0xb18   :  { %v1986_v36 = vsub.f32 %v7304_v3, %v1984_v21  ;;  %v1989_v62 = vmul.f32 %v1987_v60, %v1987_v60 }
 0xb1a   :  { %v1993_v63 = vsel %vm155_vm2, %v1989_v62, 0.0  ;;  %v1988_v20 = vmul.f32 %v1986_v36, %v1986_v36 }
 0xb1b   :  { %1994 = vadd.xlane.f32.xlu0 %v1993_v63 }
 0xb1c   :  { %v1990_v6 = vsel %vm155_vm2, %v1988_v20, 0.0 }
 0xb1d   :  { %1991 = vadd.xlane.f32.xlu1 %v1990_v6 }
 0xba4   :  { %v1995_v12 = vpop.xlane.xlu0 %1994 }
 0xba5   :  { %v1997_v13 = vmul.f32 0.03125, %v1995_v12 }
 0xba6   :  { %v1992_v14 = vpop.xlane.xlu1 %1991 }
 0xba7   :  { %v1999_v15 = vadd.f32 1e-05, %v1997_v13  ;;  %v1996_v16 = vmul.f32 0.03125, %v1992_v14 }
 0xba9   :  { %6717 = vrsqrt.f32 %v1999_v15  ;;  %v1998_v17 = vadd.f32 1e-05, %v1996_v16 }
 0xbab   :  { %6719 = vrsqrt.f32 %v1998_v17 }
 0xbb6   :  { %v6718_v19 = vpop.eup %6717 }
 0xbb7   :  { %v2003_v23 = vmul.f32 %v6718_v19, %v1987_v60 }
 0xbb8   :  { %v6720_v24 = vpop.eup %6719 }
 0xbb9   :  { %v2002_v27 = vmul.f32 %v6720_v24, %v1986_v36  ;;  %v2009_v28 = vmul.f32 %v2007_v22, %v2003_v23 }
 0xbbb   :  { %v2008_v30 = vmul.f32 %v2007_v22, %v2002_v27  ;;  %v2015_v32 = vadd.f32 %v2013_v29, %v2009_v28 }
 0xbbd   :  { %v2014_v31 = vadd.f32 %v2013_v29, %v2008_v30 }
 0xbbf   :  { %6383 = vmatprep.mubr.msk.f32.mxu1 %vm155_vm2, %v2014_v31 }
 0xbc0   :  { %6384 = vmatmul.mubr.msk.f32.vlgmr.msra.gmra.mxu1 %vm155_vm2, %v2015_v32 }
 0xbc1   :  { %6388 = vmatprep.mubr.msk.f32.mxu1 %vm6856_vm3, %v6854_v1 }
 0xc80   :  { %v6385_v38 = vpop.f32.mrf.mxu1 }
 0xc81   :  { %v7358_v39 = vadd.f32 %v6385_v38, %v2019_v33 }
 0xc82   :  { %v2092_v40 = vpop.f32.mrf.mxu1 }
 0xc83   :  { %v7360_v41 = vadd.f32 %v2092_v40, %v2019_v33  ;;  %2105 = vrot.lane.b32.xlu0 %v7358_v39, %s6852_s21 }
 0xc85   :  { %2102 = vrot.lane.b32.xlu1 %v7360_v41, %s6852_s21 }
 0xc87   :  { %2111 = vrot.lane.b32.xlu0 %v7360_v41, %s6853_s22 }
 0xc89   :  { %2107 = vrot.lane.b32.xlu1 %v7360_v41, %s6855_s23 }
 0xc8b   :  { %2115 = vrot.lane.b32.xlu0 %v7360_v41, %s6857_s24 }
 0xc8d   :  { %2109 = vrot.lane.b32.xlu1 %v7358_v39, %s6855_s23 }
 0xc91   :  { %2113 = vrot.lane.b32.xlu1 %v7358_v39, %s6853_s22 }
 0xc95   :  { %2191 = vrot.lane.b32.xlu1 %v7358_v39, %s6857_s24 }
 0xcf5   :  { %v7378_v42 = vpop.permute.xlu0 %2105 }
 0xcf6   :  { %2343 = vrot.lane.b32.xlu1 %v7378_v42, %s6857_s24 }
 0xcf7   :  { %v7382_v43 = vpop.permute.xlu1 %2102 }
 0xcf8   :  { %2267 = vrot.lane.b32.xlu0 %v7382_v43, %s6857_s24 }
 0xcf9   :  { %v7386_v44 = vpop.permute.xlu0 %2111 }
 0xcfb   :  { %v7388_v50 = vpop.permute.xlu1 %2107 }
 0xcfc   :  { %2419 = vrot.lane.b32.xlu0 %v7388_v50, %s6857_s24 }
 0xcfd   :  { %v2116_v51 = vpop.permute.xlu0 %2115 }
 0xcfe   :  { %6387 = vmatpush3.xpose.msk.msra.mxu1 %vm296_vm4, %v2116_v51 }
 0xcff   :  { %v7393_v52 = vpop.permute.xlu1 %2109  ;;  %6391 = vmatprep.subr.mxu1 %v6854_v1 }
 0xd00   :  { %2571 = vrot.lane.b32.xlu0 %v7386_v44, %s6857_s24  ;;  %2495 = vrot.lane.b32.xlu1 %v7393_v52, %s6857_s24 }
 0xd01   :  { %6389 = vmatmul.mubr.msk.f32.vlgmr.msra.gmra.mxu1 %vm296_vm4, %v7360_v41 }
 0xd02   :  { %6393 = vmatprep.mubr.msk.f32.mxu1 %vm6856_vm3, %v6854_v1 }
 0xd03   :  { %v7404_v37 = vpop.permute.xlu1 %2113 }
 0xd04   :  { %2647 = vrot.lane.b32.xlu1 %v7404_v37, %s6857_s24 }
 0xd07   :  { %v2192_v53 = vpop.permute.xlu1 %2191 }
 0xd08   :  { %6392 = vmatpush3.xpose.msk.msra.mxu1 %vm296_vm4, %v2192_v53 }
 0xd09   :  { %6401 = vmatprep.subr.mxu1 %v6854_v1 }
 0xd0b   :  { %6394 = vmatmul.mubr.msk.f32.vlgmr.msra.gmra.mxu1 %vm296_vm4, %v7358_v39 }
 0xd0c   :  { %6403 = vmatprep.mubr.msk.f32.mxu1 %vm6856_vm3, %v6854_v1 }
 0xd68   :  { %v2344_v54 = vpop.permute.xlu1 %2343 }
 0xd69   :  { %6402 = vmatpush3.xpose.msk.msra.mxu1 %vm296_vm4, %v2344_v54 }
 0xd6a   :  { %v2268_v55 = vpop.permute.xlu0 %2267  ;;  %6411 = vmatprep.subr.mxu1 %v6854_v1 }
 0xd6b   :  { %6397 = vmatpush3.xpose.msk.msra.mxu0 %vm296_vm4, %v2268_v55 }
 0xd6c   :  { %6404 = vmatmul.mubr.msk.f32.vlgmr.msra.gmra.mxu1 %vm296_vm4, %v7378_v42  ;;  %6406 = vmatprep.subr.mxu0 %v6854_v1 }
 0xd6d   :  { %6413 = vmatprep.mubr.msk.f32.mxu1 %vm6856_vm3, %v6854_v1 }
 0xd6e   :  { %6399 = vmatmul.mubr.msk.f32.vlgmr.msra.gmra.mxu0 %vm296_vm4, %v7382_v43  ;;  %v2420_v58 = vpop.permute.xlu0 %2419 }
 0xd6f   :  { %6407 = vmatpush3.xpose.msk.msra.mxu0 %vm296_vm4, %v2420_v58  ;;  %6408 = vmatprep.mubr.msk.f32.mxu0 %vm6856_vm3, %v6854_v1 }
 0xd70   :  { %6416 = vmatprep.subr.mxu0 %v6854_v1 }
 0xd72   :  { %6409 = vmatmul.mubr.msk.f32.vlgmr.msra.gmra.mxu0 %vm296_vm4, %v7388_v50  ;;  %v2572_v5 = vpop.permute.xlu0 %2571  ;;  %v2496_v7 = vpop.permute.xlu1 %2495 }
 0xd73   :  { %6412 = vmatpush3.xpose.msk.msra.mxu1 %vm296_vm4, %v2496_v7  ;;  %6417 = vmatpush3.xpose.msk.msra.mxu0 %vm296_vm4, %v2572_v5 }
 0xd74   :  { %6418 = vmatprep.mubr.msk.f32.mxu0 %vm6856_vm3, %v6854_v1  ;;  %6421 = vmatprep.subr.mxu1 %v6854_v1 }
 0xd75   :  { %6426 = vmatprep.subr.mxu0 %v6854_v1 }
 0xd76   :  { %6414 = vmatmul.mubr.msk.f32.vlgmr.msra.gmra.mxu1 %vm296_vm4, %v7393_v52  ;;  %6419 = vmatmul.mubr.msk.f32.vlgmr.msra.gmra.mxu0 %vm296_vm4, %v7386_v44  ;;  %v2648_v61 = vpop.permute.xlu1 %2647 }
 0xd77   :  { %6422 = vmatpush3.xpose.msk.msra.mxu1 %vm296_vm4, %v2648_v61  ;;  %6423 = vmatprep.mubr.msk.f32.mxu1 %vm6856_vm3, %v6854_v1 }
 0xd78   :  { %6431 = vmatprep.subr.mxu1 %v6854_v1  ;;  %6428 = vmatprep.mubr.msk.f32.mxu0 %vm6856_vm3, %v6854_v1 }
 0xd7a   :  { %6424 = vmatmul.mubr.msk.f32.vlgmr.msra.gmra.mxu1 %vm296_vm4, %v7404_v37 }
 0xd7b   :  { %6433 = vmatprep.mubr.msk.f32.mxu1 %vm6856_vm3, %v6854_v1 }
 0xdc1   :  { %v2187_v8 = vpop.f32.mrf.mxu1 }
 0xdc2   :  { %v2723_v2 = vmul.f32 0.35355338, %v2187_v8 }
 0xdc3   :  { %v6390_v45 = vpop.f32.mrf.mxu1 }
 0xdc4   :  { %v2731_v34 = vsel %vm296_vm4, %v2723_v2, -inf }
 0xdc5   :  { %2732 = vmax.xlane.f32.xlu0 %v2731_v34 }
 0xdcb   :  { %v2263_v47 = vpop.f32.mrf.mxu1 }
 0xdcc   :  { %v2724_v35 = vmul.f32 0.35355338, %v2263_v47 }
 0xdcd   :  { %v6395_v60 = vpop.f32.mrf.mxu1 }
 0xdce   :  { %v2734_v21 = vsel %vm296_vm4, %v2724_v35, -inf }
 0xdcf   :  { %2735 = vmax.xlane.f32.xlu1 %v2734_v21 }
 0xe2c   :  { %v2415_v36 = vpop.f32.mrf.mxu1 }
 0xe2d   :  { %v2726_v12 = vmul.f32 0.35355338, %v2415_v36 }
 0xe2e   :  { %v2339_v62 = vpop.f32.mrf.mxu0  ;;  %v6405_v63 = vpop.f32.mrf.mxu1 }
 0xe2f   :  { %v2725_v20 = vmul.f32 0.35355338, %v2339_v62  ;;  %v2740_v19 = vsel %vm296_vm4, %v2726_v12, -inf }
 0xe30   :  { %v6400_v6 = vpop.f32.mrf.mxu0 }
 0xe31   :  { %v2737_v13 = vsel %vm296_vm4, %v2725_v20, -inf }
 0xe32   :  { %2738 = vmax.xlane.f32.xlu0 %v2737_v13  ;;  %v2491_v14 = vpop.f32.mrf.mxu0 }
 0xe33   :  { %v2727_v15 = vmul.f32 0.35355338, %v2491_v14 }
 0xe34   :  { %v6410_v16 = vpop.f32.mrf.mxu0 }
 0xe35   :  { %v2743_v17 = vsel %vm296_vm4, %v2727_v15, -inf }
 0xe36   :  { %v2643_v22 = vpop.f32.mrf.mxu0  ;;  %2744 = vmax.xlane.f32.xlu1 %v2743_v17  ;;  %2741 = vmax.xlane.f32.xlu0 %v2740_v19  ;;  %v2567_v23 = vpop.f32.mrf.mxu1 }
 0xe37   :  { %v2729_v24 = vmul.f32 0.35355338, %v2643_v22  ;;  %v2728_v27 = vmul.f32 0.35355338, %v2567_v23 }
 0xe38   :  { %v6415_v28 = vpop.f32.mrf.mxu1  ;;  %v6420_v29 = vpop.f32.mrf.mxu0 }
 0xe39   :  { %v2749_v30 = vsel %vm296_vm4, %v2729_v24, -inf  ;;  %v2746_v31 = vsel %vm296_vm4, %v2728_v27, -inf }
 0xe3a   :  { %2750 = vmax.xlane.f32.xlu1 %v2749_v30  ;;  %2747 = vmax.xlane.f32.xlu0 %v2746_v31  ;;  %v2719_v32 = vpop.f32.mrf.mxu1 }
 0xe3b   :  { %v2730_v33 = vmul.f32 0.35355338, %v2719_v32 }
 0xe3c   :  { %v6425_v38 = vpop.f32.mrf.mxu1 }
 0xe3d   :  { %v2752_v40 = vsel %vm296_vm4, %v2730_v33, -inf }
 0xe3e   :  { %2753 = vmax.xlane.f32.xlu0 %v2752_v40 }
 0xe4b   :  { %2819 = vrot.lane.b32.xlu1 %v7360_v41, %s6858_s25 }
 0xe4e   :  { %v2733_v54 = vpop.xlane.xlu0 %2732 }
 0xe4f   :  { %2971 = vrot.lane.b32.xlu1 %v7382_v43, %s6858_s25  ;;  %v2755_v55 = vsub.f32 %v2723_v2, %v2733_v54 }
 0xe51   :  { %v2763_v58 = vmul.f32 1.442695, %v2755_v55 }
 0xe53   :  { %3047 = vrot.lane.b32.xlu1 %v7378_v42, %s6858_s25 }
 0xe54   :  { %2895 = vrot.lane.b32.xlu0 %v7358_v39, %s6858_s25 }
 0xe57   :  { %3199 = vrot.lane.b32.xlu1 %v7393_v52, %s6858_s25 }
 0xe58   :  { %3123 = vrot.lane.b32.xlu0 %v7388_v50, %s6858_s25  ;;  %v2736_v51 = vpop.xlane.xlu1 %2735 }
 0xe59   :  { %v2756_v53 = vsub.f32 %v2724_v35, %v2736_v51 }
 0xe5b   :  { %v2765_v41 = vmul.f32 1.442695, %v2756_v53 }
 0xe5d   :  { %6721 = vpow2.f32 %v2765_v41 }
 0xe5e   :  { %6723 = vpow2.f32 %v2763_v58 }
 0xe6a   :  { %v7470_v43 = vpop.eup %6721 }
 0xe6b   :  { %v2782_v42 = vsel %vm296_vm4, %v7470_v43, 0.0  ;;  %v7474_v39 = vpop.eup %6723 }
 0xe6c   :  { %v2779_v52 = vsel %vm296_vm4, %v7474_v39, 0.0 }
 0xe77   :  { %2783 = vadd.xlane.f32.xlu0 %v2782_v42 }
 0xe7b   :  { %2780 = vadd.xlane.f32.xlu1 %v2779_v52 }
 0xebb   :  { %v2739_v50 = vpop.xlane.xlu0 %2738 }
 0xebc   :  { %v2757_v5 = vsub.f32 %v2725_v20, %v2739_v50 }
 0xebe   :  { %v2767_v7 = vmul.f32 1.442695, %v2757_v5 }
 0xebf   :  { %v2742_v61 = vpop.xlane.xlu0 %2741  ;;  %v2745_v8 = vpop.xlane.xlu1 %2744 }
 0xec0   :  { %6725 = vpow2.f32 %v2767_v7  ;;  %v2758_v2 = vsub.f32 %v2726_v12, %v2742_v61  ;;  %v2759_v45 = vsub.f32 %v2727_v15, %v2745_v8 }
 0xec2   :  { %v2769_v34 = vmul.f32 1.442695, %v2758_v2  ;;  %v2771_v47 = vmul.f32 1.442695, %v2759_v45 }
 0xec3   :  { %v2748_v35 = vpop.xlane.xlu0 %2747  ;;  %v2751_v60 = vpop.xlane.xlu1 %2750 }
 0xec4   :  { %6727 = vpow2.f32 %v2769_v34  ;;  %v2760_v21 = vsub.f32 %v2728_v27, %v2748_v35  ;;  %v2761_v36 = vsub.f32 %v2729_v24, %v2751_v60 }
 0xec5   :  { %6729 = vpow2.f32 %v2771_v47 }
 0xec6   :  { %v2773_v62 = vmul.f32 1.442695, %v2760_v21  ;;  %v2775_v63 = vmul.f32 1.442695, %v2761_v36 }
 0xec7   :  { %v2754_v6 = vpop.xlane.xlu0 %2753  ;;  %v2820_v13 = vpop.permute.xlu1 %2819 }
 0xec8   :  { %6731 = vpow2.f32 %v2773_v62  ;;  %v2762_v20 = vsub.f32 %v2730_v33, %v2754_v6  ;;  %6427 = vmatpush3.msra.mxu0 %v2820_v13 }
 0xec9   :  { %6733 = vpow2.f32 %v2775_v63  ;;  %6436 = vmatprep.subr.mxu0 %v6854_v1 }
 0xeca   :  { %v2777_v12 = vmul.f32 1.442695, %v2762_v20 }
 0xecb   :  { %v2896_v14 = vpop.permute.xlu0 %2895  ;;  %v2972_v32 = vpop.permute.xlu1 %2971 }
 0xecc   :  { %6735 = vpow2.f32 %v2777_v12  ;;  %6432 = vmatpush3.msra.mxu1 %v2896_v14 }
 0xecd   :  { %v6726_v15 = vpop.eup %6725  ;;  %6441 = vmatprep.subr.mxu1 %v6854_v1 }
 0xece   :  { %v2785_v16 = vsel %vm296_vm4, %v6726_v15, 0.0 }
 0xecf   :  { %2786 = vadd.xlane.f32.xlu1 %v2785_v16  ;;  %v3048_v33 = vpop.permute.xlu1 %3047  ;;  %v3124_v38 = vpop.permute.xlu0 %3123 }
 0xed1   :  { %v6728_v17 = vpop.eup %6727 }
 0xed2   :  { %v6730_v19 = vpop.eup %6729  ;;  %v2788_v22 = vsel %vm296_vm4, %v6728_v17, 0.0 }
 0xed3   :  { %2789 = vadd.xlane.f32.xlu0 %v2788_v22  ;;  %v2791_v23 = vsel %vm296_vm4, %v6730_v19, 0.0  ;;  %v3200_v40 = vpop.permute.xlu1 %3199 }
 0xed4   :  { %2792 = vadd.xlane.f32.xlu1 %v2791_v23 }
 0xed5   :  { %v7483_v24 = vpop.eup %6731 }
 0xed6   :  { %v7485_v27 = vpop.eup %6733  ;;  %v2794_v28 = vsel %vm296_vm4, %v7483_v24, 0.0 }
 0xed7   :  { %2795 = vadd.xlane.f32.xlu0 %v2794_v28  ;;  %v2797_v29 = vsel %vm296_vm4, %v7485_v27, 0.0 }
 0xed8   :  { %2798 = vadd.xlane.f32.xlu1 %v2797_v29 }
 0xed9   :  { %v7491_v30 = vpop.eup %6735 }
 0xeda   :  { %v2800_v31 = vsel %vm296_vm4, %v7491_v30, 0.0 }
 0xedb   :  { %2801 = vadd.xlane.f32.xlu0 %v2800_v31 }
 0xee9   :  { %3351 = vrot.lane.b32.xlu1 %v7404_v37, %s6858_s25 }
 0xeed   :  { %3465 = vrot.lane.b32.xlu1 %v7322_v9, %s6859_s26 }
 0xef1   :  { %3275 = vrot.lane.b32.xlu0 %v7386_v44, %s6858_s25  ;;  %3463 = vrot.lane.b32.xlu1 %v7329_v10, %s6859_s26 }
 0xef5   :  { %3467 = vrot.lane.b32.xlu0 %v7317_v4, %s6859_s26 }
 0xf00   :  { %v2784_v51 = vpop.xlane.xlu0 %2783 }
 0xf01   :  { %6737 = vrcp.f32 %v2784_v51 }
 0xf04   :  { %v2781_v53 = vpop.xlane.xlu1 %2780 }
 0xf05   :  { %6739 = vrcp.f32 %v2781_v53 }
 0xf0e   :  { %v6738_v37 = vpop.eup %6737 }
 0xf0f   :  { %v2812_v9 = vmul.f32 %v6738_v37, %v7470_v43 }
 0xf11   :  { %6434 = vmatmul.mubr.msk.f32.vlgmr.msra.gmra.mxu1 %vm296_vm4, %v2812_v9 }
 0xf12   :  { %v6740_v44 = vpop.eup %6739  ;;  %6442 = vmatpush3.msra.mxu1 %v3048_v33  ;;  %6443 = vmatprep.mubr.msk.f32.mxu1 %vm6856_vm3, %v6854_v1 }
 0xf13   :  { %v2811_v10 = vmul.f32 %v6740_v44, %v7474_v39  ;;  %6451 = vmatprep.subr.mxu1 %v6854_v1 }
 0xf15   :  { %6429 = vmatmul.mubr.msk.f32.vlgmr.msra.gmra.mxu0 %vm296_vm4, %v2811_v10 }
 0xf16   :  { %6437 = vmatpush3.msra.mxu0 %v2972_v32  ;;  %6438 = vmatprep.mubr.msk.f32.mxu0 %vm6856_vm3, %v6854_v1 }
 0xf17   :  { %6446 = vmatprep.subr.mxu0 %v6854_v1 }
 0xf58   :  { %v2787_v4 = vpop.xlane.xlu1 %2786 }
 0xf59   :  { %6741 = vrcp.f32 %v2787_v4  ;;  %v3559_v4 = vrot.slane %v7346_v18, %v7219_v56 }
 0xf5c   :  { %v2790_v54 = vpop.xlane.xlu0 %2789 }
 0xf5d   :  { %6743 = vrcp.f32 %v2790_v54  ;;  %v2793_v55 = vpop.xlane.xlu1 %2792 }
 0xf5e   :  { %6745 = vrcp.f32 %v2793_v55 }
 0xf60   :  { %v2796_v41 = vpop.xlane.xlu0 %2795 }
 0xf61   :  { %6747 = vrcp.f32 %v2796_v41  ;;  %v2799_v58 = vpop.xlane.xlu1 %2798 }
 0xf62   :  { %6749 = vrcp.f32 %v2799_v58 }
 0xf64   :  { %v2802_v43 = vpop.xlane.xlu0 %2801 }
 0xf65   :  { %6751 = vrcp.f32 %v2802_v43  ;;  %v3352_v47 = vpop.permute.xlu1 %3351 }
 0xf66   :  { %v6742_v42 = vpop.eup %6741 }
 0xf67   :  { %v2813_v39 = vmul.f32 %v6742_v42, %v6726_v15 }
 0xf68   :  { %v3276_v8 = vpop.permute.xlu0 %3275 }
 0xf69   :  { %6439 = vmatmul.mubr.msk.f32.vlgmr.msra.gmra.mxu0 %vm296_vm4, %v2813_v39  ;;  %v3466_v36 = vpop.permute.xlu1 %3465 }
 0xf6a   :  { %v6744_v52 = vpop.eup %6743  ;;  %6447 = vmatpush3.msra.mxu0 %v3124_v38  ;;  %6448 = vmatprep.mubr.msk.f32.mxu0 %vm6856_vm3, %v6854_v1 }
 0xf6b   :  { %v6746_v50 = vpop.eup %6745  ;;  %6456 = vmatprep.subr.mxu0 %v6854_v1  ;;  %v2814_v5 = vmul.f32 %v6744_v52, %v6728_v17 }
 0xf6c   :  { %v2815_v7 = vmul.f32 %v6746_v50, %v6730_v19  ;;  %v3468_v21 = vpop.permute.xlu0 %3467 }
 0xf6d   :  { %6444 = vmatmul.mubr.msk.f32.vlgmr.msra.gmra.mxu1 %vm296_vm4, %v2814_v5  ;;  %v3464_v20 = vpop.permute.xlu1 %3463 }
 0xf6e   :  { %v6748_v61 = vpop.eup %6747  ;;  %6449 = vmatmul.mubr.msk.f32.vlgmr.msra.gmra.mxu0 %vm296_vm4, %v2815_v7  ;;  %6452 = vmatpush3.msra.mxu1 %v3200_v40 }
 0xf6f   :  { %v6750_v2 = vpop.eup %6749  ;;  %6457 = vmatpush3.msra.mxu0 %v3276_v8  ;;  %6453 = vmatprep.mubr.msk.f32.mxu1 %vm6856_vm3, %v6854_v1  ;;  %v2816_v45 = vmul.f32 %v6748_v61, %v7483_v24 }
 0xf70   :  { %6458 = vmatprep.mubr.msk.f32.mxu0 %vm6856_vm3, %v6854_v1  ;;  %6461 = vmatprep.subr.mxu1 %v6854_v1  ;;  %v2817_v34 = vmul.f32 %v6750_v2, %v7485_v27 }
 0xf71   :  { %6454 = vmatmul.mubr.msk.f32.vlgmr.msra.gmra.mxu1 %vm296_vm4, %v2816_v45  ;;  %6466 = vmatprep.subr.mxu0 %v3468_v21 }
 0xf72   :  { %v6752_v35 = vpop.eup %6751  ;;  %6459 = vmatmul.mubr.msk.f32.vlgmr.msra.gmra.mxu0 %vm296_vm4, %v2817_v34  ;;  %6462 = vmatpush3.msra.mxu1 %v3352_v47  ;;  %v5931_v47 = vld [vmem:[%s7996_s4 + $0x78] sm:$0xff] }
 0xf73   :  { %6463 = vmatprep.mubr.msk.f32.mxu1 %vm6856_vm3, %v6854_v1  ;;  %v2818_v60 = vmul.f32 %v6752_v35, %v7491_v30  ;;  %6467 = vmatpush3.msra.mxu0 %v3468_v21  ;;  %v5929_v35 = vld [vmem:[%s7996_s4 + $0x68] sm:$0xff] }
 0xf74   :  { %6468 = vmatprep.subr.mxu0 %v3466_v36  ;;  %6477 = vmatprep.subr.mxu1 %v5931_v47  ;;  %v5925_v21 = vld [vmem:[%s7996_s4 + $0x48] sm:$0xff] }
 0xf75   :  { %6464 = vmatmul.mubr.msk.f32.vlgmr.msra.gmra.mxu1 %vm296_vm4, %v2818_v60  ;;  %6469 = vmatpush3.msra.mxu0 %v3466_v36  ;;  %v5927_v60 = vld [vmem:[%s7996_s4 + $0x58] sm:$0xff] }
 0xf76   :  { %6470 = vmatprep.subr.mxu0 %v3464_v20  ;;  %6478 = vmatpush3.msra.mxu1 %v5931_v47  ;;  %v5970_v36 = vld [vmem:[%s7997_s5 + $0x78] sm:$0xff]  ;;  %v7639_v47 = vld [vmem:[%s7996_s4 + $0xa0] sm:$0xff] }
 0xf77   :  { %6471 = vmatpush3.msra.mxu0 %v3464_v20  ;;  %6479 = vmatprep.subr.mxu1 %v5929_v35 }
 0xf78   :  { %6480 = vmatpush3.msra.mxu1 %v5929_v35  ;;  %v7646_v35 = vld [vmem:[%s7996_s4 + $0x90] sm:$0xff] }
 0xf79   :  { %6481 = vmatprep.subr.mxu1 %v5927_v60 }
 0xf7a   :  { %6482 = vmatpush3.msra.mxu1 %v5927_v60  ;;  %v7653_v60 = vld [vmem:[%s7996_s4 + $0x80] sm:$0xff] }
 0xf7b   :  { %6483 = vmatprep.subr.mxu1 %v5925_v21 }
 0xf7c   :  { %6484 = vmatpush3.msra.mxu1 %v5925_v21 }
 0xfd1   :  { %v2967_v62 = vpop.f32.mrf.mxu1 }
 0xfd3   :  { %v6435_v63 = vpop.f32.mrf.mxu1 }
 0xfd4   :  { %v5968_v63 = vld [vmem:[%s7997_s5 + $0x68] sm:$0xff] }
 0xfd5   :  { %v2891_v6 = vpop.f32.mrf.mxu0 }
 0xfd7   :  { %v6430_v13 = vpop.f32.mrf.mxu0 }
0x1029   :  { %v3043_v12 = vpop.f32.mrf.mxu0 }
0x102a   :  { %3428 = vrot.lane.b32.xlu0 %v3043_v12, %s6860_s27 }
0x102b   :  { %v6440_v14 = vpop.f32.mrf.mxu0 }
0x102d   :  { %v3119_v15 = vpop.f32.mrf.mxu1 }
0x102e   :  { %v3195_v16 = vpop.f32.mrf.mxu0  ;;  %3443 = vrot.lane.b32.xlu1 %v3119_v15, %s6860_s27 }
0x102f   :  { %3432 = vrot.lane.b32.xlu0 %v3195_v16, %s6861_s28  ;;  %v6445_v17 = vpop.f32.mrf.mxu1 }
0x1030   :  { %v6450_v19 = vpop.f32.mrf.mxu0  ;;  %v3591_v17 = vrot.slane %v7346_v18, %v7262_v25 }
0x1031   :  { %v3271_v22 = vpop.f32.mrf.mxu1 }
0x1032   :  { %v3347_v23 = vpop.f32.mrf.mxu0  ;;  %3447 = vrot.lane.b32.xlu1 %v3271_v22, %s6861_s28 }
0x1033   :  { %3436 = vrot.lane.b32.xlu0 %v3347_v23, %s6862_s29  ;;  %v6455_v24 = vpop.f32.mrf.mxu1  ;;  %v3597_v23 = vrot.slane %v7346_v18, %v7265_v26 }
0x1034   :  { %v6460_v27 = vpop.f32.mrf.mxu0 }
0x1035   :  { %v3423_v28 = vpop.f32.mrf.mxu1 }
0x1036   :  { %3451 = vrot.lane.b32.xlu1 %v3423_v28, %s6862_s29 }
0x1037   :  { %3461 = vrot.lane.b32.xlu0 %v7336_v11, %s6859_s26  ;;  %v6465_v29 = vpop.f32.mrf.mxu1 }
0x109c   :  { %v3429_v30 = vpop.permute.xlu0 %3428 }
0x109d   :  { %v3439_v33 = vsel %vm296_vm4, %v2891_v6, %v3429_v30  ;;  %v5967_v6 = vld [vmem:[%s7997_s5 + $0x60] sm:$0xff] }
0x10a0   :  { %v3444_v31 = vpop.permute.xlu1 %3443 }
0x10a1   :  { %v3433_v32 = vpop.permute.xlu0 %3432  ;;  %v3454_v37 = vsel %vm296_vm4, %v2967_v62, %v3444_v31  ;;  %v5969_v62 = vld [vmem:[%s7997_s5 + $0x70] sm:$0xff] }
0x10a2   :  { %v3440_v40 = vsel %vm1620_vm5, %v3439_v33, %v3433_v32  ;;  %v5966_v32 = vld [vmem:[%s7997_s5 + $0x58] sm:$0xff]  ;;  %v5965_v33 = vld [vmem:[%s7997_s5 + $0x50] sm:$0xff] }
0x10a4   :  { %v3448_v38 = vpop.permute.xlu1 %3447 }
0x10a5   :  { %v3437_v51 = vpop.permute.xlu0 %3436  ;;  %v3455_v9 = vsel %vm1620_vm5, %v3454_v37, %v3448_v38  ;;  %v5964_v38 = vld [vmem:[%s7997_s5 + $0x48] sm:$0xff] }
0x10a6   :  { %v3441_v53 = vsel %vm1622_vm6, %v3440_v40, %v3437_v51  ;;  %v5963_v40 = vld [vmem:[%s7997_s5 + $0x40] sm:$0xff]  ;;  %v3603_v51 = vrot.slane %v7346_v18, %v7287_v49 }
0x10a7   :  { %6474 = vmatprep.mubr.msk.f32.mxu0 %vm155_vm2, %v3441_v53 }
0x10a8   :  { %v3452_v44 = vpop.permute.xlu1 %3451 }
0x10a9   :  { %v3462_v11 = vpop.permute.xlu0 %3461  ;;  %v3456_v10 = vsel %vm1622_vm6, %v3455_v9, %v3452_v44 }
0x10aa   :  { %6472 = vmatprep.subr.mxu0 %v3462_v11 }
0x10ab   :  { %6473 = vmatpush3.msra.mxu0 %v3462_v11 }
0x10ac   :  { %6475 = vmatmul.mubr.msk.f32.vlgmr.msra.gmra.mxu0 %vm155_vm2, %v3456_v10  ;;  %6488 = vmatprep.subr.mxu0 %v5970_v36 }
0x10ad   :  { %6489 = vmatpush3.msra.mxu0 %v5970_v36 }
0x10ae   :  { %6490 = vmatprep.subr.mxu0 %v5969_v62 }
0x10af   :  { %6491 = vmatpush3.msra.mxu0 %v5969_v62 }
0x10b0   :  { %6492 = vmatprep.subr.mxu0 %v5968_v63 }
0x10b1   :  { %6493 = vmatpush3.msra.mxu0 %v5968_v63 }
0x10b2   :  { %6494 = vmatprep.subr.mxu0 %v5967_v6 }
0x10b3   :  { %6495 = vmatpush3.msra.mxu0 %v5967_v6 }
0x10b4   :  { %6496 = vmatprep.subr.mxu0 %v5966_v32 }
0x10b5   :  { %6497 = vmatpush3.msra.mxu0 %v5966_v32 }
0x10b6   :  { %6498 = vmatprep.subr.mxu0 %v5965_v33 }
0x10b7   :  { %6499 = vmatpush3.msra.mxu0 %v5965_v33 }
0x10b8   :  { %6500 = vmatprep.subr.mxu0 %v5964_v38 }
0x10b9   :  { %6501 = vmatpush3.msra.mxu0 %v5964_v38 }
0x10ba   :  { %6502 = vmatprep.subr.mxu0 %v5963_v40 }
0x10bb   :  { %6503 = vmatpush3.msra.mxu0 %v5963_v40 }
0x10bc   :  { %6528 = vmatprep.subr.mxu0 %v6854_v1 }
0x116c   :  { %v6476_v54 = vpop.f32.mrf.mxu0 }
0x116d   :  { %v3555_v55 = vadd.f32 %v6476_v54, %v7301_v0 }
0x116e   :  { %v3545_v41 = vpop.f32.mrf.mxu0 }
0x116f   :  { %v7553_v58 = vadd.f32 %v3559_v4, %v3555_v55  ;;  %v3554_v43 = vadd.f32 %v3545_v41, %v7304_v3 }
0x1171   :  { %v7556_v42 = vadd.f32 %v3559_v4, %v3554_v43  ;;  %v3565_v39 = vsel %vm155_vm2, %v7553_v58, 0.0  ;;  %v3782_v4 = vrot.slane %v7346_v18, %v7296_v57 }
0x1172   :  { %3566 = vadd.xlane.f32.xlu1 %v3565_v39 }
0x1173   :  { %v3562_v52 = vsel %vm155_vm2, %v7556_v42, 0.0 }
0x1174   :  { %3563 = vadd.xlane.f32.xlu0 %v3562_v52 }
0x11fb   :  { %v3567_v50 = vpop.xlane.xlu1 %3566 }
0x11fc   :  { %v3569_v5 = vmul.f32 0.03125, %v3567_v50 }
0x11fd   :  { %v3564_v7 = vpop.xlane.xlu0 %3563 }
0x11fe   :  { %v3568_v61 = vmul.f32 0.03125, %v3564_v7  ;;  %v3571_v0 = vsub.f32 %v7553_v58, %v3569_v5 }
0x1200   :  { %v3570_v8 = vsub.f32 %v7556_v42, %v3568_v61  ;;  %v3573_v45 = vmul.f32 %v3571_v0, %v3571_v0 }
0x1202   :  { %v3572_v2 = vmul.f32 %v3570_v8, %v3570_v8  ;;  %v3577_v34 = vsel %vm155_vm2, %v3573_v45, 0.0 }
0x1204   :  { %v3574_v3 = vsel %vm155_vm2, %v3572_v2, 0.0 }
0x1205   :  { %3575 = vadd.xlane.f32.xlu0 %v3574_v3 }
0x1209   :  { %3578 = vadd.xlane.f32.xlu0 %v3577_v34  ;;  %v7634_v34 = vld [vmem:[%s7996_s4 + $0xb0] sm:$0xff] }
0x120a   :  { %6507 = vmatprep.subr.mxu1 %v7634_v34 }
0x128e   :  { %v3576_v13 = vpop.xlane.xlu0 %3575 }
0x128f   :  { %v3580_v20 = vmul.f32 0.03125, %v3576_v13 }
0x1291   :  { %v3582_v12 = vadd.f32 1e-05, %v3580_v20  ;;  %v7663_v20 = vld [vmem:[%s7998_s6 + $0x10] sm:$0xff] }
0x1292   :  { %v3579_v14 = vpop.xlane.xlu0 %3578 }
0x1293   :  { %6753 = vrsqrt.f32 %v3582_v12  ;;  %v3581_v15 = vmul.f32 0.03125, %v3579_v14  ;;  %v3825_v14 = vrot.slane %v7663_v20, %v6999_v46  ;;  %v3837_v46 = vrot.slane %v7663_v20, %v7016_v59 }
0x1295   :  { %v3583_v16 = vadd.f32 1e-05, %v3581_v15 }
0x1297   :  { %6755 = vrsqrt.f32 %v3583_v16 }
0x12a0   :  { %v6754_v19 = vpop.eup %6753 }
0x12a1   :  { %v3586_v22 = vmul.f32 %v6754_v19, %v3570_v8 }
0x12a3   :  { %v3592_v24 = vmul.f32 %v3591_v17, %v3586_v22  ;;  %v3831_v22 = vrot.slane %v7663_v20, %v7007_v48 }
0x12a4   :  { %v6756_v27 = vpop.eup %6755 }
0x12a5   :  { %v3587_v28 = vmul.f32 %v6756_v27, %v3571_v0  ;;  %v3598_v29 = vadd.f32 %v3597_v23, %v3592_v24 }
0x12a7   :  { %v3593_v30 = vmul.f32 %v3591_v17, %v3587_v28  ;;  %6485 = vmatprep.mubr.msk.f32.mxu1 %vm155_vm2, %v3598_v29 }
0x12a9   :  { %v3599_v31 = vadd.f32 %v3597_v23, %v3593_v30 }
0x12ab   :  { %6486 = vmatmul.mubr.msk.f32.vlgmr.msra.gmra.mxu1 %vm155_vm2, %v3599_v31 }
0x12ac   :  { %6508 = vmatpush3.msra.mxu1 %v7634_v34 }
0x12ad   :  { %6509 = vmatprep.subr.mxu1 %v7639_v47 }
0x12ae   :  { %6510 = vmatpush3.msra.mxu1 %v7639_v47 }
0x12af   :  { %6511 = vmatprep.subr.mxu1 %v7646_v35 }
0x12b0   :  { %6512 = vmatpush3.msra.mxu1 %v7646_v35 }
0x12b1   :  { %6513 = vmatprep.subr.mxu1 %v7653_v60 }
0x12b2   :  { %6514 = vmatpush3.msra.mxu1 %v7653_v60 }
0x12b3   :  { %6518 = vmatprep.subr.mxu1 %v6854_v1 }
0x136b   :  { %v6487_v53 = vpop.f32.mrf.mxu1 }
0x136c   :  { %v3682_v37 = vadd.f32 %v6487_v53, %v3603_v51 }
0x136d   :  { %v3676_v9 = vpop.f32.mrf.mxu1 }
0x136e   :  { %v3677_v44 = vadd.f32 %v3676_v9, %v3603_v51  ;;  %v3686_v10 = vmax.f32 %v3682_v37, 0.0 }
0x1370   :  { %v3685_v11 = vmax.f32 %v3677_v44, 0.0 }
0x1372   :  { %6504 = vmatprep.mubr.msk.f32.mxu0 %vm1877_vm7, %v3685_v11 }
0x1373   :  { %6505 = vmatmul.mubr.msk.f32.vlgmr.msra.gmra.mxu0 %vm1877_vm7, %v3686_v10 }
0x1374   :  { %6530 = vmatprep.mubr.msk.f32.mxu0 %vm6856_vm3, %v6854_v1 }
0x1433   :  { %v6506_v54 = vpop.f32.mrf.mxu0 }
0x1434   :  { %v3778_v55 = vadd.f32 %v6506_v54, %v7553_v58 }
0x1435   :  { %v3768_v41 = vpop.f32.mrf.mxu0 }
0x1436   :  { %v7618_v43 = vadd.f32 %v3782_v4, %v3778_v55  ;;  %v3777_v39 = vadd.f32 %v3768_v41, %v7556_v42 }
0x1438   :  { %v7621_v52 = vadd.f32 %v3782_v4, %v3777_v39  ;;  %v3799_v50 = vsel %vm155_vm2, %v7618_v43, 0.0 }
0x1439   :  { %3800 = vadd.xlane.f32.xlu0 %v3799_v50 }
0x143a   :  { %v3796_v5 = vsel %vm155_vm2, %v7621_v52, 0.0 }
0x143b   :  { %3797 = vadd.xlane.f32.xlu1 %v3796_v5 }
0x14c2   :  { %v3801_v7 = vpop.xlane.xlu0 %3800 }
0x14c3   :  { %v3803_v18 = vmul.f32 0.03125, %v3801_v7 }
0x14c4   :  { %v3798_v61 = vpop.xlane.xlu1 %3797 }
0x14c5   :  { %v3805_v58 = vsub.f32 %v7618_v43, %v3803_v18  ;;  %v3802_v0 = vmul.f32 0.03125, %v3798_v61 }
0x14c7   :  { %v3804_v8 = vsub.f32 %v7621_v52, %v3802_v0  ;;  %v3807_v2 = vmul.f32 %v3805_v58, %v3805_v58 }
0x14c9   :  { %v3811_v42 = vsel %vm155_vm2, %v3807_v2, 0.0  ;;  %v3806_v3 = vmul.f32 %v3804_v8, %v3804_v8 }
0x14ca   :  { %3812 = vadd.xlane.f32.xlu0 %v3811_v42 }
0x14cb   :  { %v3808_v45 = vsel %vm155_vm2, %v3806_v3, 0.0 }
0x14cc   :  { %3809 = vadd.xlane.f32.xlu1 %v3808_v45 }
0x1553   :  { %v3813_v21 = vpop.xlane.xlu0 %3812 }
0x1554   :  { %v3815_v36 = vmul.f32 0.03125, %v3813_v21 }
0x1555   :  { %v3810_v62 = vpop.xlane.xlu1 %3809 }
0x1556   :  { %v3817_v63 = vadd.f32 1e-05, %v3815_v36  ;;  %v3814_v6 = vmul.f32 0.03125, %v3810_v62 }
0x1558   :  { %6757 = vrsqrt.f32 %v3817_v63  ;;  %v3816_v13 = vadd.f32 1e-05, %v3814_v6 }
0x155a   :  { %6759 = vrsqrt.f32 %v3816_v13 }
0x1565   :  { %v6758_v12 = vpop.eup %6757 }
0x1566   :  { %v3821_v15 = vmul.f32 %v6758_v12, %v3805_v58 }
0x1567   :  { %v6760_v16 = vpop.eup %6759 }
0x1568   :  { %v3820_v17 = vmul.f32 %v6760_v16, %v3804_v8  ;;  %v3827_v19 = vmul.f32 %v3825_v14, %v3821_v15 }
0x156a   :  { %v3826_v23 = vmul.f32 %v3825_v14, %v3820_v17  ;;  %v3833_v27 = vadd.f32 %v3831_v22, %v3827_v19 }
0x156c   :  { %v3832_v24 = vadd.f32 %v3831_v22, %v3826_v23 }
0x156e   :  { %6515 = vmatprep.mubr.msk.f32.mxu1 %vm155_vm2, %v3832_v24 }
0x156f   :  { %6516 = vmatmul.mubr.msk.f32.vlgmr.msra.gmra.mxu1 %vm155_vm2, %v3833_v27 }
0x1570   :  { %6520 = vmatprep.mubr.msk.f32.mxu1 %vm6856_vm3, %v6854_v1 }
0x162f   :  { %v6517_v28 = vpop.f32.mrf.mxu1 }
0x1630   :  { %v7675_v29 = vadd.f32 %v6517_v28, %v3837_v46 }
0x1631   :  { %v3910_v30 = vpop.f32.mrf.mxu1 }
0x1632   :  { %v7677_v31 = vadd.f32 %v3910_v30, %v3837_v46  ;;  %3923 = vrot.lane.b32.xlu0 %v7675_v29, %s6852_s21 }
0x1634   :  { %3920 = vrot.lane.b32.xlu1 %v7677_v31, %s6852_s21 }
0x1636   :  { %3929 = vrot.lane.b32.xlu0 %v7677_v31, %s6853_s22 }
0x1638   :  { %3925 = vrot.lane.b32.xlu1 %v7677_v31, %s6855_s23 }
0x163a   :  { %3933 = vrot.lane.b32.xlu0 %v7677_v31, %s6857_s24 }
0x163c   :  { %3927 = vrot.lane.b32.xlu1 %v7675_v29, %s6855_s23 }
0x1640   :  { %3931 = vrot.lane.b32.xlu1 %v7675_v29, %s6853_s22 }
0x1644   :  { %4009 = vrot.lane.b32.xlu1 %v7675_v29, %s6857_s24 }
0x16a4   :  { %v7695_v48 = vpop.permute.xlu0 %3923 }
0x16a5   :  { %4161 = vrot.lane.b32.xlu1 %v7695_v48, %s6857_s24 }
0x16a6   :  { %v7699_v59 = vpop.permute.xlu1 %3920 }
0x16a7   :  { %4085 = vrot.lane.b32.xlu0 %v7699_v59, %s6857_s24 }
0x16a8   :  { %v7703_v32 = vpop.permute.xlu0 %3929 }
0x16aa   :  { %v7705_v33 = vpop.permute.xlu1 %3925 }
0x16ab   :  { %4237 = vrot.lane.b32.xlu0 %v7705_v33, %s6857_s24 }
0x16ac   :  { %v3934_v38 = vpop.permute.xlu0 %3933 }
0x16ad   :  { %6519 = vmatpush3.xpose.msk.msra.mxu1 %vm296_vm4, %v3934_v38 }
0x16ae   :  { %v7710_v40 = vpop.permute.xlu1 %3927  ;;  %6523 = vmatprep.subr.mxu1 %v6854_v1 }
0x16af   :  { %4389 = vrot.lane.b32.xlu0 %v7703_v32, %s6857_s24  ;;  %4313 = vrot.lane.b32.xlu1 %v7710_v40, %s6857_s24 }
0x16b0   :  { %6521 = vmatmul.mubr.msk.f32.vlgmr.msra.gmra.mxu1 %vm296_vm4, %v7677_v31 }
0x16b1   :  { %6525 = vmatprep.mubr.msk.f32.mxu1 %vm6856_vm3, %v6854_v1 }
0x16b2   :  { %v7721_v51 = vpop.permute.xlu1 %3931 }
0x16b3   :  { %4465 = vrot.lane.b32.xlu1 %v7721_v51, %s6857_s24 }
0x16b6   :  { %v4010_v53 = vpop.permute.xlu1 %4009 }
0x16b7   :  { %6524 = vmatpush3.xpose.msk.msra.mxu1 %vm296_vm4, %v4010_v53 }
0x16b8   :  { %6533 = vmatprep.subr.mxu1 %v6854_v1 }
0x16ba   :  { %6526 = vmatmul.mubr.msk.f32.vlgmr.msra.gmra.mxu1 %vm296_vm4, %v7675_v29 }
0x16bb   :  { %6535 = vmatprep.mubr.msk.f32.mxu1 %vm6856_vm3, %v6854_v1 }
0x1717   :  { %v4162_v37 = vpop.permute.xlu1 %4161 }
0x1718   :  { %6534 = vmatpush3.xpose.msk.msra.mxu1 %vm296_vm4, %v4162_v37 }
0x1719   :  { %v4086_v9 = vpop.permute.xlu0 %4085  ;;  %6543 = vmatprep.subr.mxu1 %v6854_v1 }
0x171a   :  { %6529 = vmatpush3.xpose.msk.msra.mxu0 %vm296_vm4, %v4086_v9 }
0x171b   :  { %6536 = vmatmul.mubr.msk.f32.vlgmr.msra.gmra.mxu1 %vm296_vm4, %v7695_v48  ;;  %6538 = vmatprep.subr.mxu0 %v6854_v1 }
0x171c   :  { %6545 = vmatprep.mubr.msk.f32.mxu1 %vm6856_vm3, %v6854_v1 }
0x171d   :  { %6531 = vmatmul.mubr.msk.f32.vlgmr.msra.gmra.mxu0 %vm296_vm4, %v7699_v59  ;;  %v4238_v44 = vpop.permute.xlu0 %4237 }
0x171e   :  { %6539 = vmatpush3.xpose.msk.msra.mxu0 %vm296_vm4, %v4238_v44  ;;  %6540 = vmatprep.mubr.msk.f32.mxu0 %vm6856_vm3, %v6854_v1 }
0x171f   :  { %6548 = vmatprep.subr.mxu0 %v6854_v1 }
0x1721   :  { %6541 = vmatmul.mubr.msk.f32.vlgmr.msra.gmra.mxu0 %vm296_vm4, %v7705_v33  ;;  %v4390_v11 = vpop.permute.xlu0 %4389  ;;  %v4314_v10 = vpop.permute.xlu1 %4313 }
0x1722   :  { %6544 = vmatpush3.xpose.msk.msra.mxu1 %vm296_vm4, %v4314_v10  ;;  %6549 = vmatpush3.xpose.msk.msra.mxu0 %vm296_vm4, %v4390_v11 }
0x1723   :  { %6550 = vmatprep.mubr.msk.f32.mxu0 %vm6856_vm3, %v6854_v1  ;;  %6553 = vmatprep.subr.mxu1 %v6854_v1 }
0x1724   :  { %6558 = vmatprep.subr.mxu0 %v6854_v1 }
0x1725   :  { %6546 = vmatmul.mubr.msk.f32.vlgmr.msra.gmra.mxu1 %vm296_vm4, %v7710_v40  ;;  %6551 = vmatmul.mubr.msk.f32.vlgmr.msra.gmra.mxu0 %vm296_vm4, %v7703_v32  ;;  %v4466_v4 = vpop.permute.xlu1 %4465 }
0x1726   :  { %6554 = vmatpush3.xpose.msk.msra.mxu1 %vm296_vm4, %v4466_v4  ;;  %6555 = vmatprep.mubr.msk.f32.mxu1 %vm6856_vm3, %v6854_v1 }
0x1727   :  { %6563 = vmatprep.subr.mxu1 %v6854_v1  ;;  %6560 = vmatprep.mubr.msk.f32.mxu0 %vm6856_vm3, %v6854_v1 }
0x1729   :  { %6556 = vmatmul.mubr.msk.f32.vlgmr.msra.gmra.mxu1 %vm296_vm4, %v7721_v51 }
0x172a   :  { %6565 = vmatprep.mubr.msk.f32.mxu1 %vm6856_vm3, %v6854_v1 }
0x1770   :  { %v4005_v54 = vpop.f32.mrf.mxu1 }
0x1771   :  { %v4541_v55 = vmul.f32 0.35355338, %v4005_v54 }
0x1772   :  { %v6522_v41 = vpop.f32.mrf.mxu1 }
0x1773   :  { %v4549_v39 = vsel %vm296_vm4, %v4541_v55, -inf }
0x1774   :  { %4550 = vmax.xlane.f32.xlu0 %v4549_v39 }
0x177a   :  { %v4081_v50 = vpop.f32.mrf.mxu1 }
0x177b   :  { %v4542_v5 = vmul.f32 0.35355338, %v4081_v50 }
0x177c   :  { %v6527_v7 = vpop.f32.mrf.mxu1 }
0x177d   :  { %v4552_v18 = vsel %vm296_vm4, %v4542_v5, -inf }
0x177e   :  { %4553 = vmax.xlane.f32.xlu1 %v4552_v18 }
0x17db   :  { %v4233_v61 = vpop.f32.mrf.mxu1 }
0x17dc   :  { %v4544_v42 = vmul.f32 0.35355338, %v4233_v61 }
0x17dd   :  { %v4157_v58 = vpop.f32.mrf.mxu0  ;;  %v6537_v0 = vpop.f32.mrf.mxu1 }
0x17de   :  { %v4543_v8 = vmul.f32 0.35355338, %v4157_v58  ;;  %v4558_v63 = vsel %vm296_vm4, %v4544_v42, -inf }
0x17df   :  { %v6532_v2 = vpop.f32.mrf.mxu0 }
0x17e0   :  { %v4555_v3 = vsel %vm296_vm4, %v4543_v8, -inf }
0x17e1   :  { %4556 = vmax.xlane.f32.xlu0 %v4555_v3  ;;  %v4309_v45 = vpop.f32.mrf.mxu0 }
0x17e2   :  { %v4545_v21 = vmul.f32 0.35355338, %v4309_v45 }
0x17e3   :  { %v6542_v36 = vpop.f32.mrf.mxu0 }
0x17e4   :  { %v4561_v62 = vsel %vm296_vm4, %v4545_v21, -inf }
0x17e5   :  { %v4461_v6 = vpop.f32.mrf.mxu0  ;;  %4562 = vmax.xlane.f32.xlu1 %v4561_v62  ;;  %4559 = vmax.xlane.f32.xlu0 %v4558_v63  ;;  %v4385_v13 = vpop.f32.mrf.mxu1 }
0x17e6   :  { %v4547_v12 = vmul.f32 0.35355338, %v4461_v6  ;;  %v4546_v14 = vmul.f32 0.35355338, %v4385_v13 }
0x17e7   :  { %v6547_v15 = vpop.f32.mrf.mxu1  ;;  %v6552_v16 = vpop.f32.mrf.mxu0 }
0x17e8   :  { %v4567_v17 = vsel %vm296_vm4, %v4547_v12, -inf  ;;  %v4564_v19 = vsel %vm296_vm4, %v4546_v14, -inf }
0x17e9   :  { %4568 = vmax.xlane.f32.xlu1 %v4567_v17  ;;  %4565 = vmax.xlane.f32.xlu0 %v4564_v19  ;;  %v4537_v22 = vpop.f32.mrf.mxu1 }
0x17ea   :  { %v4548_v23 = vmul.f32 0.35355338, %v4537_v22 }
0x17eb   :  { %v6557_v24 = vpop.f32.mrf.mxu1 }
0x17ec   :  { %v4570_v27 = vsel %vm296_vm4, %v4548_v23, -inf }
0x17ed   :  { %4571 = vmax.xlane.f32.xlu0 %v4570_v27 }
0x17fa   :  { %4637 = vrot.lane.b32.xlu1 %v7677_v31, %s6858_s25 }
0x17fd   :  { %v4551_v30 = vpop.xlane.xlu0 %4550 }
0x17fe   :  { %4789 = vrot.lane.b32.xlu1 %v7699_v59, %s6858_s25  ;;  %v4573_v38 = vsub.f32 %v4541_v55, %v4551_v30 }
0x1800   :  { %v4581_v53 = vmul.f32 1.442695, %v4573_v38 }
0x1802   :  { %4865 = vrot.lane.b32.xlu1 %v7695_v48, %s6858_s25 }
0x1803   :  { %4713 = vrot.lane.b32.xlu0 %v7675_v29, %s6858_s25 }
0x1806   :  { %5017 = vrot.lane.b32.xlu1 %v7710_v40, %s6858_s25 }
0x1807   :  { %4941 = vrot.lane.b32.xlu0 %v7705_v33, %s6858_s25  ;;  %v4554_v46 = vpop.xlane.xlu1 %4553 }
0x1808   :  { %v4574_v28 = vsub.f32 %v4542_v5, %v4554_v46 }
0x180a   :  { %v4583_v31 = vmul.f32 1.442695, %v4574_v28 }
0x180c   :  { %6761 = vpow2.f32 %v4583_v31 }
0x180d   :  { %6763 = vpow2.f32 %v4581_v53 }
0x1819   :  { %v7787_v59 = vpop.eup %6761 }
0x181a   :  { %v4600_v48 = vsel %vm296_vm4, %v7787_v59, 0.0  ;;  %v7791_v29 = vpop.eup %6763 }
0x181b   :  { %v4597_v40 = vsel %vm296_vm4, %v7791_v29, 0.0 }
0x1826   :  { %4601 = vadd.xlane.f32.xlu0 %v4600_v48 }
0x182a   :  { %4598 = vadd.xlane.f32.xlu1 %v4597_v40 }
0x186a   :  { %v4557_v33 = vpop.xlane.xlu0 %4556 }
0x186b   :  { %v4575_v37 = vsub.f32 %v4543_v8, %v4557_v33 }
0x186d   :  { %v4585_v9 = vmul.f32 1.442695, %v4575_v37 }
0x186e   :  { %v4560_v44 = vpop.xlane.xlu0 %4559  ;;  %v4563_v11 = vpop.xlane.xlu1 %4562 }
0x186f   :  { %6765 = vpow2.f32 %v4585_v9  ;;  %v4576_v10 = vsub.f32 %v4544_v42, %v4560_v44  ;;  %v4577_v4 = vsub.f32 %v4545_v21, %v4563_v11 }
0x1871   :  { %v4587_v54 = vmul.f32 1.442695, %v4576_v10  ;;  %v4589_v55 = vmul.f32 1.442695, %v4577_v4 }
0x1872   :  { %v4566_v41 = vpop.xlane.xlu0 %4565  ;;  %v4569_v39 = vpop.xlane.xlu1 %4568 }
0x1873   :  { %6767 = vpow2.f32 %v4587_v54  ;;  %v4578_v50 = vsub.f32 %v4546_v14, %v4566_v41  ;;  %v4579_v5 = vsub.f32 %v4547_v12, %v4569_v39 }
0x1874   :  { %6769 = vpow2.f32 %v4589_v55 }
0x1875   :  { %v4591_v7 = vmul.f32 1.442695, %v4578_v50  ;;  %v4593_v18 = vmul.f32 1.442695, %v4579_v5 }
0x1876   :  { %v4572_v61 = vpop.xlane.xlu0 %4571  ;;  %v4638_v58 = vpop.permute.xlu1 %4637 }
0x1877   :  { %6771 = vpow2.f32 %v4591_v7  ;;  %v4580_v0 = vsub.f32 %v4548_v23, %v4572_v61  ;;  %6559 = vmatpush3.msra.mxu0 %v4638_v58 }
0x1878   :  { %6773 = vpow2.f32 %v4593_v18  ;;  %6568 = vmatprep.subr.mxu0 %v6854_v1 }
0x1879   :  { %v4595_v8 = vmul.f32 1.442695, %v4580_v0 }
0x187a   :  { %v4714_v2 = vpop.permute.xlu0 %4713  ;;  %v4790_v16 = vpop.permute.xlu1 %4789 }
0x187b   :  { %6775 = vpow2.f32 %v4595_v8  ;;  %6564 = vmatpush3.msra.mxu1 %v4714_v2 }
0x187c   :  { %v6766_v42 = vpop.eup %6765  ;;  %6573 = vmatprep.subr.mxu1 %v6854_v1 }
0x187d   :  { %v4603_v3 = vsel %vm296_vm4, %v6766_v42, 0.0 }
0x187e   :  { %4604 = vadd.xlane.f32.xlu1 %v4603_v3  ;;  %v4866_v17 = vpop.permute.xlu1 %4865  ;;  %v4942_v19 = vpop.permute.xlu0 %4941 }
0x1880   :  { %v6768_v45 = vpop.eup %6767 }
0x1881   :  { %v6770_v21 = vpop.eup %6769  ;;  %v4606_v36 = vsel %vm296_vm4, %v6768_v45, 0.0 }
0x1882   :  { %4607 = vadd.xlane.f32.xlu0 %v4606_v36  ;;  %v4609_v62 = vsel %vm296_vm4, %v6770_v21, 0.0  ;;  %v5018_v22 = vpop.permute.xlu1 %5017 }
0x1883   :  { %4610 = vadd.xlane.f32.xlu1 %v4609_v62 }
0x1884   :  { %v7800_v63 = vpop.eup %6771 }
0x1885   :  { %v7802_v6 = vpop.eup %6773  ;;  %v4612_v13 = vsel %vm296_vm4, %v7800_v63, 0.0 }
0x1886   :  { %4613 = vadd.xlane.f32.xlu0 %v4612_v13  ;;  %v4615_v12 = vsel %vm296_vm4, %v7802_v6, 0.0 }
0x1887   :  { %4616 = vadd.xlane.f32.xlu1 %v4615_v12 }
0x1888   :  { %v7808_v14 = vpop.eup %6775 }
0x1889   :  { %v4618_v15 = vsel %vm296_vm4, %v7808_v14, 0.0 }
0x188a   :  { %4619 = vadd.xlane.f32.xlu0 %v4618_v15 }
0x1898   :  { %5169 = vrot.lane.b32.xlu1 %v7721_v51, %s6858_s25 }
0x189c   :  { %5283 = vrot.lane.b32.xlu1 %v7639_v47, %s6859_s26 }
0x18a0   :  { %5093 = vrot.lane.b32.xlu0 %v7703_v32, %s6858_s25  ;;  %5281 = vrot.lane.b32.xlu1 %v7646_v35, %s6859_s26 }
0x18a4   :  { %5285 = vrot.lane.b32.xlu0 %v7634_v34, %s6859_s26 }
0x18af   :  { %v4602_v23 = vpop.xlane.xlu0 %4601 }
0x18b0   :  { %6777 = vrcp.f32 %v4602_v23 }
0x18b3   :  { %v4599_v24 = vpop.xlane.xlu1 %4598 }
0x18b4   :  { %6779 = vrcp.f32 %v4599_v24 }
0x18bd   :  { %v6778_v51 = vpop.eup %6777 }
0x18be   :  { %v4630_v47 = vmul.f32 %v6778_v51, %v7787_v59 }
0x18c0   :  { %6566 = vmatmul.mubr.msk.f32.vlgmr.msra.gmra.mxu1 %vm296_vm4, %v4630_v47  ;;  %v5377_v47 = vrot.slane %v7663_v20, %v7219_v56 }
0x18c1   :  { %v6780_v32 = vpop.eup %6779  ;;  %6574 = vmatpush3.msra.mxu1 %v4866_v17  ;;  %6575 = vmatprep.mubr.msk.f32.mxu1 %vm6856_vm3, %v6854_v1 }
0x18c2   :  { %v4629_v35 = vmul.f32 %v6780_v32, %v7791_v29  ;;  %6583 = vmatprep.subr.mxu1 %v6854_v1 }
0x18c4   :  { %6561 = vmatmul.mubr.msk.f32.vlgmr.msra.gmra.mxu0 %vm296_vm4, %v4629_v35 }
0x18c5   :  { %6569 = vmatpush3.msra.mxu0 %v4790_v16  ;;  %6570 = vmatprep.mubr.msk.f32.mxu0 %vm6856_vm3, %v6854_v1 }
0x18c6   :  { %6578 = vmatprep.subr.mxu0 %v6854_v1 }
0x1907   :  { %v4605_v34 = vpop.xlane.xlu1 %4604 }
0x1908   :  { %6781 = vrcp.f32 %v4605_v34 }
0x190b   :  { %v4608_v27 = vpop.xlane.xlu0 %4607 }
0x190c   :  { %6783 = vrcp.f32 %v4608_v27  ;;  %v4611_v46 = vpop.xlane.xlu1 %4610 }
0x190d   :  { %6785 = vrcp.f32 %v4611_v46 }
0x190f   :  { %v4614_v28 = vpop.xlane.xlu0 %4613 }
0x1910   :  { %6787 = vrcp.f32 %v4614_v28  ;;  %v4617_v30 = vpop.xlane.xlu1 %4616 }
0x1911   :  { %6789 = vrcp.f32 %v4617_v30 }
0x1913   :  { %v4620_v38 = vpop.xlane.xlu0 %4619 }
0x1914   :  { %6791 = vrcp.f32 %v4620_v38  ;;  %v5170_v10 = vpop.permute.xlu1 %5169 }
0x1915   :  { %v6782_v31 = vpop.eup %6781 }
0x1916   :  { %v4631_v53 = vmul.f32 %v6782_v31, %v6766_v42 }
0x1917   :  { %v5094_v37 = vpop.permute.xlu0 %5093 }
0x1918   :  { %6571 = vmatmul.mubr.msk.f32.vlgmr.msra.gmra.mxu0 %vm296_vm4, %v4631_v53  ;;  %v5284_v41 = vpop.permute.xlu1 %5283 }
0x1919   :  { %v6784_v59 = vpop.eup %6783  ;;  %6579 = vmatpush3.msra.mxu0 %v4942_v19  ;;  %6580 = vmatprep.mubr.msk.f32.mxu0 %vm6856_vm3, %v6854_v1 }
0x191a   :  { %v6786_v48 = vpop.eup %6785  ;;  %6588 = vmatprep.subr.mxu0 %v6854_v1  ;;  %v4632_v29 = vmul.f32 %v6784_v59, %v6768_v45 }
0x191b   :  { %v4633_v40 = vmul.f32 %v6786_v48, %v6770_v21  ;;  %v5286_v55 = vpop.permute.xlu0 %5285 }
0x191c   :  { %6576 = vmatmul.mubr.msk.f32.vlgmr.msra.gmra.mxu1 %vm296_vm4, %v4632_v29  ;;  %v5282_v18 = vpop.permute.xlu1 %5281 }
0x191d   :  { %v6788_v33 = vpop.eup %6787  ;;  %6581 = vmatmul.mubr.msk.f32.vlgmr.msra.gmra.mxu0 %vm296_vm4, %v4633_v40  ;;  %6584 = vmatpush3.msra.mxu1 %v5018_v22 }
0x191e   :  { %v6790_v9 = vpop.eup %6789  ;;  %6589 = vmatpush3.msra.mxu0 %v5094_v37  ;;  %6585 = vmatprep.mubr.msk.f32.mxu1 %vm6856_vm3, %v6854_v1  ;;  %v4634_v44 = vmul.f32 %v6788_v33, %v7800_v63  ;;  %v5980_v37 = vld [vmem:[%s7996_s4 + $0xb8] sm:$0xff] }
0x191f   :  { %6590 = vmatprep.mubr.msk.f32.mxu0 %vm6856_vm3, %v6854_v1  ;;  %6593 = vmatprep.subr.mxu1 %v6854_v1  ;;  %v4635_v11 = vmul.f32 %v6790_v9, %v7802_v6  ;;  %v5978_v9 = vld [vmem:[%s7996_s4 + $0xa8] sm:$0xff] }
0x1920   :  { %6586 = vmatmul.mubr.msk.f32.vlgmr.msra.gmra.mxu1 %vm296_vm4, %v4634_v44  ;;  %6598 = vmatprep.subr.mxu0 %v5286_v55  ;;  %v5976_v44 = vld [vmem:[%s7996_s4 + $0x98] sm:$0xff] }
0x1921   :  { %v6792_v4 = vpop.eup %6791  ;;  %6591 = vmatmul.mubr.msk.f32.vlgmr.msra.gmra.mxu0 %vm296_vm4, %v4635_v11  ;;  %6594 = vmatpush3.msra.mxu1 %v5170_v10  ;;  %v5974_v11 = vld [vmem:[%s7996_s4 + $0x88] sm:$0xff]  ;;  %v6019_v10 = vld [vmem:[%s7997_s5 + $0xb8] sm:$0xff] }
0x1922   :  { %6595 = vmatprep.mubr.msk.f32.mxu1 %vm6856_vm3, %v6854_v1  ;;  %v4636_v54 = vmul.f32 %v6792_v4, %v7808_v14  ;;  %6599 = vmatpush3.msra.mxu0 %v5286_v55  ;;  %v6018_v4 = vld [vmem:[%s7997_s5 + $0xb0] sm:$0xff]  ;;  %v6016_v55 = vld [vmem:[%s7997_s5 + $0xa0] sm:$0xff] }
0x1923   :  { %6600 = vmatprep.subr.mxu0 %v5284_v41  ;;  %6609 = vmatprep.subr.mxu1 %v5980_v37 }
0x1924   :  { %6596 = vmatmul.mubr.msk.f32.vlgmr.msra.gmra.mxu1 %vm296_vm4, %v4636_v54  ;;  %6601 = vmatpush3.msra.mxu0 %v5284_v41  ;;  %v6017_v54 = vld [vmem:[%s7997_s5 + $0xa8] sm:$0xff] }
0x1925   :  { %6602 = vmatprep.subr.mxu0 %v5282_v18  ;;  %6610 = vmatpush3.msra.mxu1 %v5980_v37 }
0x1926   :  { %6603 = vmatpush3.msra.mxu0 %v5282_v18  ;;  %6611 = vmatprep.subr.mxu1 %v5978_v9 }
0x1927   :  { %6612 = vmatpush3.msra.mxu1 %v5978_v9 }
0x1928   :  { %6613 = vmatprep.subr.mxu1 %v5976_v44 }
0x1929   :  { %6614 = vmatpush3.msra.mxu1 %v5976_v44 }
0x192a   :  { %6615 = vmatprep.subr.mxu1 %v5974_v11 }
0x192b   :  { %6616 = vmatpush3.msra.mxu1 %v5974_v11 }
0x1980   :  { %v4785_v39 = vpop.f32.mrf.mxu1 }
0x1982   :  { %v6567_v50 = vpop.f32.mrf.mxu1 }
0x1984   :  { %v4709_v5 = vpop.f32.mrf.mxu0 }
0x1986   :  { %v6562_v7 = vpop.f32.mrf.mxu0 }
0x19d8   :  { %v4861_v61 = vpop.f32.mrf.mxu0 }
0x19d9   :  { %5246 = vrot.lane.b32.xlu0 %v4861_v61, %s6860_s27  ;;  %v5409_v61 = vrot.slane %v7663_v20, %v7262_v25  ;;  %v6014_v25 = vld [vmem:[%s7997_s5 + $0x90] sm:$0xff] }
0x19da   :  { %v6572_v58 = vpop.f32.mrf.mxu0 }
0x19dc   :  { %v4937_v0 = vpop.f32.mrf.mxu1 }
0x19dd   :  { %v5013_v8 = vpop.f32.mrf.mxu0  ;;  %5261 = vrot.lane.b32.xlu1 %v4937_v0, %s6860_s27 }
0x19de   :  { %5250 = vrot.lane.b32.xlu0 %v5013_v8, %s6861_s28  ;;  %v6577_v2 = vpop.f32.mrf.mxu1  ;;  %v5415_v8 = vrot.slane %v7663_v20, %v7265_v26  ;;  %v6013_v26 = vld [vmem:[%s7997_s5 + $0x88] sm:$0xff] }
0x19df   :  { %v6582_v42 = vpop.f32.mrf.mxu0 }
0x19e0   :  { %v5089_v3 = vpop.f32.mrf.mxu1 }
0x19e1   :  { %v5165_v45 = vpop.f32.mrf.mxu0  ;;  %5265 = vrot.lane.b32.xlu1 %v5089_v3, %s6861_s28 }
0x19e2   :  { %5254 = vrot.lane.b32.xlu0 %v5165_v45, %s6862_s29  ;;  %v6587_v21 = vpop.f32.mrf.mxu1 }
0x19e3   :  { %v6592_v36 = vpop.f32.mrf.mxu0 }
0x19e4   :  { %v5241_v62 = vpop.f32.mrf.mxu1 }
0x19e5   :  { %5269 = vrot.lane.b32.xlu1 %v5241_v62, %s6862_s29  ;;  %v6015_v62 = vld [vmem:[%s7997_s5 + $0x98] sm:$0xff] }
0x19e6   :  { %5279 = vrot.lane.b32.xlu0 %v7653_v60, %s6859_s26  ;;  %v6597_v63 = vpop.f32.mrf.mxu1 }
0x19e7   :  { %v6012_v63 = vld [vmem:[%s7997_s5 + $0x80] sm:$0xff] }
0x1a4b   :  { %v5247_v6 = vpop.permute.xlu0 %5246 }
0x1a4c   :  { %v5257_v14 = vsel %vm296_vm4, %v4709_v5, %v5247_v6  ;;  %v5606_v6 = vld [vmem:[%s7999_s7 + $0x18] sm:$0xff] }
0x1a4f   :  { %v5262_v13 = vpop.permute.xlu1 %5261 }
0x1a50   :  { %v5251_v12 = vpop.permute.xlu0 %5250  ;;  %v5272_v22 = vsel %vm296_vm4, %v4785_v39, %v5262_v13  ;;  %v5605_v13 = vld [vmem:[%s7999_s7 + $0x10] sm:$0xff] }
0x1a51   :  { %v5258_v16 = vsel %vm1620_vm5, %v5257_v14, %v5251_v12  ;;  %v5604_v12 = vld [vmem:[%s7999_s7 + $0x8] sm:$0xff]  ;;  %v5603_v14 = vld [vmem:[%s7999_s7] sm:$0xff] }
0x1a53   :  { %v5266_v15 = vpop.permute.xlu1 %5265 }
0x1a54   :  { %v5255_v17 = vpop.permute.xlu0 %5254  ;;  %v5273_v23 = vsel %vm1620_vm5, %v5272_v22, %v5266_v15 }
0x1a55   :  { %v5259_v19 = vsel %vm1622_vm6, %v5258_v16, %v5255_v17  ;;  %v5421_v17 = vrot.slane %v7663_v20, %v7287_v49  ;;  %v7948_v49 = vld [vmem:[%s7999_s7 + $0x20] ss:$0 sm:$0xff] }
0x1a56   :  { %6606 = vmatprep.mubr.msk.f32.mxu0 %vm155_vm2, %v5259_v19 }
0x1a57   :  { %v5270_v24 = vpop.permute.xlu1 %5269 }
0x1a58   :  { %v5280_v60 = vpop.permute.xlu0 %5279  ;;  %v5274_v51 = vsel %vm1622_vm6, %v5273_v23, %v5270_v24 }
0x1a59   :  { %6604 = vmatprep.subr.mxu0 %v5280_v60 }
0x1a5a   :  { %6605 = vmatpush3.msra.mxu0 %v5280_v60 }
0x1a5b   :  { %6607 = vmatmul.mubr.msk.f32.vlgmr.msra.gmra.mxu0 %vm155_vm2, %v5274_v51  ;;  %6620 = vmatprep.subr.mxu0 %v6019_v10 }
0x1a5c   :  { %6621 = vmatpush3.msra.mxu0 %v6019_v10 }
0x1a5d   :  { %6622 = vmatprep.subr.mxu0 %v6018_v4 }
0x1a5e   :  { %6623 = vmatpush3.msra.mxu0 %v6018_v4 }
0x1a5f   :  { %6624 = vmatprep.subr.mxu0 %v6017_v54 }
0x1a60   :  { %6625 = vmatpush3.msra.mxu0 %v6017_v54 }
0x1a61   :  { %6626 = vmatprep.subr.mxu0 %v6016_v55 }
0x1a62   :  { %6627 = vmatpush3.msra.mxu0 %v6016_v55 }
0x1a63   :  { %6628 = vmatprep.subr.mxu0 %v6015_v62 }
0x1a64   :  { %6629 = vmatpush3.msra.mxu0 %v6015_v62 }
0x1a65   :  { %6630 = vmatprep.subr.mxu0 %v6014_v25 }
0x1a66   :  { %6631 = vmatpush3.msra.mxu0 %v6014_v25 }
0x1a67   :  { %6632 = vmatprep.subr.mxu0 %v6013_v26 }
0x1a68   :  { %6633 = vmatpush3.msra.mxu0 %v6013_v26 }
0x1a69   :  { %6634 = vmatprep.subr.mxu0 %v6012_v63 }
0x1a6a   :  { %6635 = vmatpush3.msra.mxu0 %v6012_v63 }
0x1b1b   :  { %v6608_v32 = vpop.f32.mrf.mxu0 }
0x1b1c   :  { %v5373_v35 = vadd.f32 %v6608_v32, %v7618_v43 }
0x1b1d   :  { %v5363_v34 = vpop.f32.mrf.mxu0 }
0x1b1e   :  { %v7870_v27 = vadd.f32 %v5377_v47, %v5373_v35  ;;  %v5372_v46 = vadd.f32 %v5363_v34, %v7621_v52 }
0x1b20   :  { %v7873_v28 = vadd.f32 %v5377_v47, %v5372_v46  ;;  %v5383_v30 = vsel %vm155_vm2, %v7870_v27, 0.0  ;;  %v5600_v46 = vrot.slane %v7663_v20, %v7296_v57  ;;  %v6805_v20 = vld [vmem:[%s7993_s1 + $0x8] sm:$0xff] }
0x1b21   :  { %5384 = vadd.xlane.f32.xlu1 %v5383_v30  ;;  %vm5714_vm8 = vcmp.gt.f32.partialorder %v6805_v20, 0.5 }
0x1b22   :  { %v5380_v38 = vsel %vm155_vm2, %v7873_v28, 0.0 }
0x1b23   :  { %5381 = vadd.xlane.f32.xlu0 %v5380_v38 }
0x1b32   :  { %5622 = vrot.lane.b32.xlu1 %v5606_v6, %s6852_s21 }
0x1b36   :  { %5618 = vrot.lane.b32.xlu1 %v5604_v12, %s6852_s21 }
0x1b3a   :  { %5616 = vrot.lane.b32.xlu1 %v5603_v14, %s6852_s21 }
0x1baa   :  { %v5385_v31 = vpop.xlane.xlu1 %5384 }
0x1bab   :  { %v5387_v56 = vmul.f32 0.03125, %v5385_v31 }
0x1bac   :  { %v5382_v53 = vpop.xlane.xlu0 %5381 }
0x1bad   :  { %v5386_v59 = vmul.f32 0.03125, %v5382_v53  ;;  %v5389_v43 = vsub.f32 %v7870_v27, %v5387_v56  ;;  %v6806_v53 = vld [vmem:[%s7993_s1] sm:$0xff]  ;;  %s6863_s1 = smov [#allocation2]  }
0x1bae   :  { %v5623_v15 = vpop.permute.xlu1 %5622  ;;  %vm5713_vm10 = vcmp.gt.f32.partialorder %v6806_v53, 0.5  ;;  %s5867_s15 = sshll.u32 %s6863_s1, 4  ;;  %s5868_s15 = int_to_ptr.vmem [resolvable:$true] %s5867_s15 }
0x1baf   :  { %v5388_v48 = vsub.f32 %v7873_v28, %v5386_v59  ;;  %v5391_v40 = vmul.f32 %v5389_v43, %v5389_v43  ;;  %6639 = vmatprep.subr.mxu1 %v5623_v15  ;;  %s6807_s16 = scalar_lea.vmem %s5868_s15, 32  ;;  %p6812_p1 = scmp.lt.s32.totalorder %s5868_s15, %s5868_s15 }
0x1bb0   :  { %p6808_p0 = scmp.ne.s32.totalorder %s5868_s15, %s6807_s16  ;;  %p6813_p2 = scmp.lt.s32.totalorder %s6807_s16, %s6807_s16 }
0x1bb1   :  { %v5390_v29 = vmul.f32 %v5388_v48, %v5388_v48  ;;  %v5395_v33 = vsel %vm155_vm2, %v5391_v40, 0.0 }
0x1bb2   :  { %v5619_v47 = vpop.permute.xlu1 %5618  ;;  %p6814_p3 = por %p6813_p2, %p6812_p1 }
0x1bb3   :  { %v5392_v52 = vsel %vm155_vm2, %v5390_v29, 0.0 }
0x1bb4   :  { %5393 = vadd.xlane.f32.xlu0 %v5392_v52  ;;  %p6815_p4 = pnand %p6814_p3, %p6808_p0 }
0x1bb6   :  { %v5617_v32 = vpop.permute.xlu1 %5616 }
0x1bb8   :  { %5396 = vadd.xlane.f32.xlu0 %v5395_v33 }
0x1bce   :  { %5620 = vrot.lane.b32.xlu0 %v5605_v13, %s6852_s21 }
0x1bd2   :  { %5629 = vrot.lane.b32.xlu0 %v7948_v49, %s6852_s21 }
0x1c3d   :  { %v5394_v41 = vpop.xlane.xlu0 %5393 }
0x1c3e   :  { %v5398_v39 = vmul.f32 0.03125, %v5394_v41 }
0x1c40   :  { %v5400_v50 = vadd.f32 1e-05, %v5398_v39 }
0x1c41   :  { %v5397_v5 = vpop.xlane.xlu0 %5396 }
0x1c42   :  { %6793 = vrsqrt.f32 %v5400_v50  ;;  %v5399_v7 = vmul.f32 0.03125, %v5397_v5 }
0x1c44   :  { %v5401_v18 = vadd.f32 1e-05, %v5399_v7 }
0x1c45   :  { %v5621_v16 = vpop.permute.xlu0 %5620 }
0x1c46   :  { %6795 = vrsqrt.f32 %v5401_v18 }
0x1c49   :  { %v5630_v57 = vpop.permute.xlu0 %5629 }
0x1c4f   :  { %v6794_v58 = vpop.eup %6793 }
0x1c50   :  { %v5404_v0 = vmul.f32 %v6794_v58, %v5388_v48 }
0x1c52   :  { %v5410_v2 = vmul.f32 %v5409_v61, %v5404_v0 }
0x1c53   :  { %v6796_v42 = vpop.eup %6795 }
0x1c54   :  { %v5405_v3 = vmul.f32 %v6796_v42, %v5389_v43  ;;  %v5416_v45 = vadd.f32 %v5415_v8, %v5410_v2 }
0x1c56   :  { %v5411_v21 = vmul.f32 %v5409_v61, %v5405_v3  ;;  %6617 = vmatprep.mubr.msk.f32.mxu1 %vm155_vm2, %v5416_v45 }
0x1c58   :  { %v5417_v36 = vadd.f32 %v5415_v8, %v5411_v21 }
0x1c5a   :  { %6618 = vmatmul.mubr.msk.f32.vlgmr.msra.gmra.mxu1 %vm155_vm2, %v5417_v36 }
0x1c5b   :  { %6640 = vmatpush3.msra.mxu1 %v5623_v15 }
0x1c5c   :  { %6641 = vmatprep.subr.mxu1 %v5621_v16 }
0x1c5d   :  { %6642 = vmatpush3.msra.mxu1 %v5621_v16 }
0x1c5e   :  { %6643 = vmatprep.subr.mxu1 %v5619_v47 }
0x1c5f   :  { %6644 = vmatpush3.msra.mxu1 %v5619_v47 }
0x1c60   :  { %6645 = vmatprep.subr.mxu1 %v5617_v32 }
0x1c61   :  { %6646 = vmatpush3.msra.mxu1 %v5617_v32 }
0x1c62   :  { %6650 = vmatprep.subr.mxu1 %v6854_v1 }
0x1d1a   :  { %v6619_v19 = vpop.f32.mrf.mxu1 }
0x1d1b   :  { %v5500_v22 = vadd.f32 %v6619_v19, %v5421_v17 }
0x1d1c   :  { %v5494_v23 = vpop.f32.mrf.mxu1 }
0x1d1d   :  { %v5495_v24 = vadd.f32 %v5494_v23, %v5421_v17  ;;  %v5504_v51 = vmax.f32 %v5500_v22, 0.0 }
0x1d1f   :  { %v5503_v60 = vmax.f32 %v5495_v24, 0.0 }
0x1d21   :  { %6636 = vmatprep.mubr.msk.f32.mxu0 %vm1877_vm7, %v5503_v60 }
0x1d22   :  { %6637 = vmatmul.mubr.msk.f32.vlgmr.msra.gmra.mxu0 %vm1877_vm7, %v5504_v51 }
0x1de2   :  { %v6638_v35 = vpop.f32.mrf.mxu0 }
0x1de3   :  { %v5596_v34 = vadd.f32 %v6638_v35, %v7870_v27 }
0x1de4   :  { %v5586_v30 = vpop.f32.mrf.mxu0 }
0x1de5   :  { %v5595_v38 = vadd.f32 %v5586_v30, %v7873_v28  ;;  %v7959_v56 = vadd.f32 %v5600_v46, %v5596_v34 }
0x1de7   :  { %v7957_v31 = vadd.f32 %v5600_v46, %v5595_v38 }
0x1de9   :  { %6647 = vmatprep.mubr.msk.f32.mxu1 %vm155_vm2, %v7957_v31 }
0x1dea   :  { %6648 = vmatmul.mubr.msk.f32.vlgmr.msra.gmra.mxu1 %vm155_vm2, %v7959_v56 }
0x1deb   :  { %6651 = vmatpush3.msra.mxu1 %v5606_v6  ;;  %6658 = vmatprep.mubr.msk.f32.mxu1 %vm6856_vm3, %v6854_v1 }
0x1dec   :  { %6652 = vmatprep.subr.mxu1 %v6854_v1 }
0x1ded   :  { %6653 = vmatpush3.msra.mxu1 %v5605_v13 }
0x1dee   :  { %6654 = vmatprep.subr.mxu1 %v6854_v1 }
0x1def   :  { %6655 = vmatpush3.msra.mxu1 %v5604_v12 }
0x1df0   :  { %6656 = vmatprep.subr.mxu1 %v6854_v1 }
0x1df1   :  { %6657 = vmatpush3.msra.mxu1 %v5603_v14 }
0x1eaa   :  { %v6649_v27 = vpop.f32.mrf.mxu1 }
0x1eab   :  { %v5710_v28 = vadd.f32 %v6649_v27, %v5630_v57 }
0x1eac   :  { %v5704_v59 = vpop.f32.mrf.mxu1 }
0x1ead   :  { %v5716_v43 = vsel %vm5714_vm8, %v5710_v28, -1e+09  ;;  %v5705_v48 = vadd.f32 %v5704_v59, %v5630_v57 }
0x1eae   :  { %v5750_v1 = vsel %vm5717_vm9, %v5716_v43, -inf }
0x1eaf   :  { %v5751_v29 = vrot.slane %v5750_v1, 4  ;;  %v5715_v52 = vsel %vm5713_vm10, %v5705_v48, -1e+09 }
0x1eb0   :  { %v5718_v40 = vsel %vm5717_vm9, %v5715_v52, -inf }
0x1eb1   :  { %v5752_v33 = vmax.f32 %v5750_v1, %v5751_v29  ;;  %v5719_v37 = vrot.slane %v5718_v40, 4 }
0x1eb3   :  { %v5753_v9 = vrot.slane %v5752_v33, 2  ;;  %v5720_v44 = vmax.f32 %v5718_v40, %v5719_v37 }
0x1eb5   :  { %v5754_v11 = vmax.f32 %v5752_v33, %v5753_v9  ;;  %v5721_v10 = vrot.slane %v5720_v44, 2 }
0x1eb7   :  { %v5755_v4 = vrot.slane %v5754_v11, 1  ;;  %v5722_v54 = vmax.f32 %v5720_v44, %v5721_v10 }
0x1eb9   :  { %v5756_v55 = vmax.f32 %v5754_v11, %v5755_v4  ;;  %v5723_v41 = vrot.slane %v5722_v54, 1 }
0x1ebb   :  { %v5757_v39 = vsub.f32 %v5716_v43, %v5756_v55  ;;  %v5724_v50 = vmax.f32 %v5722_v54, %v5723_v41 }
0x1ebd   :  { %v5758_v5 = vmul.f32 1.442695, %v5757_v39  ;;  %v5725_v7 = vsub.f32 %v5715_v52, %v5724_v50 }
0x1ebf   :  { %6797 = vpow2.f32 %v5758_v5  ;;  %v5726_v18 = vmul.f32 1.442695, %v5725_v7 }
0x1ec1   :  { %6799 = vpow2.f32 %v5726_v18 }
0x1ecc   :  { %v6798_v61 = vpop.eup %6797 }
0x1ecd   :  { %v5760_v58 = vsel %vm5717_vm9, %v6798_v61, 0.0 }
0x1ece   :  { %v6800_v0 = vpop.eup %6799  ;;  %v5761_v8 = vrot.slane %v5760_v58, 4 }
0x1ecf   :  { %v5728_v2 = vsel %vm5717_vm9, %v6800_v0, 0.0 }
0x1ed0   :  { %v5762_v42 = vadd.f32 %v5761_v8, %v5760_v58  ;;  %v5729_v3 = vrot.slane %v5728_v2, 4 }
0x1ed2   :  { %v5763_v45 = vrot.slane %v5762_v42, 2  ;;  %v5730_v21 = vadd.f32 %v5729_v3, %v5728_v2 }
0x1ed4   :  { %v5764_v36 = vadd.f32 %v5763_v45, %v5762_v42  ;;  %v5731_v62 = vrot.slane %v5730_v21, 2 }
0x1ed6   :  { %v5765_v25 = vrot.slane %v5764_v36, 1  ;;  %v5732_v26 = vadd.f32 %v5731_v62, %v5730_v21 }
0x1ed8   :  { %v5766_v63 = vadd.f32 %v5765_v25, %v5764_v36  ;;  %v5733_v6 = vrot.slane %v5732_v26, 1 }
0x1eda   :  { %6801 = vrcp.f32 %v5766_v63  ;;  %v5734_v13 = vadd.f32 %v5733_v6, %v5732_v26 }
0x1edc   :  { %6803 = vrcp.f32 %v5734_v13 }
0x1ee7   :  { %v6802_v12 = vpop.eup %6801 }
0x1ee8   :  { %v5768_v14 = vmul.f32 %v6802_v12, %v6798_v61 }
0x1ee9   :  { %v6804_v15 = vpop.eup %6803 }
0x1eea   :  { %5771 = vperm.xlu0 %6675, %v5768_v14   ;;  %v5736_v16 = vmul.f32 %v6804_v15, %v6800_v0 }
0x1eec   :  { %5739 = vperm.xlu1 %6676, %v5736_v16  }
0x1f65   :  { %v5772_v17 = vpop.permute.xlu0 %5771 }
0x1f66   :  { %v5774_v19 = vmul.f32 %v5772_v17, %v7959_v56 }
0x1f67   :  { %v5740_v22 = vpop.permute.xlu1 %5739 }
0x1f68   :  { %v5775_v23 = vsel %vm155_vm2, %v5774_v19, 0.0  ;;  %v5742_v24 = vmul.f32 %v5740_v22, %v7957_v31 }
0x1f69   :  { %v5776_v60 = vrot.slane %v5775_v23, 4 }
0x1f6a   :  { %v5743_v51 = vsel %vm155_vm2, %v5742_v24, 0.0 }
0x1f6b   :  { %v5777_v47 = vadd.f32 %v5776_v60, %v5775_v23  ;;  %v5744_v32 = vrot.slane %v5743_v51, 4 }
0x1f6d   :  { %v5778_v35 = vrot.slane %v5777_v47, 2  ;;  %v5745_v34 = vadd.f32 %v5744_v32, %v5743_v51 }
0x1f6f   :  { %v5779_v46 = vadd.f32 %v5778_v35, %v5777_v47  ;;  %v5746_v30 = vrot.slane %v5745_v34, 2 }
0x1f71   :  { %v5780_v38 = vrot.slane %v5779_v46, 1  ;;  %v5747_v57 = vadd.f32 %v5746_v30, %v5745_v34 }
0x1f73   :  { %v5748_v20 = vrot.slane %v5747_v57, 1  ;;  %v5781_v27 = vadd.f32 %v5780_v38, %v5779_v46 }
0x1f75   :  { %v5749_v56 = vadd.f32 %v5748_v20, %v5747_v57 }
0x1f77   :  { %v5783_v28 = vsel %vm5782_vm11, %v5749_v56, %v5781_v27 }
0x1f78   :  { %6659 = vmatmul.mubr.msk.f32.vlgmr.msra.gmra.mxu1 %vm155_vm2, %v5783_v28  ;;  %5785 = vst.msk [vmem:[#allocation2] sm:$0x3] %vm5784_vm12, %v5783_v28 }
0x1f79   :  { %6818 = shalt.err (!%p6815_p4)
}
0x1f7a   :  { %5870 = dma.vmem_to_hbm [thread:$0]  %s5868_s15, 32, %s8000_s8, [#allocation3]   ;;  %vm5859_vm13 = vcmask 58368  }
0x1f7b   :  { %s6864_s19 = smov [#allocation4]  }
0x1f7c   :  { %s5877_s4 = sshll.u32 %s6864_s19, 4  ;;  %s5878_s4 = int_to_ptr.vmem [resolvable:$true] %s5877_s4 }
0x1f7d   :  { %s6827_s20 = scalar_lea.vmem %s5878_s4, 32  ;;  %p6832_p6 = scmp.lt.s32.totalorder %s5878_s4, %s5878_s4 }
0x1f7e   :  { %p6828_p5 = scmp.ne.s32.totalorder %s5878_s4, %s6827_s20  ;;  %p6833_p7 = scmp.lt.s32.totalorder %s6827_s20, %s6827_s20 }
0x1f80   :  { %p6834_p8 = por %p6833_p7, %p6832_p6 }
0x1f82   :  { %p6835_p9 = pnand %p6834_p8, %p6828_p5 }
0x2038   :  { %v5855_v31 = vpop.f32.mrf.mxu1 }
0x2039   :  { %v5856_v53 = vadd.f32 %v7948_v49, %v5855_v31 }
0x203a   :  { %v6660_v59 = vpop.f32.mrf.mxu1 }
0x203b   :  { %5860 = vst.msk [vmem:[#allocation4] sm:$0x3] %vm5859_vm13, %v5856_v53 }
0x203c   :  { %6838 = shalt.err (!%p6835_p9)
}
0x203d   :  { %5880 = dma.vmem_to_hbm [thread:$0]  %s5878_s4, 32, %s8001_s9, [#allocation5]  }
0x203e   :  { %6847 = dma.done.wait [#allocation3], 32  }
0x203f   :  { %6848 = vsyncadd [#allocation3], 4294967264 }
0x2040   :  { %6849 = dma.done.wait [#allocation5], 32  }
0x2041   :  { %6850 = vsyncadd [#allocation5], 4294967264 }
0x2042   :  { %5887 = vsyncpa [#allocation3], 1 }
0x2043   :  { %5888 = vsyncpa [#allocation5], 1 }

</bundles_post_ra>
